<compile_context>
chip_gen: v5e
topology: v5e:2x2
jax: 0.10.0
libtpu: 0.0.40
codegen_flags: <defaults>
</compile_context>

<pallas_src>
import numpy as np

import jax
import jax.numpy as jnp
from jax.experimental import pallas as pl
from jax.experimental.pallas import tpu as pltpu

LEAKY_SLOPE = 0.01        # F.leaky_relu default negative_slope

# ---------------------------------------------------------------------------
# Blocked-Toeplitz configuration (fixed by the module hyper-parameters)
#   conv1  : Conv1d(2, 32, 65, stride=8, dilation=1, padding=29)
#   conv2  : Conv1d(32, 64, 65, stride=8, dilation=2, padding=61)
#   deconv2: ConvTranspose1d(64, 32, 65, stride=8, dilation=1, padding=29, output_padding=1)
#   deconv1: ConvTranspose1d(32, 2, 65, stride=8, dilation=2, padding=61, output_padding=1)
# ---------------------------------------------------------------------------
_M_OUT = 8                         # every layer emits 8 blocked output rows
_G1, _P1, _OFF1 = 8, 64, 29        # conv1    Xe1 (9,128)  -> Y1 (M,256)
_G2, _P2, _OFF2 = 1, 8, 64         # conv2    Xe2 (24,256) -> Y2 (M,64)
_G3, _P3, _OFF3 = 8, 1, 4          # deconv2  Xe3 (16,64)  -> Y3 (M,256)
_G4, _P4, _OFF4 = 64, 8, 8         # deconv1  Xe4 (10,256) -> Y4 (M,128)

_N_ROWS1 = 9                       # (29 + 512 + 35) / 64
_N_ROWS2, _N_ROWS3, _N_ROWS4 = 24, 16, 10   # M_OUT + full_tap_count - 1
_ROW2 = _OFF2 // _P2               # 8 : rows of Xe2 that hold Y1
_ROW3 = _OFF3 // _P3               # 4 : rows of Xe3 that hold Y2
_ROW4 = _OFF4 // _P4               # 1 : rows of Xe4 that hold Y3

# layer-2 active taps: only 8-row windows intersecting the y1 band rows [8,16)
_J2_START, _N_TAPS2 = 1, 15        # u2 is pre-sliced host-side to these taps


# ---------------------------------------------------------------------------
# Host-side weight preparation (runs once)
# ---------------------------------------------------------------------------
def _build_diagonals(w, *, stride, dilation, pad, P, G, o_elems, transposed,
                     in_ci_major=False, out_co_major=False):
    """Banded weight stack U of shape (J, P*Cin, G*Cout) such that

        y[m*G + r, co] = sum_j sum_{p,ci} xfull[(m+j)*P + p, ci] * U[j, row, col]

    with xfull[i] = x[i - o_elems] (zero outside [0, L_in)).
      row = ci*P + p  if in_ci_major  else p*Cin + ci
      col = co*G + r  if out_co_major else r*Cout + co
    conv:        w has PyTorch layout (Cout, Cin, K)
    transposed:  w has PyTorch layout (Cin, Cout, K)
    """
    if transposed:
        Cin, Cout, K = w.shape
        assert G == P * stride
    else:
        Cout, Cin, K = w.shape
        assert P == G * stride

    entries = []
    jmax = 0
    for r in range(G):
        for k in range(K):
            if transposed:
                num = r + pad - k * dilation
                if num % stride != 0:          # tap never hits output phase r
                    continue
                flat = num // stride + o_elems
                blk = w[:, :, k]               # (Cin, Cout)
            else:
                flat = r * stride + k * dilation - pad + o_elems
                blk = w[:, :, k].T             # (Cin, Cout)
            assert flat >= 0, "o_elems too small"
            j, p = divmod(flat, P)
            entries.append((j, p, r, blk))
            jmax = max(jmax, j)

    U = np.zeros((jmax + 1, P * Cin, G * Cout), np.float32)
    ci = np.arange(Cin)
    co = np.arange(Cout)
    for j, p, r, blk in entries:
        rows = ci * P + p if in_ci_major else p * Cin + ci
        cols = co * G + r if out_co_major else r * Cout + co
        U[j][np.ix_(rows, cols)] += blk
    return U


def init_params(key):
    ks = jax.random.split(key, 8)
    scale = 0.05
    return {
        "w1": scale * jax.random.normal(ks[0], (32, 2, 65), jnp.float32),
        "b1": scale * jax.random.normal(ks[1], (32,), jnp.float32),
        "w2": scale * jax.random.normal(ks[2], (64, 32, 65), jnp.float32),
        "b2": scale * jax.random.normal(ks[3], (64,), jnp.float32),
        "dw2": scale * jax.random.normal(ks[4], (64, 32, 65), jnp.float32),
        "db2": scale * jax.random.normal(ks[5], (32,), jnp.float32),
        "dw1": scale * jax.random.normal(ks[6], (32, 2, 65), jnp.float32),
        "db1": scale * jax.random.normal(ks[7], (2,), jnp.float32),
    }


def prepare_params(params):
    """Hoisted one-time weight reformatting (banded matrices, bf16, tiled biases)."""
    w1 = np.asarray(params["w1"], np.float32)
    w2 = np.asarray(params["w2"], np.float32)
    dw2 = np.asarray(params["dw2"], np.float32)
    dw1 = np.asarray(params["dw1"], np.float32)
    b1 = np.asarray(params["b1"], np.float32)
    b2 = np.asarray(params["b2"], np.float32)
    db2 = np.asarray(params["db2"], np.float32)
    db1 = np.asarray(params["db1"], np.float32)

    u1 = _build_diagonals(w1, stride=8, dilation=1, pad=29, P=_P1, G=_G1,
                          o_elems=_OFF1, transposed=False, in_ci_major=True)
    u2 = _build_diagonals(w2, stride=8, dilation=2, pad=61, P=_P2, G=_G2,
                          o_elems=_OFF2, transposed=False)
    u3 = _build_diagonals(dw2, stride=8, dilation=1, pad=29, P=_P3, G=_G3,
                          o_elems=_OFF3, transposed=True)
    u4 = _build_diagonals(dw1, stride=8, dilation=2, pad=61, P=_P4, G=_G4,
                          o_elems=_OFF4, transposed=True, out_co_major=True)

    assert u1.shape == (2, 128, 256), u1.shape
    assert u2.shape == (17, 256, 64), u2.shape
    assert u3.shape == (9, 64, 256), u3.shape
    assert u4.shape == (3, 256, 128), u4.shape

    # Drop layer-2 taps whose lhs window lies entirely in the zero halo.
    u2 = u2[_J2_START:_J2_START + _N_TAPS2]
    assert u2.shape == (15, 256, 64), u2.shape

    bf = lambda a: jnp.asarray(a, jnp.bfloat16)
    return {
        "u1": bf(u1), "u2": bf(u2), "u3": bf(u3), "u4": bf(u4),
        "b1": jnp.asarray(np.tile(b1, _G1)[None, :], jnp.float32),
        "b2": jnp.asarray(np.tile(b2, _G2)[None, :], jnp.float32),
        "b3": jnp.asarray(np.tile(db2, _G3)[None, :], jnp.float32),
        "b4": jnp.asarray(np.repeat(db1, _G4)[None, :], jnp.float32),  # co-major
    }


# ---------------------------------------------------------------------------
# Fused Pallas kernel: the whole autoencoder for `batch_tile` batch elements
# ---------------------------------------------------------------------------
def _dilated_convae_kernel(x_ref, u1_ref, b1_ref, u2_ref, b2_ref, u3_ref, b3_ref,
                           u4_ref, b4_ref, o_ref, xe2_ref, xe3_ref, xe4_ref):
    f32, bf16 = jnp.float32, jnp.bfloat16
    BT = x_ref.shape[0]
    M = BT * _M_OUT

    def leaky(v):
        return jnp.where(v >= 0.0, v, LEAKY_SLOPE * v)

    def banded_matmul(src_ref, u_ref, b_ref, j_start):
        """acc[M, N] = bias + sum_t  src[:, j_start+t : j_start+t+8, :] @ U[t]"""
        n_taps, K = u_ref.shape[0], u_ref.shape[1]

        def lhs(t):                                   # (BT, 8, K) bf16 -> (M, K)
            j = j_start + t
            return src_ref[:, j:j + _M_OUT, :].reshape(M, K)

        acc = jnp.dot(lhs(0), u_ref[0], preferred_element_type=f32) + b_ref[...]
        for t in range(1, n_taps):                    # static unroll, contiguous MXU chain
            acc = acc + jnp.dot(lhs(t), u_ref[t], preferred_element_type=f32)
        return acc

    def stage(xe_ref, y, row0):
        """Zero only the halo rows and write the bf16 y band once."""
        n_rows, K = xe_ref.shape[1], xe_ref.shape[2]
        xe_ref[:, :row0, :] = jnp.zeros((BT, row0, K), bf16)
        xe_ref[:, row0 + _M_OUT:, :] = jnp.zeros((BT, n_rows - row0 - _M_OUT, K), bf16)
        xe_ref[:, row0:row0 + _M_OUT, :] = y.astype(bf16).reshape(BT, _M_OUT, K)

    # ---- layer 1: conv1 + leaky_relu --------------------------------------
    y1 = leaky(banded_matmul(x_ref, u1_ref, b1_ref, 0))
    # ---- layer 2: conv2 + leaky_relu --------------------------------------
    stage(xe2_ref, y1, _ROW2)
    y2 = leaky(banded_matmul(xe2_ref, u2_ref, b2_ref, _J2_START))
    # ---- layer 3: deconv2 + leaky_relu ------------------------------------
    stage(xe3_ref, y2, _ROW3)
    y3 = leaky(banded_matmul(xe3_ref, u3_ref, b3_ref, 0))
    # ---- layer 4: deconv1 (no activation) ---------------------------------
    stage(xe4_ref, y3, _ROW4)
    y4 = banded_matmul(xe4_ref, u4_ref, b4_ref, 0)
    o_ref[...] = y4.reshape(BT, _M_OUT, o_ref.shape[2])


def dilated_convae_forward(prep, x, *, batch_tile=None):
    """x: (B, 2, 512) float32 NCL  ->  (B, 2, 512) float32 NCL."""
    B, C, L = x.shape
    assert C == 2 and L == 512, "kernel is specialised to the module's (2, 512) input"

    if batch_tile is None:
        # Fold the whole (small) batch into one fat grid step; cap at 32 so a
        # matmul is at most (256, K).  On v7x pass batch_tile=B//2 so the
        # 2-step "parallel" grid keeps both TensorCores busy.
        batch_tile = B if B <= 32 else 32
    Bp = ((B + batch_tile - 1) // batch_tile) * batch_tile
    if Bp != B:
        x = jnp.concatenate([x, jnp.zeros((Bp - B, C, L), x.dtype)], axis=0)
    n_steps = Bp // batch_tile

    # Input pack (ci-major blocked layout, bf16): pad + reshape + 64-contiguous transpose.
    xp = jnp.pad(x, ((0, 0), (0, 0), (_OFF1, _N_ROWS1 * _P1 - L - _OFF1)))
    xe1 = (xp.reshape(Bp, C, _N_ROWS1, _P1)
             .transpose(0, 2, 1, 3)
             .reshape(Bp, _N_ROWS1, C * _P1)
             .astype(jnp.bfloat16))

    # Advisory cost hint so XLA can overlap the surrounding pack/unpack ops.
    macs = _M_OUT * sum(int(np.prod(prep[k].shape)) for k in ("u1", "u2", "u3", "u4"))
    weight_bytes = sum(int(np.prod(prep[k].shape)) * prep[k].dtype.itemsize
                       for k in ("u1", "u2", "u3", "u4", "b1", "b2", "b3", "b4"))
    cost = pl.CostEstimate(
        flops=2 * macs * Bp,
        transcendentals=0,
        bytes_accessed=weight_bytes + int(xe1.size) * 2 + Bp * _M_OUT * _G4 * 2 * 4)

    const3 = lambda s: (0, 0, 0)
    const2 = lambda s: (0, 0)

    y4 = pl.pallas_call(
        _dilated_convae_kernel,
        out_shape=jax.ShapeDtypeStruct((Bp, _M_OUT, _G4 * 2), jnp.float32),
        grid=(n_steps,),
        in_specs=[
            pl.BlockSpec((batch_tile, _N_ROWS1, C * _P1), lambda s: (s, 0, 0)),
            pl.BlockSpec(prep["u1"].shape, const3),
            pl.BlockSpec(prep["b1"].shape, const2),
            pl.BlockSpec(prep["u2"].shape, const3),
            pl.BlockSpec(prep["b2"].shape, const2),
            pl.BlockSpec(prep["u3"].shape, const3),
            pl.BlockSpec(prep["b3"].shape, const2),
            pl.BlockSpec(prep["u4"].shape, const3),
            pl.BlockSpec(prep["b4"].shape, const2),
        ],
        out_specs=pl.BlockSpec((batch_tile, _M_OUT, _G4 * 2), lambda s: (s, 0, 0)),
        scratch_shapes=[
            pltpu.VMEM((batch_tile, _N_ROWS2, _P2 * 32), jnp.bfloat16),
            pltpu.VMEM((batch_tile, _N_ROWS3, _P3 * 64), jnp.bfloat16),
            pltpu.VMEM((batch_tile, _N_ROWS4, _P4 * 32), jnp.bfloat16),
        ],
        compiler_params=pltpu.CompilerParams(
            dimension_semantics=("parallel",)),
        cost_estimate=cost,
    )(xe1, prep["u1"], prep["b1"], prep["u2"], prep["b2"],
      prep["u3"], prep["b3"], prep["u4"], prep["b4"])

    # Output unpack (co-major blocked layout): reshape + 64-contiguous transpose.
    out = (y4.reshape(Bp, _M_OUT, 2, _G4)
             .transpose(0, 2, 1, 3)
             .reshape(Bp, 2, _M_OUT * _G4))
    return out[:B]


# ---------------------------------------------------------------------------
# Pure-JAX reference (PyTorch semantics) used only for validation
# ---------------------------------------------------------------------------
def _leaky_ref(x):
    return jnp.where(x >= 0.0, x, LEAKY_SLOPE * x)


def _conv1d_ref(x, w, b, stride, dilation, pad):
    out = jax.lax.conv_general_dilated(
        x, w, window_strides=(stride,), padding=[(pad, pad)],
        rhs_dilation=(dilation,), dimension_numbers=("NCH", "OIH", "NCH"),
        precision=jax.lax.Precision.HIGHEST)
    return out + b[None, :, None]


def _deconv1d_ref(x, w, b, stride, dilation, pad, outpad):
    K = w.shape[-1]
    w_f = jnp.flip(jnp.transpose(w, (1, 0, 2)), axis=-1)       # (Cout, Cin, K)
    pl_ = dilation * (K - 1) - pad
    out = jax.lax.conv_general_dilated(
        x, w_f, window_strides=(1,), padding=[(pl_, pl_ + outpad)],
        lhs_dilation=(stride,), rhs_dilation=(dilation,),
        dimension_numbers=("NCH", "OIH", "NCH"),
        precision=jax.lax.Precision.HIGHEST)
    return out + b[None, :, None]


def reference_forward(params, x, low=None):
    """low=jnp.bfloat16 reproduces the kernel's bf16 rounding of matmul inputs."""
    def c(a):
        return a.astype(low).astype(jnp.float32) if low is not None else a

    h = _leaky_ref(_conv1d_ref(c(x), c(params["w1"]), params["b1"], 8, 1, 29))
    h = _leaky_ref(_conv1d_ref(c(h), c(params["w2"]), params["b2"], 8, 2, 61))
    h = _leaky_ref(_deconv1d_ref(c(h), c(params["dw2"]), params["db2"], 8, 1, 29, 1))
    h = _deconv1d_ref(c(h), c(params["dw1"]), params["db1"], 8, 2, 61, 1)
    return h


# ---------------------------------------------------------------------------
if __name__ == "__main__":
    key = jax.random.PRNGKey(0)
    pkey, xkey = jax.random.split(key)
    params = init_params(pkey)
    prep = prepare_params(params)

    # input: (batch=2, channels=2, length=512) -- NCL, PyTorch convention
    x = jax.random.normal(xkey, (2, 2, 512), jnp.float32)

    fwd = jax.jit(dilated_convae_forward)
    out = jax.block_until_ready(fwd(prep, x))

    assert out.shape == (2, 2, 512), out.shape
    assert bool(jnp.all(jnp.isfinite(out)))

    # Tight check against a precision-matched (bf16 matmul inputs, f32 accum) reference.
    ref_bf16 = reference_forward(params, x, low=jnp.bfloat16)
    err_matched = float(jnp.max(jnp.abs(out - ref_bf16)))
    assert err_matched < 3e-3, f"matched-precision error too large: {err_matched}"

    # Loose sanity check against the exact f32 PyTorch-semantics reference.
    ref_f32 = reference_forward(params, x, low=None)
    err_f32 = float(jnp.max(jnp.abs(out - ref_f32)))
    assert err_f32 < 1.5e-1, f"f32 reference error too large: {err_f32}"

    print("KERNEL_OK")
</pallas_src>

<mosaic_0001>
module attributes {stable_mosaic.version = 11 : i64} {
  func.func @_dilated_convae_kernel(%arg0: i32, %arg1: memref<2x9x128xbf16, #tpu.memory_space<vmem>>, %arg2: memref<2x128x256xbf16, #tpu.memory_space<vmem>>, %arg3: memref<1x256xf32, #tpu.memory_space<vmem>>, %arg4: memref<15x256x64xbf16, #tpu.memory_space<vmem>>, %arg5: memref<1x64xf32, #tpu.memory_space<vmem>>, %arg6: memref<9x64x256xbf16, #tpu.memory_space<vmem>>, %arg7: memref<1x256xf32, #tpu.memory_space<vmem>>, %arg8: memref<3x256x128xbf16, #tpu.memory_space<vmem>>, %arg9: memref<1x128xf32, #tpu.memory_space<vmem>>, %arg10: memref<2x8x128xf32, #tpu.memory_space<vmem>>, %arg11: memref<2x24x256xbf16, #tpu.memory_space<vmem>>, %arg12: memref<2x16x64xbf16, #tpu.memory_space<vmem>>, %arg13: memref<2x10x256xbf16, #tpu.memory_space<vmem>>) attributes {dimension_semantics = [#tpu.dimension_semantics<parallel>], iteration_bounds = array<i64: 1>, scalar_prefetch = 0 : i64, scratch_operands = 3 : i64, tpu.core_type = #tpu.core_type<tc>, window_params = [{transform_indices = @transform_0, window_bounds = array<i64: 2, 9, 128>}, {pipeline_mode = #tpu.pipeline_mode<synchronous>, transform_indices = @transform_1, window_bounds = array<i64: 2, 128, 256>}, {pipeline_mode = #tpu.pipeline_mode<synchronous>, transform_indices = @transform_2, window_bounds = array<i64: 1, 256>}, {pipeline_mode = #tpu.pipeline_mode<synchronous>, transform_indices = @transform_3, window_bounds = array<i64: 15, 256, 64>}, {pipeline_mode = #tpu.pipeline_mode<synchronous>, transform_indices = @transform_4, window_bounds = array<i64: 1, 64>}, {pipeline_mode = #tpu.pipeline_mode<synchronous>, transform_indices = @transform_5, window_bounds = array<i64: 9, 64, 256>}, {pipeline_mode = #tpu.pipeline_mode<synchronous>, transform_indices = @transform_6, window_bounds = array<i64: 1, 256>}, {pipeline_mode = #tpu.pipeline_mode<synchronous>, transform_indices = @transform_7, window_bounds = array<i64: 3, 256, 128>}, {pipeline_mode = #tpu.pipeline_mode<synchronous>, transform_indices = @transform_8, window_bounds = array<i64: 1, 128>}, {transform_indices = @transform_9, window_bounds = array<i64: 2, 8, 128>}]} {
    %c0 = arith.constant 0 : index
    %c0_0 = arith.constant 0 : index
    %c0_1 = arith.constant 0 : index
    %0 = vector.load %arg1[%c0, %c0_0, %c0_1] : memref<2x9x128xbf16, #tpu.memory_space<vmem>>, vector<2x8x128xbf16>
    %1 = vector.shape_cast %0 : vector<2x8x128xbf16> to vector<16x128xbf16>
    %c0_2 = arith.constant 0 : index
    %c0_3 = arith.constant 0 : index
    %c0_4 = arith.constant 0 : index
    %2 = vector.load %arg2[%c0_2, %c0_3, %c0_4] : memref<2x128x256xbf16, #tpu.memory_space<vmem>>, vector<1x128x256xbf16>
    %3 = vector.shape_cast %2 : vector<1x128x256xbf16> to vector<128x256xbf16>
    %cst = arith.constant dense<0.000000e+00> : vector<16x256xf32>
    %4 = tpu.matmul %1, %3, %cst {dimension_numbers = #tpu.dot_dimension_numbers<[1], [0], [0], [1], [0, 0, 1, 1], [], []>} : vector<16x128xbf16>, vector<128x256xbf16>, vector<16x256xf32> -> vector<16x256xf32>
    %c0_5 = arith.constant 0 : index
    %c0_6 = arith.constant 0 : index
    %5 = vector.load %arg3[%c0_5, %c0_6] : memref<1x256xf32, #tpu.memory_space<vmem>>, vector<1x256xf32>
    %6 = vector.broadcast %5 : vector<1x256xf32> to vector<16x256xf32>
    %7 = arith.addf %4, %6 : vector<16x256xf32>
    %c0_7 = arith.constant 0 : index
    %c1 = arith.constant 1 : index
    %c0_8 = arith.constant 0 : index
    %8 = vector.load %arg1[%c0_7, %c1, %c0_8] : memref<2x9x128xbf16, #tpu.memory_space<vmem>>, vector<2x8x128xbf16>
    %9 = vector.shape_cast %8 : vector<2x8x128xbf16> to vector<16x128xbf16>
    %c1_9 = arith.constant 1 : index
    %c0_10 = arith.constant 0 : index
    %c0_11 = arith.constant 0 : index
    %10 = vector.load %arg2[%c1_9, %c0_10, %c0_11] : memref<2x128x256xbf16, #tpu.memory_space<vmem>>, vector<1x128x256xbf16>
    %11 = vector.shape_cast %10 : vector<1x128x256xbf16> to vector<128x256xbf16>
    %cst_12 = arith.constant dense<0.000000e+00> : vector<16x256xf32>
    %12 = tpu.matmul %9, %11, %cst_12 {dimension_numbers = #tpu.dot_dimension_numbers<[1], [0], [0], [1], [0, 0, 1, 1], [], []>} : vector<16x128xbf16>, vector<128x256xbf16>, vector<16x256xf32> -> vector<16x256xf32>
    %13 = arith.addf %7, %12 : vector<16x256xf32>
    %cst_13 = arith.constant 0.000000e+00 : f32
    %14 = vector.broadcast %cst_13 : f32 to vector<16x256xf32>
    %15 = arith.cmpf oge, %13, %14 : vector<16x256xf32>
    %cst_14 = arith.constant 0.00999999977 : f32
    %16 = vector.broadcast %cst_14 : f32 to vector<16x256xf32>
    %17 = arith.mulf %16, %13 : vector<16x256xf32>
    %18 = arith.select %15, %13, %17 : vector<16x256xi1>, vector<16x256xf32>
    %cst_15 = arith.constant 0.000000e+00 : bf16
    %19 = vector.broadcast %cst_15 : bf16 to vector<2x8x256xbf16>
    %c0_16 = arith.constant 0 : index
    %c0_17 = arith.constant 0 : index
    %c0_18 = arith.constant 0 : index
    %20 = vector.load %arg11[%c0_16, %c0_17, %c0_18] : memref<2x24x256xbf16, #tpu.memory_space<vmem>>, vector<2x8x256xbf16>
    tpu.vector_store %arg11[%c0_16, %c0_17, %c0_18], %19 {strides = array<i32>} : memref<2x24x256xbf16, #tpu.memory_space<vmem>>, vector<2x8x256xbf16>,
    %cst_19 = arith.constant 0.000000e+00 : bf16
    %21 = vector.broadcast %cst_19 : bf16 to vector<2x8x256xbf16>
    %c0_20 = arith.constant 0 : index
    %c16 = arith.constant 16 : index
    %c0_21 = arith.constant 0 : index
    %22 = vector.load %arg11[%c0_20, %c16, %c0_21] : memref<2x24x256xbf16, #tpu.memory_space<vmem>>, vector<2x8x256xbf16>
    tpu.vector_store %arg11[%c0_20, %c16, %c0_21], %21 {strides = array<i32>} : memref<2x24x256xbf16, #tpu.memory_space<vmem>>, vector<2x8x256xbf16>,
    %23 = arith.truncf %18 : vector<16x256xf32> to vector<16x256xbf16>
    %24 = vector.shape_cast %23 : vector<16x256xbf16> to vector<2x8x256xbf16>
    %c0_22 = arith.constant 0 : index
    %c8 = arith.constant 8 : index
    %c0_23 = arith.constant 0 : index
    %25 = vector.load %arg11[%c0_22, %c8, %c0_23] : memref<2x24x256xbf16, #tpu.memory_space<vmem>>, vector<2x8x256xbf16>
    tpu.vector_store %arg11[%c0_22, %c8, %c0_23], %24 {strides = array<i32>} : memref<2x24x256xbf16, #tpu.memory_space<vmem>>, vector<2x8x256xbf16>,
    %c0_24 = arith.constant 0 : index
    %c1_25 = arith.constant 1 : index
    %c0_26 = arith.constant 0 : index
    %26 = vector.load %arg11[%c0_24, %c1_25, %c0_26] : memref<2x24x256xbf16, #tpu.memory_space<vmem>>, vector<2x8x256xbf16>
    %27 = vector.shape_cast %26 : vector<2x8x256xbf16> to vector<16x256xbf16>
    %c0_27 = arith.constant 0 : index
    %c0_28 = arith.constant 0 : index
    %c0_29 = arith.constant 0 : index
    %28 = vector.load %arg4[%c0_27, %c0_28, %c0_29] : memref<15x256x64xbf16, #tpu.memory_space<vmem>>, vector<1x256x64xbf16>
    %29 = vector.shape_cast %28 : vector<1x256x64xbf16> to vector<256x64xbf16>
    %cst_30 = arith.constant dense<0.000000e+00> : vector<16x64xf32>
    %30 = tpu.matmul %27, %29, %cst_30 {dimension_numbers = #tpu.dot_dimension_numbers<[1], [0], [0], [1], [0, 0, 1, 1], [], []>} : vector<16x256xbf16>, vector<256x64xbf16>, vector<16x64xf32> -> vector<16x64xf32>
    %c0_31 = arith.constant 0 : index
    %c0_32 = arith.constant 0 : index
    %31 = vector.load %arg5[%c0_31, %c0_32] : memref<1x64xf32, #tpu.memory_space<vmem>>, vector<1x64xf32>
    %32 = vector.broadcast %31 : vector<1x64xf32> to vector<16x64xf32>
    %33 = arith.addf %30, %32 : vector<16x64xf32>
    %c0_33 = arith.constant 0 : index
    %c2 = arith.constant 2 : index
    %c0_34 = arith.constant 0 : index
    %34 = vector.load %arg11[%c0_33, %c2, %c0_34] : memref<2x24x256xbf16, #tpu.memory_space<vmem>>, vector<2x8x256xbf16>
    %35 = vector.shape_cast %34 : vector<2x8x256xbf16> to vector<16x256xbf16>
    %c1_35 = arith.constant 1 : index
    %c0_36 = arith.constant 0 : index
    %c0_37 = arith.constant 0 : index
    %36 = vector.load %arg4[%c1_35, %c0_36, %c0_37] : memref<15x256x64xbf16, #tpu.memory_space<vmem>>, vector<1x256x64xbf16>
    %37 = vector.shape_cast %36 : vector<1x256x64xbf16> to vector<256x64xbf16>
    %cst_38 = arith.constant dense<0.000000e+00> : vector<16x64xf32>
    %38 = tpu.matmul %35, %37, %cst_38 {dimension_numbers = #tpu.dot_dimension_numbers<[1], [0], [0], [1], [0, 0, 1, 1], [], []>} : vector<16x256xbf16>, vector<256x64xbf16>, vector<16x64xf32> -> vector<16x64xf32>
    %39 = arith.addf %33, %38 : vector<16x64xf32>
    %c0_39 = arith.constant 0 : index
    %c3 = arith.constant 3 : index
    %c0_40 = arith.constant 0 : index
    %40 = vector.load %arg11[%c0_39, %c3, %c0_40] : memref<2x24x256xbf16, #tpu.memory_space<vmem>>, vector<2x8x256xbf16>
    %41 = vector.shape_cast %40 : vector<2x8x256xbf16> to vector<16x256xbf16>
    %c2_41 = arith.constant 2 : index
    %c0_42 = arith.constant 0 : index
    %c0_43 = arith.constant 0 : index
    %42 = vector.load %arg4[%c2_41, %c0_42, %c0_43] : memref<15x256x64xbf16, #tpu.memory_space<vmem>>, vector<1x256x64xbf16>
    %43 = vector.shape_cast %42 : vector<1x256x64xbf16> to vector<256x64xbf16>
    %cst_44 = arith.constant dense<0.000000e+00> : vector<16x64xf32>
    %44 = tpu.matmul %41, %43, %cst_44 {dimension_numbers = #tpu.dot_dimension_numbers<[1], [0], [0], [1], [0, 0, 1, 1], [], []>} : vector<16x256xbf16>, vector<256x64xbf16>, vector<16x64xf32> -> vector<16x64xf32>
    %45 = arith.addf %39, %44 : vector<16x64xf32>
    %c0_45 = arith.constant 0 : index
    %c4 = arith.constant 4 : index
    %c0_46 = arith.constant 0 : index
    %46 = vector.load %arg11[%c0_45, %c4, %c0_46] : memref<2x24x256xbf16, #tpu.memory_space<vmem>>, vector<2x8x256xbf16>
    %47 = vector.shape_cast %46 : vector<2x8x256xbf16> to vector<16x256xbf16>
    %c3_47 = arith.constant 3 : index
    %c0_48 = arith.constant 0 : index
    %c0_49 = arith.constant 0 : index
    %48 = vector.load %arg4[%c3_47, %c0_48, %c0_49] : memref<15x256x64xbf16, #tpu.memory_space<vmem>>, vector<1x256x64xbf16>
    %49 = vector.shape_cast %48 : vector<1x256x64xbf16> to vector<256x64xbf16>
    %cst_50 = arith.constant dense<0.000000e+00> : vector<16x64xf32>
    %50 = tpu.matmul %47, %49, %cst_50 {dimension_numbers = #tpu.dot_dimension_numbers<[1], [0], [0], [1], [0, 0, 1, 1], [], []>} : vector<16x256xbf16>, vector<256x64xbf16>, vector<16x64xf32> -> vector<16x64xf32>
    %51 = arith.addf %45, %50 : vector<16x64xf32>
    %c0_51 = arith.constant 0 : index
    %c5 = arith.constant 5 : index
    %c0_52 = arith.constant 0 : index
    %52 = vector.load %arg11[%c0_51, %c5, %c0_52] : memref<2x24x256xbf16, #tpu.memory_space<vmem>>, vector<2x8x256xbf16>
    %53 = vector.shape_cast %52 : vector<2x8x256xbf16> to vector<16x256xbf16>
    %c4_53 = arith.constant 4 : index
    %c0_54 = arith.constant 0 : index
    %c0_55 = arith.constant 0 : index
    %54 = vector.load %arg4[%c4_53, %c0_54, %c0_55] : memref<15x256x64xbf16, #tpu.memory_space<vmem>>, vector<1x256x64xbf16>
    %55 = vector.shape_cast %54 : vector<1x256x64xbf16> to vector<256x64xbf16>
    %cst_56 = arith.constant dense<0.000000e+00> : vector<16x64xf32>
    %56 = tpu.matmul %53, %55, %cst_56 {dimension_numbers = #tpu.dot_dimension_numbers<[1], [0], [0], [1], [0, 0, 1, 1], [], []>} : vector<16x256xbf16>, vector<256x64xbf16>, vector<16x64xf32> -> vector<16x64xf32>
    %57 = arith.addf %51, %56 : vector<16x64xf32>
    %c0_57 = arith.constant 0 : index
    %c6 = arith.constant 6 : index
    %c0_58 = arith.constant 0 : index
    %58 = vector.load %arg11[%c0_57, %c6, %c0_58] : memref<2x24x256xbf16, #tpu.memory_space<vmem>>, vector<2x8x256xbf16>
    %59 = vector.shape_cast %58 : vector<2x8x256xbf16> to vector<16x256xbf16>
    %c5_59 = arith.constant 5 : index
    %c0_60 = arith.constant 0 : index
    %c0_61 = arith.constant 0 : index
    %60 = vector.load %arg4[%c5_59, %c0_60, %c0_61] : memref<15x256x64xbf16, #tpu.memory_space<vmem>>, vector<1x256x64xbf16>
    %61 = vector.shape_cast %60 : vector<1x256x64xbf16> to vector<256x64xbf16>
    %cst_62 = arith.constant dense<0.000000e+00> : vector<16x64xf32>
    %62 = tpu.matmul %59, %61, %cst_62 {dimension_numbers = #tpu.dot_dimension_numbers<[1], [0], [0], [1], [0, 0, 1, 1], [], []>} : vector<16x256xbf16>, vector<256x64xbf16>, vector<16x64xf32> -> vector<16x64xf32>
    %63 = arith.addf %57, %62 : vector<16x64xf32>
    %c0_63 = arith.constant 0 : index
    %c7 = arith.constant 7 : index
    %c0_64 = arith.constant 0 : index
    %64 = vector.load %arg11[%c0_63, %c7, %c0_64] : memref<2x24x256xbf16, #tpu.memory_space<vmem>>, vector<2x8x256xbf16>
    %65 = vector.shape_cast %64 : vector<2x8x256xbf16> to vector<16x256xbf16>
    %c6_65 = arith.constant 6 : index
    %c0_66 = arith.constant 0 : index
    %c0_67 = arith.constant 0 : index
    %66 = vector.load %arg4[%c6_65, %c0_66, %c0_67] : memref<15x256x64xbf16, #tpu.memory_space<vmem>>, vector<1x256x64xbf16>
    %67 = vector.shape_cast %66 : vector<1x256x64xbf16> to vector<256x64xbf16>
    %cst_68 = arith.constant dense<0.000000e+00> : vector<16x64xf32>
    %68 = tpu.matmul %65, %67, %cst_68 {dimension_numbers = #tpu.dot_dimension_numbers<[1], [0], [0], [1], [0, 0, 1, 1], [], []>} : vector<16x256xbf16>, vector<256x64xbf16>, vector<16x64xf32> -> vector<16x64xf32>
    %69 = arith.addf %63, %68 : vector<16x64xf32>
    %c0_69 = arith.constant 0 : index
    %c8_70 = arith.constant 8 : index
    %c0_71 = arith.constant 0 : index
    %70 = vector.load %arg11[%c0_69, %c8_70, %c0_71] : memref<2x24x256xbf16, #tpu.memory_space<vmem>>, vector<2x8x256xbf16>
    %71 = vector.shape_cast %70 : vector<2x8x256xbf16> to vector<16x256xbf16>
    %c7_72 = arith.constant 7 : index
    %c0_73 = arith.constant 0 : index
    %c0_74 = arith.constant 0 : index
    %72 = vector.load %arg4[%c7_72, %c0_73, %c0_74] : memref<15x256x64xbf16, #tpu.memory_space<vmem>>, vector<1x256x64xbf16>
    %73 = vector.shape_cast %72 : vector<1x256x64xbf16> to vector<256x64xbf16>
    %cst_75 = arith.constant dense<0.000000e+00> : vector<16x64xf32>
    %74 = tpu.matmul %71, %73, %cst_75 {dimension_numbers = #tpu.dot_dimension_numbers<[1], [0], [0], [1], [0, 0, 1, 1], [], []>} : vector<16x256xbf16>, vector<256x64xbf16>, vector<16x64xf32> -> vector<16x64xf32>
    %75 = arith.addf %69, %74 : vector<16x64xf32>
    %c0_76 = arith.constant 0 : index
    %c9 = arith.constant 9 : index
    %c0_77 = arith.constant 0 : index
    %76 = vector.load %arg11[%c0_76, %c9, %c0_77] : memref<2x24x256xbf16, #tpu.memory_space<vmem>>, vector<2x8x256xbf16>
    %77 = vector.shape_cast %76 : vector<2x8x256xbf16> to vector<16x256xbf16>
    %c8_78 = arith.constant 8 : index
    %c0_79 = arith.constant 0 : index
    %c0_80 = arith.constant 0 : index
    %78 = vector.load %arg4[%c8_78, %c0_79, %c0_80] : memref<15x256x64xbf16, #tpu.memory_space<vmem>>, vector<1x256x64xbf16>
    %79 = vector.shape_cast %78 : vector<1x256x64xbf16> to vector<256x64xbf16>
    %cst_81 = arith.constant dense<0.000000e+00> : vector<16x64xf32>
    %80 = tpu.matmul %77, %79, %cst_81 {dimension_numbers = #tpu.dot_dimension_numbers<[1], [0], [0], [1], [0, 0, 1, 1], [], []>} : vector<16x256xbf16>, vector<256x64xbf16>, vector<16x64xf32> -> vector<16x64xf32>
    %81 = arith.addf %75, %80 : vector<16x64xf32>
    %c0_82 = arith.constant 0 : index
    %c10 = arith.constant 10 : index
    %c0_83 = arith.constant 0 : index
    %82 = vector.load %arg11[%c0_82, %c10, %c0_83] : memref<2x24x256xbf16, #tpu.memory_space<vmem>>, vector<2x8x256xbf16>
    %83 = vector.shape_cast %82 : vector<2x8x256xbf16> to vector<16x256xbf16>
    %c9_84 = arith.constant 9 : index
    %c0_85 = arith.constant 0 : index
    %c0_86 = arith.constant 0 : index
    %84 = vector.load %arg4[%c9_84, %c0_85, %c0_86] : memref<15x256x64xbf16, #tpu.memory_space<vmem>>, vector<1x256x64xbf16>
    %85 = vector.shape_cast %84 : vector<1x256x64xbf16> to vector<256x64xbf16>
    %cst_87 = arith.constant dense<0.000000e+00> : vector<16x64xf32>
    %86 = tpu.matmul %83, %85, %cst_87 {dimension_numbers = #tpu.dot_dimension_numbers<[1], [0], [0], [1], [0, 0, 1, 1], [], []>} : vector<16x256xbf16>, vector<256x64xbf16>, vector<16x64xf32> -> vector<16x64xf32>
    %87 = arith.addf %81, %86 : vector<16x64xf32>
    %c0_88 = arith.constant 0 : index
    %c11 = arith.constant 11 : index
    %c0_89 = arith.constant 0 : index
    %88 = vector.load %arg11[%c0_88, %c11, %c0_89] : memref<2x24x256xbf16, #tpu.memory_space<vmem>>, vector<2x8x256xbf16>
    %89 = vector.shape_cast %88 : vector<2x8x256xbf16> to vector<16x256xbf16>
    %c10_90 = arith.constant 10 : index
    %c0_91 = arith.constant 0 : index
    %c0_92 = arith.constant 0 : index
    %90 = vector.load %arg4[%c10_90, %c0_91, %c0_92] : memref<15x256x64xbf16, #tpu.memory_space<vmem>>, vector<1x256x64xbf16>
    %91 = vector.shape_cast %90 : vector<1x256x64xbf16> to vector<256x64xbf16>
    %cst_93 = arith.constant dense<0.000000e+00> : vector<16x64xf32>
    %92 = tpu.matmul %89, %91, %cst_93 {dimension_numbers = #tpu.dot_dimension_numbers<[1], [0], [0], [1], [0, 0, 1, 1], [], []>} : vector<16x256xbf16>, vector<256x64xbf16>, vector<16x64xf32> -> vector<16x64xf32>
    %93 = arith.addf %87, %92 : vector<16x64xf32>
    %c0_94 = arith.constant 0 : index
    %c12 = arith.constant 12 : index
    %c0_95 = arith.constant 0 : index
    %94 = vector.load %arg11[%c0_94, %c12, %c0_95] : memref<2x24x256xbf16, #tpu.memory_space<vmem>>, vector<2x8x256xbf16>
    %95 = vector.shape_cast %94 : vector<2x8x256xbf16> to vector<16x256xbf16>
    %c11_96 = arith.constant 11 : index
    %c0_97 = arith.constant 0 : index
    %c0_98 = arith.constant 0 : index
    %96 = vector.load %arg4[%c11_96, %c0_97, %c0_98] : memref<15x256x64xbf16, #tpu.memory_space<vmem>>, vector<1x256x64xbf16>
    %97 = vector.shape_cast %96 : vector<1x256x64xbf16> to vector<256x64xbf16>
    %cst_99 = arith.constant dense<0.000000e+00> : vector<16x64xf32>
    %98 = tpu.matmul %95, %97, %cst_99 {dimension_numbers = #tpu.dot_dimension_numbers<[1], [0], [0], [1], [0, 0, 1, 1], [], []>} : vector<16x256xbf16>, vector<256x64xbf16>, vector<16x64xf32> -> vector<16x64xf32>
    %99 = arith.addf %93, %98 : vector<16x64xf32>
    %c0_100 = arith.constant 0 : index
    %c13 = arith.constant 13 : index
    %c0_101 = arith.constant 0 : index
    %100 = vector.load %arg11[%c0_100, %c13, %c0_101] : memref<2x24x256xbf16, #tpu.memory_space<vmem>>, vector<2x8x256xbf16>
    %101 = vector.shape_cast %100 : vector<2x8x256xbf16> to vector<16x256xbf16>
    %c12_102 = arith.constant 12 : index
    %c0_103 = arith.constant 0 : index
    %c0_104 = arith.constant 0 : index
    %102 = vector.load %arg4[%c12_102, %c0_103, %c0_104] : memref<15x256x64xbf16, #tpu.memory_space<vmem>>, vector<1x256x64xbf16>
    %103 = vector.shape_cast %102 : vector<1x256x64xbf16> to vector<256x64xbf16>
    %cst_105 = arith.constant dense<0.000000e+00> : vector<16x64xf32>
    %104 = tpu.matmul %101, %103, %cst_105 {dimension_numbers = #tpu.dot_dimension_numbers<[1], [0], [0], [1], [0, 0, 1, 1], [], []>} : vector<16x256xbf16>, vector<256x64xbf16>, vector<16x64xf32> -> vector<16x64xf32>
    %105 = arith.addf %99, %104 : vector<16x64xf32>
    %c0_106 = arith.constant 0 : index
    %c14 = arith.constant 14 : index
    %c0_107 = arith.constant 0 : index
    %106 = vector.load %arg11[%c0_106, %c14, %c0_107] : memref<2x24x256xbf16, #tpu.memory_space<vmem>>, vector<2x8x256xbf16>
    %107 = vector.shape_cast %106 : vector<2x8x256xbf16> to vector<16x256xbf16>
    %c13_108 = arith.constant 13 : index
    %c0_109 = arith.constant 0 : index
    %c0_110 = arith.constant 0 : index
    %108 = vector.load %arg4[%c13_108, %c0_109, %c0_110] : memref<15x256x64xbf16, #tpu.memory_space<vmem>>, vector<1x256x64xbf16>
    %109 = vector.shape_cast %108 : vector<1x256x64xbf16> to vector<256x64xbf16>
    %cst_111 = arith.constant dense<0.000000e+00> : vector<16x64xf32>
    %110 = tpu.matmul %107, %109, %cst_111 {dimension_numbers = #tpu.dot_dimension_numbers<[1], [0], [0], [1], [0, 0, 1, 1], [], []>} : vector<16x256xbf16>, vector<256x64xbf16>, vector<16x64xf32> -> vector<16x64xf32>
    %111 = arith.addf %105, %110 : vector<16x64xf32>
    %c0_112 = arith.constant 0 : index
    %c15 = arith.constant 15 : index
    %c0_113 = arith.constant 0 : index
    %112 = vector.load %arg11[%c0_112, %c15, %c0_113] : memref<2x24x256xbf16, #tpu.memory_space<vmem>>, vector<2x8x256xbf16>
    %113 = vector.shape_cast %112 : vector<2x8x256xbf16> to vector<16x256xbf16>
    %c14_114 = arith.constant 14 : index
    %c0_115 = arith.constant 0 : index
    %c0_116 = arith.constant 0 : index
    %114 = vector.load %arg4[%c14_114, %c0_115, %c0_116] : memref<15x256x64xbf16, #tpu.memory_space<vmem>>, vector<1x256x64xbf16>
    %115 = vector.shape_cast %114 : vector<1x256x64xbf16> to vector<256x64xbf16>
    %cst_117 = arith.constant dense<0.000000e+00> : vector<16x64xf32>
    %116 = tpu.matmul %113, %115, %cst_117 {dimension_numbers = #tpu.dot_dimension_numbers<[1], [0], [0], [1], [0, 0, 1, 1], [], []>} : vector<16x256xbf16>, vector<256x64xbf16>, vector<16x64xf32> -> vector<16x64xf32>
    %117 = arith.addf %111, %116 : vector<16x64xf32>
    %cst_118 = arith.constant 0.000000e+00 : f32
    %118 = vector.broadcast %cst_118 : f32 to vector<16x64xf32>
    %119 = arith.cmpf oge, %117, %118 : vector<16x64xf32>
    %cst_119 = arith.constant 0.00999999977 : f32
    %120 = vector.broadcast %cst_119 : f32 to vector<16x64xf32>
    %121 = arith.mulf %120, %117 : vector<16x64xf32>
    %122 = arith.select %119, %117, %121 : vector<16x64xi1>, vector<16x64xf32>
    %cst_120 = arith.constant 0.000000e+00 : bf16
    %123 = vector.broadcast %cst_120 : bf16 to vector<2x4x64xbf16>
    %c0_121 = arith.constant 0 : index
    %c0_122 = arith.constant 0 : index
    %c0_123 = arith.constant 0 : index
    %124 = vector.load %arg12[%c0_121, %c0_122, %c0_123] : memref<2x16x64xbf16, #tpu.memory_space<vmem>>, vector<2x4x64xbf16>
    tpu.vector_store %arg12[%c0_121, %c0_122, %c0_123], %123 {strides = array<i32>} : memref<2x16x64xbf16, #tpu.memory_space<vmem>>, vector<2x4x64xbf16>,
    %cst_124 = arith.constant 0.000000e+00 : bf16
    %125 = vector.broadcast %cst_124 : bf16 to vector<2x4x64xbf16>
    %c0_125 = arith.constant 0 : index
    %c12_126 = arith.constant 12 : index
    %c0_127 = arith.constant 0 : index
    %126 = vector.load %arg12[%c0_125, %c12_126, %c0_127] : memref<2x16x64xbf16, #tpu.memory_space<vmem>>, vector<2x4x64xbf16>
    tpu.vector_store %arg12[%c0_125, %c12_126, %c0_127], %125 {strides = array<i32>} : memref<2x16x64xbf16, #tpu.memory_space<vmem>>, vector<2x4x64xbf16>,
    %127 = arith.truncf %122 : vector<16x64xf32> to vector<16x64xbf16>
    %128 = vector.shape_cast %127 : vector<16x64xbf16> to vector<2x8x64xbf16>
    %c0_128 = arith.constant 0 : index
    %c4_129 = arith.constant 4 : index
    %c0_130 = arith.constant 0 : index
    %129 = vector.load %arg12[%c0_128, %c4_129, %c0_130] : memref<2x16x64xbf16, #tpu.memory_space<vmem>>, vector<2x8x64xbf16>
    tpu.vector_store %arg12[%c0_128, %c4_129, %c0_130], %128 {strides = array<i32>} : memref<2x16x64xbf16, #tpu.memory_space<vmem>>, vector<2x8x64xbf16>,
    %c0_131 = arith.constant 0 : index
    %c0_132 = arith.constant 0 : index
    %c0_133 = arith.constant 0 : index
    %130 = vector.load %arg12[%c0_131, %c0_132, %c0_133] : memref<2x16x64xbf16, #tpu.memory_space<vmem>>, vector<2x8x64xbf16>
    %131 = vector.shape_cast %130 : vector<2x8x64xbf16> to vector<16x64xbf16>
    %c0_134 = arith.constant 0 : index
    %c0_135 = arith.constant 0 : index
    %c0_136 = arith.constant 0 : index
    %132 = vector.load %arg6[%c0_134, %c0_135, %c0_136] : memref<9x64x256xbf16, #tpu.memory_space<vmem>>, vector<1x64x256xbf16>
    %133 = vector.shape_cast %132 : vector<1x64x256xbf16> to vector<64x256xbf16>
    %cst_137 = arith.constant dense<0.000000e+00> : vector<16x256xf32>
    %134 = tpu.matmul %131, %133, %cst_137 {dimension_numbers = #tpu.dot_dimension_numbers<[1], [0], [0], [1], [0, 0, 1, 1], [], []>} : vector<16x64xbf16>, vector<64x256xbf16>, vector<16x256xf32> -> vector<16x256xf32>
    %c0_138 = arith.constant 0 : index
    %c0_139 = arith.constant 0 : index
    %135 = vector.load %arg7[%c0_138, %c0_139] : memref<1x256xf32, #tpu.memory_space<vmem>>, vector<1x256xf32>
    %136 = vector.broadcast %135 : vector<1x256xf32> to vector<16x256xf32>
    %137 = arith.addf %134, %136 : vector<16x256xf32>
    %c0_140 = arith.constant 0 : index
    %c1_141 = arith.constant 1 : index
    %c0_142 = arith.constant 0 : index
    %138 = vector.load %arg12[%c0_140, %c1_141, %c0_142] : memref<2x16x64xbf16, #tpu.memory_space<vmem>>, vector<2x8x64xbf16>
    %139 = vector.shape_cast %138 : vector<2x8x64xbf16> to vector<16x64xbf16>
    %c1_143 = arith.constant 1 : index
    %c0_144 = arith.constant 0 : index
    %c0_145 = arith.constant 0 : index
    %140 = vector.load %arg6[%c1_143, %c0_144, %c0_145] : memref<9x64x256xbf16, #tpu.memory_space<vmem>>, vector<1x64x256xbf16>
    %141 = vector.shape_cast %140 : vector<1x64x256xbf16> to vector<64x256xbf16>
    %cst_146 = arith.constant dense<0.000000e+00> : vector<16x256xf32>
    %142 = tpu.matmul %139, %141, %cst_146 {dimension_numbers = #tpu.dot_dimension_numbers<[1], [0], [0], [1], [0, 0, 1, 1], [], []>} : vector<16x64xbf16>, vector<64x256xbf16>, vector<16x256xf32> -> vector<16x256xf32>
    %143 = arith.addf %137, %142 : vector<16x256xf32>
    %c0_147 = arith.constant 0 : index
    %c2_148 = arith.constant 2 : index
    %c0_149 = arith.constant 0 : index
    %144 = vector.load %arg12[%c0_147, %c2_148, %c0_149] : memref<2x16x64xbf16, #tpu.memory_space<vmem>>, vector<2x8x64xbf16>
    %145 = vector.shape_cast %144 : vector<2x8x64xbf16> to vector<16x64xbf16>
    %c2_150 = arith.constant 2 : index
    %c0_151 = arith.constant 0 : index
    %c0_152 = arith.constant 0 : index
    %146 = vector.load %arg6[%c2_150, %c0_151, %c0_152] : memref<9x64x256xbf16, #tpu.memory_space<vmem>>, vector<1x64x256xbf16>
    %147 = vector.shape_cast %146 : vector<1x64x256xbf16> to vector<64x256xbf16>
    %cst_153 = arith.constant dense<0.000000e+00> : vector<16x256xf32>
    %148 = tpu.matmul %145, %147, %cst_153 {dimension_numbers = #tpu.dot_dimension_numbers<[1], [0], [0], [1], [0, 0, 1, 1], [], []>} : vector<16x64xbf16>, vector<64x256xbf16>, vector<16x256xf32> -> vector<16x256xf32>
    %149 = arith.addf %143, %148 : vector<16x256xf32>
    %c0_154 = arith.constant 0 : index
    %c3_155 = arith.constant 3 : index
    %c0_156 = arith.constant 0 : index
    %150 = vector.load %arg12[%c0_154, %c3_155, %c0_156] : memref<2x16x64xbf16, #tpu.memory_space<vmem>>, vector<2x8x64xbf16>
    %151 = vector.shape_cast %150 : vector<2x8x64xbf16> to vector<16x64xbf16>
    %c3_157 = arith.constant 3 : index
    %c0_158 = arith.constant 0 : index
    %c0_159 = arith.constant 0 : index
    %152 = vector.load %arg6[%c3_157, %c0_158, %c0_159] : memref<9x64x256xbf16, #tpu.memory_space<vmem>>, vector<1x64x256xbf16>
    %153 = vector.shape_cast %152 : vector<1x64x256xbf16> to vector<64x256xbf16>
    %cst_160 = arith.constant dense<0.000000e+00> : vector<16x256xf32>
    %154 = tpu.matmul %151, %153, %cst_160 {dimension_numbers = #tpu.dot_dimension_numbers<[1], [0], [0], [1], [0, 0, 1, 1], [], []>} : vector<16x64xbf16>, vector<64x256xbf16>, vector<16x256xf32> -> vector<16x256xf32>
    %155 = arith.addf %149, %154 : vector<16x256xf32>
    %c0_161 = arith.constant 0 : index
    %c4_162 = arith.constant 4 : index
    %c0_163 = arith.constant 0 : index
    %156 = vector.load %arg12[%c0_161, %c4_162, %c0_163] : memref<2x16x64xbf16, #tpu.memory_space<vmem>>, vector<2x8x64xbf16>
    %157 = vector.shape_cast %156 : vector<2x8x64xbf16> to vector<16x64xbf16>
    %c4_164 = arith.constant 4 : index
    %c0_165 = arith.constant 0 : index
    %c0_166 = arith.constant 0 : index
    %158 = vector.load %arg6[%c4_164, %c0_165, %c0_166] : memref<9x64x256xbf16, #tpu.memory_space<vmem>>, vector<1x64x256xbf16>
    %159 = vector.shape_cast %158 : vector<1x64x256xbf16> to vector<64x256xbf16>
    %cst_167 = arith.constant dense<0.000000e+00> : vector<16x256xf32>
    %160 = tpu.matmul %157, %159, %cst_167 {dimension_numbers = #tpu.dot_dimension_numbers<[1], [0], [0], [1], [0, 0, 1, 1], [], []>} : vector<16x64xbf16>, vector<64x256xbf16>, vector<16x256xf32> -> vector<16x256xf32>
    %161 = arith.addf %155, %160 : vector<16x256xf32>
    %c0_168 = arith.constant 0 : index
    %c5_169 = arith.constant 5 : index
    %c0_170 = arith.constant 0 : index
    %162 = vector.load %arg12[%c0_168, %c5_169, %c0_170] : memref<2x16x64xbf16, #tpu.memory_space<vmem>>, vector<2x8x64xbf16>
    %163 = vector.shape_cast %162 : vector<2x8x64xbf16> to vector<16x64xbf16>
    %c5_171 = arith.constant 5 : index
    %c0_172 = arith.constant 0 : index
    %c0_173 = arith.constant 0 : index
    %164 = vector.load %arg6[%c5_171, %c0_172, %c0_173] : memref<9x64x256xbf16, #tpu.memory_space<vmem>>, vector<1x64x256xbf16>
    %165 = vector.shape_cast %164 : vector<1x64x256xbf16> to vector<64x256xbf16>
    %cst_174 = arith.constant dense<0.000000e+00> : vector<16x256xf32>
    %166 = tpu.matmul %163, %165, %cst_174 {dimension_numbers = #tpu.dot_dimension_numbers<[1], [0], [0], [1], [0, 0, 1, 1], [], []>} : vector<16x64xbf16>, vector<64x256xbf16>, vector<16x256xf32> -> vector<16x256xf32>
    %167 = arith.addf %161, %166 : vector<16x256xf32>
    %c0_175 = arith.constant 0 : index
    %c6_176 = arith.constant 6 : index
    %c0_177 = arith.constant 0 : index
    %168 = vector.load %arg12[%c0_175, %c6_176, %c0_177] : memref<2x16x64xbf16, #tpu.memory_space<vmem>>, vector<2x8x64xbf16>
    %169 = vector.shape_cast %168 : vector<2x8x64xbf16> to vector<16x64xbf16>
    %c6_178 = arith.constant 6 : index
    %c0_179 = arith.constant 0 : index
    %c0_180 = arith.constant 0 : index
    %170 = vector.load %arg6[%c6_178, %c0_179, %c0_180] : memref<9x64x256xbf16, #tpu.memory_space<vmem>>, vector<1x64x256xbf16>
    %171 = vector.shape_cast %170 : vector<1x64x256xbf16> to vector<64x256xbf16>
    %cst_181 = arith.constant dense<0.000000e+00> : vector<16x256xf32>
    %172 = tpu.matmul %169, %171, %cst_181 {dimension_numbers = #tpu.dot_dimension_numbers<[1], [0], [0], [1], [0, 0, 1, 1], [], []>} : vector<16x64xbf16>, vector<64x256xbf16>, vector<16x256xf32> -> vector<16x256xf32>
    %173 = arith.addf %167, %172 : vector<16x256xf32>
    %c0_182 = arith.constant 0 : index
    %c7_183 = arith.constant 7 : index
    %c0_184 = arith.constant 0 : index
    %174 = vector.load %arg12[%c0_182, %c7_183, %c0_184] : memref<2x16x64xbf16, #tpu.memory_space<vmem>>, vector<2x8x64xbf16>
    %175 = vector.shape_cast %174 : vector<2x8x64xbf16> to vector<16x64xbf16>
    %c7_185 = arith.constant 7 : index
    %c0_186 = arith.constant 0 : index
    %c0_187 = arith.constant 0 : index
    %176 = vector.load %arg6[%c7_185, %c0_186, %c0_187] : memref<9x64x256xbf16, #tpu.memory_space<vmem>>, vector<1x64x256xbf16>
    %177 = vector.shape_cast %176 : vector<1x64x256xbf16> to vector<64x256xbf16>
    %cst_188 = arith.constant dense<0.000000e+00> : vector<16x256xf32>
    %178 = tpu.matmul %175, %177, %cst_188 {dimension_numbers = #tpu.dot_dimension_numbers<[1], [0], [0], [1], [0, 0, 1, 1], [], []>} : vector<16x64xbf16>, vector<64x256xbf16>, vector<16x256xf32> -> vector<16x256xf32>
    %179 = arith.addf %173, %178 : vector<16x256xf32>
    %c0_189 = arith.constant 0 : index
    %c8_190 = arith.constant 8 : index
    %c0_191 = arith.constant 0 : index
    %180 = vector.load %arg12[%c0_189, %c8_190, %c0_191] : memref<2x16x64xbf16, #tpu.memory_space<vmem>>, vector<2x8x64xbf16>
    %181 = vector.shape_cast %180 : vector<2x8x64xbf16> to vector<16x64xbf16>
    %c8_192 = arith.constant 8 : index
    %c0_193 = arith.constant 0 : index
    %c0_194 = arith.constant 0 : index
    %182 = vector.load %arg6[%c8_192, %c0_193, %c0_194] : memref<9x64x256xbf16, #tpu.memory_space<vmem>>, vector<1x64x256xbf16>
    %183 = vector.shape_cast %182 : vector<1x64x256xbf16> to vector<64x256xbf16>
    %cst_195 = arith.constant dense<0.000000e+00> : vector<16x256xf32>
    %184 = tpu.matmul %181, %183, %cst_195 {dimension_numbers = #tpu.dot_dimension_numbers<[1], [0], [0], [1], [0, 0, 1, 1], [], []>} : vector<16x64xbf16>, vector<64x256xbf16>, vector<16x256xf32> -> vector<16x256xf32>
    %185 = arith.addf %179, %184 : vector<16x256xf32>
    %cst_196 = arith.constant 0.000000e+00 : f32
    %186 = vector.broadcast %cst_196 : f32 to vector<16x256xf32>
    %187 = arith.cmpf oge, %185, %186 : vector<16x256xf32>
    %cst_197 = arith.constant 0.00999999977 : f32
    %188 = vector.broadcast %cst_197 : f32 to vector<16x256xf32>
    %189 = arith.mulf %188, %185 : vector<16x256xf32>
    %190 = arith.select %187, %185, %189 : vector<16x256xi1>, vector<16x256xf32>
    %cst_198 = arith.constant 0.000000e+00 : bf16
    %191 = vector.broadcast %cst_198 : bf16 to vector<2x1x256xbf16>
    %c0_199 = arith.constant 0 : index
    %c0_200 = arith.constant 0 : index
    %c0_201 = arith.constant 0 : index
    %192 = vector.load %arg13[%c0_199, %c0_200, %c0_201] : memref<2x10x256xbf16, #tpu.memory_space<vmem>>, vector<2x1x256xbf16>
    tpu.vector_store %arg13[%c0_199, %c0_200, %c0_201], %191 {strides = array<i32>} : memref<2x10x256xbf16, #tpu.memory_space<vmem>>, vector<2x1x256xbf16>,
    %cst_202 = arith.constant 0.000000e+00 : bf16
    %193 = vector.broadcast %cst_202 : bf16 to vector<2x1x256xbf16>
    %c0_203 = arith.constant 0 : index
    %c9_204 = arith.constant 9 : index
    %c0_205 = arith.constant 0 : index
    %194 = vector.load %arg13[%c0_203, %c9_204, %c0_205] : memref<2x10x256xbf16, #tpu.memory_space<vmem>>, vector<2x1x256xbf16>
    tpu.vector_store %arg13[%c0_203, %c9_204, %c0_205], %193 {strides = array<i32>} : memref<2x10x256xbf16, #tpu.memory_space<vmem>>, vector<2x1x256xbf16>,
    %195 = arith.truncf %190 : vector<16x256xf32> to vector<16x256xbf16>
    %196 = vector.shape_cast %195 : vector<16x256xbf16> to vector<2x8x256xbf16>
    %c0_206 = arith.constant 0 : index
    %c1_207 = arith.constant 1 : index
    %c0_208 = arith.constant 0 : index
    %197 = vector.load %arg13[%c0_206, %c1_207, %c0_208] : memref<2x10x256xbf16, #tpu.memory_space<vmem>>, vector<2x8x256xbf16>
    tpu.vector_store %arg13[%c0_206, %c1_207, %c0_208], %196 {strides = array<i32>} : memref<2x10x256xbf16, #tpu.memory_space<vmem>>, vector<2x8x256xbf16>,
    %c0_209 = arith.constant 0 : index
    %c0_210 = arith.constant 0 : index
    %c0_211 = arith.constant 0 : index
    %198 = vector.load %arg13[%c0_209, %c0_210, %c0_211] : memref<2x10x256xbf16, #tpu.memory_space<vmem>>, vector<2x8x256xbf16>
    %199 = vector.shape_cast %198 : vector<2x8x256xbf16> to vector<16x256xbf16>
    %c0_212 = arith.constant 0 : index
    %c0_213 = arith.constant 0 : index
    %c0_214 = arith.constant 0 : index
    %200 = vector.load %arg8[%c0_212, %c0_213, %c0_214] : memref<3x256x128xbf16, #tpu.memory_space<vmem>>, vector<1x256x128xbf16>
    %201 = vector.shape_cast %200 : vector<1x256x128xbf16> to vector<256x128xbf16>
    %cst_215 = arith.constant dense<0.000000e+00> : vector<16x128xf32>
    %202 = tpu.matmul %199, %201, %cst_215 {dimension_numbers = #tpu.dot_dimension_numbers<[1], [0], [0], [1], [0, 0, 1, 1], [], []>} : vector<16x256xbf16>, vector<256x128xbf16>, vector<16x128xf32> -> vector<16x128xf32>
    %c0_216 = arith.constant 0 : index
    %c0_217 = arith.constant 0 : index
    %203 = vector.load %arg9[%c0_216, %c0_217] : memref<1x128xf32, #tpu.memory_space<vmem>>, vector<1x128xf32>
    %204 = vector.broadcast %203 : vector<1x128xf32> to vector<16x128xf32>
    %205 = arith.addf %202, %204 : vector<16x128xf32>
    %c0_218 = arith.constant 0 : index
    %c1_219 = arith.constant 1 : index
    %c0_220 = arith.constant 0 : index
    %206 = vector.load %arg13[%c0_218, %c1_219, %c0_220] : memref<2x10x256xbf16, #tpu.memory_space<vmem>>, vector<2x8x256xbf16>
    %207 = vector.shape_cast %206 : vector<2x8x256xbf16> to vector<16x256xbf16>
    %c1_221 = arith.constant 1 : index
    %c0_222 = arith.constant 0 : index
    %c0_223 = arith.constant 0 : index
    %208 = vector.load %arg8[%c1_221, %c0_222, %c0_223] : memref<3x256x128xbf16, #tpu.memory_space<vmem>>, vector<1x256x128xbf16>
    %209 = vector.shape_cast %208 : vector<1x256x128xbf16> to vector<256x128xbf16>
    %cst_224 = arith.constant dense<0.000000e+00> : vector<16x128xf32>
    %210 = tpu.matmul %207, %209, %cst_224 {dimension_numbers = #tpu.dot_dimension_numbers<[1], [0], [0], [1], [0, 0, 1, 1], [], []>} : vector<16x256xbf16>, vector<256x128xbf16>, vector<16x128xf32> -> vector<16x128xf32>
    %211 = arith.addf %205, %210 : vector<16x128xf32>
    %c0_225 = arith.constant 0 : index
    %c2_226 = arith.constant 2 : index
    %c0_227 = arith.constant 0 : index
    %212 = vector.load %arg13[%c0_225, %c2_226, %c0_227] : memref<2x10x256xbf16, #tpu.memory_space<vmem>>, vector<2x8x256xbf16>
    %213 = vector.shape_cast %212 : vector<2x8x256xbf16> to vector<16x256xbf16>
    %c2_228 = arith.constant 2 : index
    %c0_229 = arith.constant 0 : index
    %c0_230 = arith.constant 0 : index
    %214 = vector.load %arg8[%c2_228, %c0_229, %c0_230] : memref<3x256x128xbf16, #tpu.memory_space<vmem>>, vector<1x256x128xbf16>
    %215 = vector.shape_cast %214 : vector<1x256x128xbf16> to vector<256x128xbf16>
    %cst_231 = arith.constant dense<0.000000e+00> : vector<16x128xf32>
    %216 = tpu.matmul %213, %215, %cst_231 {dimension_numbers = #tpu.dot_dimension_numbers<[1], [0], [0], [1], [0, 0, 1, 1], [], []>} : vector<16x256xbf16>, vector<256x128xbf16>, vector<16x128xf32> -> vector<16x128xf32>
    %217 = arith.addf %211, %216 : vector<16x128xf32>
    %218 = vector.shape_cast %217 : vector<16x128xf32> to vector<2x8x128xf32>
    %c0_232 = arith.constant 0 : index
    %c0_233 = arith.constant 0 : index
    %c0_234 = arith.constant 0 : index
    %219 = vector.load %arg10[%c0_232, %c0_233, %c0_234] : memref<2x8x128xf32, #tpu.memory_space<vmem>>, vector<2x8x128xf32>
    tpu.vector_store %arg10[%c0_232, %c0_233, %c0_234], %218 {strides = array<i32>} : memref<2x8x128xf32, #tpu.memory_space<vmem>>, vector<2x8x128xf32>,
    return
  }
  func.func @transform_0(%arg0: i32) -> (i32, i32, i32) {
    %c0_i32 = arith.constant 0 : i32
    %c0_i32_0 = arith.constant 0 : i32
    %c0_i32_1 = arith.constant 0 : i32
    return %arg0, %c0_i32, %c0_i32_0 : i32, i32, i32
  }
  func.func @transform_1(%arg0: i32) -> (i32, i32, i32) {
    %c0_i32 = arith.constant 0 : i32
    %c0_i32_0 = arith.constant 0 : i32
    %c0_i32_1 = arith.constant 0 : i32
    %c0_i32_2 = arith.constant 0 : i32
    return %c0_i32, %c0_i32_0, %c0_i32_1 : i32, i32, i32
  }
  func.func @transform_2(%arg0: i32) -> (i32, i32) {
    %c0_i32 = arith.constant 0 : i32
    %c0_i32_0 = arith.constant 0 : i32
    %c0_i32_1 = arith.constant 0 : i32
    return %c0_i32, %c0_i32_0 : i32, i32
  }
  func.func @transform_3(%arg0: i32) -> (i32, i32, i32) {
    %c0_i32 = arith.constant 0 : i32
    %c0_i32_0 = arith.constant 0 : i32
    %c0_i32_1 = arith.constant 0 : i32
    %c0_i32_2 = arith.constant 0 : i32
    return %c0_i32, %c0_i32_0, %c0_i32_1 : i32, i32, i32
  }
  func.func @transform_4(%arg0: i32) -> (i32, i32) {
    %c0_i32 = arith.constant 0 : i32
    %c0_i32_0 = arith.constant 0 : i32
    %c0_i32_1 = arith.constant 0 : i32
    return %c0_i32, %c0_i32_0 : i32, i32
  }
  func.func @transform_5(%arg0: i32) -> (i32, i32, i32) {
    %c0_i32 = arith.constant 0 : i32
    %c0_i32_0 = arith.constant 0 : i32
    %c0_i32_1 = arith.constant 0 : i32
    %c0_i32_2 = arith.constant 0 : i32
    return %c0_i32, %c0_i32_0, %c0_i32_1 : i32, i32, i32
  }
  func.func @transform_6(%arg0: i32) -> (i32, i32) {
    %c0_i32 = arith.constant 0 : i32
    %c0_i32_0 = arith.constant 0 : i32
    %c0_i32_1 = arith.constant 0 : i32
    return %c0_i32, %c0_i32_0 : i32, i32
  }
  func.func @transform_7(%arg0: i32) -> (i32, i32, i32) {
    %c0_i32 = arith.constant 0 : i32
    %c0_i32_0 = arith.constant 0 : i32
    %c0_i32_1 = arith.constant 0 : i32
    %c0_i32_2 = arith.constant 0 : i32
    return %c0_i32, %c0_i32_0, %c0_i32_1 : i32, i32, i32
  }
  func.func @transform_8(%arg0: i32) -> (i32, i32) {
    %c0_i32 = arith.constant 0 : i32
    %c0_i32_0 = arith.constant 0 : i32
    %c0_i32_1 = arith.constant 0 : i32
    return %c0_i32, %c0_i32_0 : i32, i32
  }
  func.func @transform_9(%arg0: i32) -> (i32, i32, i32) {
    %c0_i32 = arith.constant 0 : i32
    %c0_i32_0 = arith.constant 0 : i32
    %c0_i32_1 = arith.constant 0 : i32
    return %arg0, %c0_i32, %c0_i32_0 : i32, i32, i32
  }
}

</mosaic_0001>

<bundles_post_ra>
// kernel: dilated_convae_forward.1
= control target key start
LH: loop header
LB: loop body
LE: loop exit
PB: predicated region body
PF: predicated region fallthrough
CT: control target
= control target key end

     0   :  { %vm175_vm0 = vsmask.f32 3328  ;;  %vm176_vm1 = vsmask.f32 7440  ;;  %vm565_vm7 = vcmask 1042432   ;;  %vm566_vm8 = vcmask 1046532   ;;  %s9522_s1 = inlined_call_operand.vmem [shape: bf16[2,128,256], index: 1, kind: input, shape index: {}]   ;;  %s9523_s0 = inlined_call_operand.vmem [shape: bf16[2,9,128], index: 0, kind: input, shape index: {}]   ;;  %s9524_s3 = inlined_call_operand.vmem [shape: bf16[15,256,64], index: 3, kind: input, shape index: {}]   ;;  %s9525_s2 = inlined_call_operand.vmem [shape: f32[1,256], index: 2, kind: input, shape index: {}]   ;;  %s9526_s4 = inlined_call_operand.vmem [shape: f32[1,64], index: 4, kind: input, shape index: {}]   ;;  %s9527_s5 = inlined_call_operand.vmem [shape: bf16[9,64,256], index: 5, kind: input, shape index: {}]   ;;  %s9528_s8 = inlined_call_operand.vmem [shape: f32[1,128], index: 8, kind: input, shape index: {}]   ;;  %s9529_s7 = inlined_call_operand.vmem [shape: bf16[3,256,128], index: 7, kind: input, shape index: {}]   ;;  %s9530_s6 = inlined_call_operand.vmem [shape: f32[1,256], index: 6, kind: input, shape index: {}]   ;;  %s9531_s9 = inlined_call_operand.vmem [shape: f32[2,8,128], index: 9, kind: output, shape index: {}]  }
   0x1   :  { %v4930_v0 = vld [vmem:[%s9522_s1 + $0x70] sm:$0xf]  ;;  %v7116_v1 = vld [vmem:[%s9522_s1 + $0x74] sm:$0xf0]  ;;  %v7115_v2 = vld [vmem:[%s9522_s1 + $0x74] sm:$0xf] }
   0x2   :  { %v4931_v3 = vor.u32 %v7116_v1, %v4930_v0  ;;  %v4932_v4 = vld [vmem:[%s9522_s1 + $0x78] sm:$0xf0]  ;;  %v5010_v5 = vld [vmem:[%s9522_s1 + $0xf0] sm:$0xf]  ;;  %v7132_v6 = vld [vmem:[%s9522_s1 + $0xf4] sm:$0xf0] }
   0x3   :  { %v4935_v7 = vor.u32 %v7115_v2, %v4932_v4  ;;  %v5011_v8 = vor.u32 %v7132_v6, %v5010_v5  ;;  %v7131_v9 = vld [vmem:[%s9522_s1 + $0xf4] sm:$0xf]  ;;  %v5012_v10 = vld [vmem:[%s9522_s1 + $0xf8] sm:$0xf0]  ;;  %v4922_v11 = vld [vmem:[%s9522_s1 + $0x60] sm:$0xf] }
   0x4   :  { %143 = vmatpush.bf16.msra.mxu0 %v4931_v3  ;;  %v5015_v12 = vor.u32 %v7131_v9, %v5012_v10  ;;  %v7114_v13 = vld [vmem:[%s9522_s1 + $0x64] sm:$0xf0]  ;;  %v7113_v14 = vld [vmem:[%s9522_s1 + $0x64] sm:$0xf]  ;;  %v4924_v15 = vld [vmem:[%s9522_s1 + $0x68] sm:$0xf0] }
   0x5   :  { %157 = vmatpush.bf16.msra.mxu1 %v4935_v7  ;;  %307 = vmatpush.bf16.msra.mxu2 %v5011_v8  ;;  %v4923_v16 = vor.u32 %v7114_v13, %v4922_v11  ;;  %v4927_v17 = vor.u32 %v7113_v14, %v4924_v15  ;;  %v5002_v18 = vld [vmem:[%s9522_s1 + $0xe0] sm:$0xf]  ;;  %v7130_v19 = vld [vmem:[%s9522_s1 + $0xe4] sm:$0xf0]  ;;  %v7129_v20 = vld [vmem:[%s9522_s1 + $0xe4] sm:$0xf] }
   0x6   :  { %321 = vmatpush.bf16.msra.mxu3 %v5015_v12  ;;  %v5003_v21 = vor.u32 %v7130_v19, %v5002_v18  ;;  %v5004_v22 = vld [vmem:[%s9522_s1 + $0xe8] sm:$0xf0]  ;;  %v4914_v23 = vld [vmem:[%s9522_s1 + $0x50] sm:$0xf]  ;;  %v7112_v24 = vld [vmem:[%s9522_s1 + $0x54] sm:$0xf0] }
   0x7   :  { %v5007_v25 = vor.u32 %v7129_v20, %v5004_v22  ;;  %v7111_v26 = vld [vmem:[%s9522_s1 + $0x54] sm:$0xf]  ;;  %v4916_v27 = vld [vmem:[%s9522_s1 + $0x58] sm:$0xf0]  ;;  %v4994_v28 = vld [vmem:[%s9522_s1 + $0xd0] sm:$0xf]  ;;  %v4915_v29 = vor.u32 %v7112_v24, %v4914_v23 }
   0x8   :  { %144 = vmatpush.bf16.msra.mxu0 %v4923_v16  ;;  %v7128_v30 = vld [vmem:[%s9522_s1 + $0xd4] sm:$0xf0]  ;;  %v7127_v31 = vld [vmem:[%s9522_s1 + $0xd4] sm:$0xf]  ;;  %v4996_v32 = vld [vmem:[%s9522_s1 + $0xd8] sm:$0xf0]  ;;  %v4919_v33 = vor.u32 %v7111_v26, %v4916_v27 }
   0x9   :  { %158 = vmatpush.bf16.msra.mxu1 %v4927_v17  ;;  %308 = vmatpush.bf16.msra.mxu2 %v5003_v21  ;;  %v4995_v34 = vor.u32 %v7128_v30, %v4994_v28  ;;  %v4906_v35 = vld [vmem:[%s9522_s1 + $0x40] sm:$0xf]  ;;  %v7110_v36 = vld [vmem:[%s9522_s1 + $0x44] sm:$0xf0]  ;;  %v7109_v37 = vld [vmem:[%s9522_s1 + $0x44] sm:$0xf]  ;;  %v4999_v38 = vor.u32 %v7127_v31, %v4996_v32 }
   0xa   :  { %322 = vmatpush.bf16.msra.mxu3 %v5007_v25  ;;  %v4908_v39 = vld [vmem:[%s9522_s1 + $0x48] sm:$0xf0]  ;;  %v4986_v40 = vld [vmem:[%s9522_s1 + $0xc0] sm:$0xf]  ;;  %v7126_v41 = vld [vmem:[%s9522_s1 + $0xc4] sm:$0xf0]  ;;  %v4907_v44 = vor.u32 %v7110_v36, %v4906_v35 }
   0xb   :  { %v7125_v42 = vld [vmem:[%s9522_s1 + $0xc4] sm:$0xf]  ;;  %v4988_v43 = vld [vmem:[%s9522_s1 + $0xc8] sm:$0xf0]  ;;  %v4911_v45 = vor.u32 %v7109_v37, %v4908_v39  ;;  %v4987_v46 = vor.u32 %v7126_v41, %v4986_v40  ;;  %v4898_v47 = vld [vmem:[%s9522_s1 + $0x30] sm:$0xf] }
   0xc   :  { %145 = vmatpush.bf16.msra.mxu0 %v4915_v29  ;;  %v7108_v48 = vld [vmem:[%s9522_s1 + $0x34] sm:$0xf0]  ;;  %v7107_v49 = vld [vmem:[%s9522_s1 + $0x34] sm:$0xf]  ;;  %v4991_v50 = vor.u32 %v7125_v42, %v4988_v43  ;;  %v4900_v51 = vld [vmem:[%s9522_s1 + $0x38] sm:$0xf0] }
   0xd   :  { %159 = vmatpush.bf16.msra.mxu1 %v4919_v33  ;;  %309 = vmatpush.bf16.msra.mxu2 %v4995_v34  ;;  %v4978_v52 = vld [vmem:[%s9522_s1 + $0xb0] sm:$0xf]  ;;  %v7124_v53 = vld [vmem:[%s9522_s1 + $0xb4] sm:$0xf0]  ;;  %v7123_v54 = vld [vmem:[%s9522_s1 + $0xb4] sm:$0xf]  ;;  %v4899_v56 = vor.u32 %v7108_v48, %v4898_v47  ;;  %v4903_v57 = vor.u32 %v7107_v49, %v4900_v51 }
   0xe   :  { %323 = vmatpush.bf16.msra.mxu3 %v4999_v38  ;;  %v4980_v55 = vld [vmem:[%s9522_s1 + $0xb8] sm:$0xf0]  ;;  %v4979_v58 = vor.u32 %v7124_v53, %v4978_v52  ;;  %v4890_v59 = vld [vmem:[%s9522_s1 + $0x20] sm:$0xf]  ;;  %v7106_v60 = vld [vmem:[%s9522_s1 + $0x24] sm:$0xf0] }
   0xf   :  { %v7105_v61 = vld [vmem:[%s9522_s1 + $0x24] sm:$0xf]  ;;  %v4983_v62 = vor.u32 %v7123_v54, %v4980_v55  ;;  %v4892_v63 = vld [vmem:[%s9522_s1 + $0x28] sm:$0xf0]  ;;  %v4970_v0 = vld [vmem:[%s9522_s1 + $0xa0] sm:$0xf]  ;;  %v4891_v4 = vor.u32 %v7106_v60, %v4890_v59 }
  0x10   :  { %146 = vmatpush.bf16.msra.mxu0 %v4907_v44  ;;  %v7122_v1 = vld [vmem:[%s9522_s1 + $0xa4] sm:$0xf0]  ;;  %v7121_v2 = vld [vmem:[%s9522_s1 + $0xa4] sm:$0xf]  ;;  %v4972_v3 = vld [vmem:[%s9522_s1 + $0xa8] sm:$0xf0]  ;;  %v4895_v7 = vor.u32 %v7105_v61, %v4892_v63 }
  0x11   :  { %160 = vmatpush.bf16.msra.mxu1 %v4911_v45  ;;  %310 = vmatpush.bf16.msra.mxu2 %v4987_v46  ;;  %v4882_v5 = vld [vmem:[%s9522_s1 + $0x10] sm:$0xf]  ;;  %v7104_v6 = vld [vmem:[%s9522_s1 + $0x14] sm:$0xf0]  ;;  %v4971_v8 = vor.u32 %v7122_v1, %v4970_v0  ;;  %v7103_v9 = vld [vmem:[%s9522_s1 + $0x14] sm:$0xf]  ;;  %v4975_v12 = vor.u32 %v7121_v2, %v4972_v3 }
  0x12   :  { %324 = vmatpush.bf16.msra.mxu3 %v4991_v50  ;;  %v4884_v10 = vld [vmem:[%s9522_s1 + $0x18] sm:$0xf0]  ;;  %v4962_v11 = vld [vmem:[%s9522_s1 + $0x90] sm:$0xf]  ;;  %v7120_v13 = vld [vmem:[%s9522_s1 + $0x94] sm:$0xf0]  ;;  %v4883_v16 = vor.u32 %v7104_v6, %v4882_v5 }
  0x13   :  { %v7119_v14 = vld [vmem:[%s9522_s1 + $0x94] sm:$0xf]  ;;  %v4964_v15 = vld [vmem:[%s9522_s1 + $0x98] sm:$0xf0]  ;;  %v4874_v17 = vld [vmem:[%s9522_s1] sm:$0xf]  ;;  %v4887_v28 = vor.u32 %v7103_v9, %v4884_v10  ;;  %v4963_v29 = vor.u32 %v7120_v13, %v4962_v11 }
  0x14   :  { %147 = vmatpush.bf16.msra.mxu0 %v4899_v56  ;;  %v7102_v18 = vld [vmem:[%s9522_s1 + $0x4] sm:$0xf0]  ;;  %v171_v19 = vld [vmem:[%s9523_s0] sm:$0xf]  ;;  %v172_v20 = vld [vmem:[%s9523_s0 + $0x4] sm:$0x1]  ;;  %v4967_v34 = vor.u32 %v7119_v14, %v4964_v15 }
  0x15   :  { %161 = vmatpush.bf16.msra.mxu1 %v4903_v57  ;;  %311 = vmatpush.bf16.msra.mxu2 %v4979_v58  ;;  %v173_v21 = vld [vmem:[%s9523_s0 + $0x8] sm:$0xf]  ;;  %v7101_v22 = vld [vmem:[%s9522_s1 + $0x4] sm:$0xf]  ;;  %v174_v23 = vld [vmem:[%s9523_s0 + $0xc] sm:$0x1]  ;;  %v4875_v42 = vor.u32 %v7102_v18, %v4874_v17 }
  0x16   :  { %325 = vmatpush.bf16.msra.mxu3 %v4983_v62  ;;  %v179_v24 = vshrl.u32 %v171_v19, 16  ;;  %v182_v25 = vshll.u32 %v171_v19, 16  ;;  %v188_v26 = vshll.u32 %v172_v20, 16  ;;  %v193_v27 = vshrl.u32 %v173_v21, 16  ;;  %v4876_v30 = vld [vmem:[%s9522_s1 + $0x8] sm:$0xf0]  ;;  %vm7766_vm2 = vmor %vm175_vm0, %vm176_vm1 }
  0x17   :  { %v4954_v31 = vld [vmem:[%s9522_s1 + $0x80] sm:$0xf]  ;;  %v196_v32 = vshll.u32 %v173_v21, 16  ;;  %v202_v33 = vshll.u32 %v174_v23, 16  ;;  %v7118_v35 = vld [vmem:[%s9522_s1 + $0x84] sm:$0xf0]  ;;  %v4879_v47 = vor.u32 %v7101_v22, %v4876_v30  ;;  %vm7975_vm9 = vmor %vm565_vm7, %vm566_vm8 }
  0x18   :  { %148 = vmatpush.bf16.msra.mxu0 %v4891_v4  ;;  %v181_v36 = vrot.slane %v179_v24, 4  ;;  %v184_v37 = vrot.slane %v182_v25, 5  ;;  %v195_v38 = vrot.slane %v193_v27, 4  ;;  %v7117_v39 = vld [vmem:[%s9522_s1 + $0x84] sm:$0xf]  ;;  %v190_v46 = vrot.slane %v188_v26, 5 }
  0x19   :  { %162 = vmatpush.bf16.msra.mxu1 %v4895_v7  ;;  %312 = vmatpush.bf16.msra.mxu2 %v4971_v8  ;;  %v4956_v40 = vld [vmem:[%s9522_s1 + $0x88] sm:$0xf0]  ;;  %v198_v41 = vrot.slane %v196_v32, 5  ;;  %v4870_v43 = vld [vmem:[%s9523_s0] sm:$0xf]  ;;  %v4955_v48 = vor.u32 %v7118_v35, %v4954_v31  ;;  %v204_v51 = vrot.slane %v202_v33, 5 }
  0x1a   :  { %326 = vmatpush.bf16.msra.mxu3 %v4975_v12  ;;  %v7100_v44 = vld [vmem:[%s9523_s0 + $0x4] sm:$0xf0]  ;;  %v185_v45 = vor.u32 %v184_v37, %v181_v36  ;;  %v4959_v52 = vor.u32 %v7117_v39, %v4956_v40  ;;  %v7156_v54 = vld [vmem:[%s9524_s3 + $0xb8] sm:$0xff]  ;;  %v7155_v0 = vld [vmem:[%s9524_s3 + $0xb0] sm:$0xff]  ;;  %v7503_v37 = vmov 0   ;;  %vm957_vm10 = vcmask 1041408  }
  0x1b   :  { %v199_v50 = vor.u32 %v198_v41, %v195_v38  ;;  %v4871_v55 = vor.u32 %v7100_v44, %v4870_v43  ;;  %v7164_v57 = vld [vmem:[%s9524_s3 + $0xf8] sm:$0xff]  ;;  %v7163_v1 = vld [vmem:[%s9524_s3 + $0xf0] sm:$0xff]  ;;  %v7154_v5 = vld [vmem:[%s9524_s3 + $0xa8] sm:$0xff]  ;;  %351 = vst [vmem:[#allocation2] sm:$0xff] %v7503_v37  ;;  %vm958_vm11 = vcmask 1045508   ;;  %vm1349_vm0 = vcmask 1040384  }
  0x1c   :  { %149 = vmatpush.bf16.msra.mxu0 %v4883_v16  ;;  %v186_v53 = vrot.slane %v185_v45, 4  ;;  %v7140_v59 = vld [vmem:[%s9524_s3 + $0x38] sm:$0xff]  ;;  %v7139_v3 = vld [vmem:[%s9524_s3 + $0x30] sm:$0xff]  ;;  %v7162_v6 = vld [vmem:[%s9524_s3 + $0xe8] sm:$0xff]  ;;  %352 = vst [vmem:[#allocation2 + $0x18] sm:$0xff] %v7503_v37  ;;  %vm1350_vm1 = vcmask 1044484  }
  0x1d   :  { %163 = vmatpush.bf16.msra.mxu1 %v4887_v28  ;;  %313 = vmatpush.bf16.msra.mxu2 %v4963_v29  ;;  %v200_v56 = vrot.slane %v199_v50, 4  ;;  %v7148_v62 = vld [vmem:[%s9524_s3 + $0x78] sm:$0xff]  ;;  %v7147_v4 = vld [vmem:[%s9524_s3 + $0x70] sm:$0xff]  ;;  %v7138_v7 = vld [vmem:[%s9524_s3 + $0x28] sm:$0xff]  ;;  %353 = vst [vmem:[#allocation2 + $0x10] sm:$0xff] %v7503_v37 }
  0x1e   :  { %327 = vmatpush.bf16.msra.mxu3 %v4967_v34  ;;  %v191_v58 = vsel %vm7766_vm2, %v186_v53, %v190_v46  ;;  %v7146_v8 = vld [vmem:[%s9524_s3 + $0x68] sm:$0xff]  ;;  %v7153_v9 = vld [vmem:[%s9524_s3 + $0xa0] sm:$0xff]  ;;  %v7152_v13 = vld [vmem:[%s9524_s3 + $0x98] sm:$0xff]  ;;  %354 = vst [vmem:[#allocation2 + $0x28] sm:$0xff] %v7503_v37  ;;  %vm745_vm12 = vsmask.f32 2304 }
  0x1f   :  { %v205_v60 = vsel %vm7766_vm2, %v200_v56, %v204_v51  ;;  %v223_v61 = vunpack.c.l.b16 %v191_v58  ;;  %v7161_v10 = vld [vmem:[%s9524_s3 + $0xe0] sm:$0xff]  ;;  %v7160_v14 = vld [vmem:[%s9524_s3 + $0xd8] sm:$0xff]  ;;  %v7151_v17 = vld [vmem:[%s9524_s3 + $0x90] sm:$0xff]  ;;  %vm746_vm13 = vsmask.f32 6416 }
  0x20   :  { %150 = vmatpush.bf16.msra.mxu0 %v4875_v42  ;;  %v224_v63 = vunpack.c.l.b16 %v205_v60  ;;  %v7137_v11 = vld [vmem:[%s9524_s3 + $0x20] sm:$0xff]  ;;  %v7136_v15 = vld [vmem:[%s9524_s3 + $0x18] sm:$0xff]  ;;  %v7159_v18 = vld [vmem:[%s9524_s3 + $0xd0] sm:$0xff]  ;;  %vm1529_vm7 = vsmask.f32 256 }
  0x21   :  { %164 = vmatpush.bf16.msra.mxu1 %v4879_v47  ;;  %314 = vmatpush.bf16.msra.mxu2 %v4955_v48  ;;  %v7145_v12 = vld [vmem:[%s9524_s3 + $0x60] sm:$0xff]  ;;  %v7144_v16 = vld [vmem:[%s9524_s3 + $0x58] sm:$0xff]  ;;  %v7135_v19 = vld [vmem:[%s9524_s3 + $0x10] sm:$0xff]  ;;  %vm1530_vm8 = vsmask.f32 4368 }
  0x22   :  { %328 = vmatpush.bf16.msra.mxu3 %v4959_v52  ;;  %v225_v2 = vpack.c.b16 %v224_v63, %v223_v61  ;;  %v7143_v20 = vld [vmem:[%s9524_s3 + $0x50] sm:$0xff]  ;;  %v7150_v21 = vld [vmem:[%s9524_s3 + $0x88] sm:$0xff]  ;;  %v7149_v25 = vld [vmem:[%s9524_s3 + $0x80] sm:$0xff] }
  0x23   :  { %151 = vmatmul.bf16.vlgmr.msra.gmra.mxu0 %v4871_v55  ;;  %v7158_v22 = vld [vmem:[%s9524_s3 + $0xc8] sm:$0xff]  ;;  %v7157_v26 = vld [vmem:[%s9524_s3 + $0xc0] sm:$0xff]  ;;  %v7188_v27 = vld [vmem:[%s9524_s3 + $0x1b8] sm:$0xff] }
  0x24   :  { %165 = vmatmul.bf16.vlgmr.msra.gmra.mxu1 %v4871_v55  ;;  %531 = vmatpush.bf16.msrb.mxu0 %v7140_v59  ;;  %v7134_v23 = vld [vmem:[%s9524_s3 + $0x8] sm:$0xff]  ;;  %v7196_v28 = vld [vmem:[%s9524_s3 + $0x1f8] sm:$0xff]  ;;  %v7133_v29 = vld [vmem:[%s9524_s3] sm:$0xff] }
  0x25   :  { %713 = vmatpush.bf16.msrb.mxu2 %v7156_v54  ;;  %545 = vmatpush.bf16.msrb.mxu1 %v7148_v62  ;;  %v7142_v24 = vld [vmem:[%s9524_s3 + $0x48] sm:$0xff]  ;;  %v7141_v30 = vld [vmem:[%s9524_s3 + $0x40] sm:$0xff]  ;;  %v7172_v31 = vld [vmem:[%s9524_s3 + $0x138] sm:$0xff] }
  0x26   :  { %727 = vmatpush.bf16.msrb.mxu3 %v7164_v57  ;;  %315 = vmatmul.bf16.vlgmr.msra.gmra.mxu2 %v225_v2  ;;  %v7180_v32 = vld [vmem:[%s9524_s3 + $0x178] sm:$0xff]  ;;  %v7187_v33 = vld [vmem:[%s9524_s3 + $0x1b0] sm:$0xff]  ;;  %v7186_v38 = vld [vmem:[%s9524_s3 + $0x1a8] sm:$0xff] }
  0x27   :  { %329 = vmatmul.bf16.vlgmr.msra.gmra.mxu3 %v225_v2  ;;  %v7195_v34 = vld [vmem:[%s9524_s3 + $0x1f0] sm:$0xff]  ;;  %v7194_v39 = vld [vmem:[%s9524_s3 + $0x1e8] sm:$0xff]  ;;  %v7185_v42 = vld [vmem:[%s9524_s3 + $0x1a0] sm:$0xff] }
  0x28   :  { %532 = vmatpush.bf16.msrb.mxu0 %v7139_v3  ;;  %v7171_v35 = vld [vmem:[%s9524_s3 + $0x130] sm:$0xff]  ;;  %v7170_v40 = vld [vmem:[%s9524_s3 + $0x128] sm:$0xff]  ;;  %v7193_v43 = vld [vmem:[%s9524_s3 + $0x1e0] sm:$0xff] }
  0x29   :  { %714 = vmatpush.bf16.msrb.mxu2 %v7155_v0  ;;  %546 = vmatpush.bf16.msrb.mxu1 %v7147_v4  ;;  %v7179_v36 = vld [vmem:[%s9524_s3 + $0x170] sm:$0xff]  ;;  %v7178_v41 = vld [vmem:[%s9524_s3 + $0x168] sm:$0xff]  ;;  %v7169_v44 = vld [vmem:[%s9524_s3 + $0x120] sm:$0xff] }
  0x2a   :  { %728 = vmatpush.bf16.msrb.mxu3 %v7163_v1  ;;  %v7177_v45 = vld [vmem:[%s9524_s3 + $0x160] sm:$0xff]  ;;  %v7184_v46 = vld [vmem:[%s9524_s3 + $0x198] sm:$0xff]  ;;  %v7183_v51 = vld [vmem:[%s9524_s3 + $0x190] sm:$0xff] }
  0x2b   :  { %v7192_v47 = vld [vmem:[%s9524_s3 + $0x1d8] sm:$0xff]  ;;  %v7191_v52 = vld [vmem:[%s9524_s3 + $0x1d0] sm:$0xff]  ;;  %v51_v55 = vld [vmem:[%s9525_s2] sm:$0x3] }
  0x2c   :  { %533 = vmatpush.bf16.msrb.mxu0 %v7138_v7  ;;  %v7168_v48 = vld [vmem:[%s9524_s3 + $0x118] sm:$0xff]  ;;  %v7167_v53 = vld [vmem:[%s9524_s3 + $0x110] sm:$0xff]  ;;  %v7182_v56 = vld [vmem:[%s9524_s3 + $0x188] sm:$0xff]  ;;  %v53_v60 = vperm.slane %v51_v55, 0  ;;  %v54_v61 = vperm.slane %v51_v55, 1 }
  0x2d   :  { %715 = vmatpush.bf16.msrb.mxu2 %v7154_v5  ;;  %547 = vmatpush.bf16.msrb.mxu1 %v7146_v8  ;;  %v7176_v50 = vld [vmem:[%s9524_s3 + $0x158] sm:$0xff]  ;;  %v7175_v54 = vld [vmem:[%s9524_s3 + $0x150] sm:$0xff]  ;;  %v7190_v57 = vld [vmem:[%s9524_s3 + $0x1c8] sm:$0xff] }
  0x2e   :  { %729 = vmatpush.bf16.msrb.mxu3 %v7162_v6  ;;  %v7166_v58 = vld [vmem:[%s9524_s3 + $0x108] sm:$0xff]  ;;  %v7181_v0 = vld [vmem:[%s9524_s3 + $0x180] sm:$0xff]  ;;  %vm8035_vm14 = vmor %vm957_vm10, %vm958_vm11  ;;  %vm3247_vm11 = vcmask 517120  }
  0x2f   :  { %v7174_v59 = vld [vmem:[%s9524_s3 + $0x148] sm:$0xff]  ;;  %v7189_v1 = vld [vmem:[%s9524_s3 + $0x1c0] sm:$0xff]  ;;  %vm8049_vm15 = vmor %vm745_vm12, %vm746_vm13  ;;  %vm3250_vm12 = vcmask 519170  }
  0x30   :  { %534 = vmatpush.bf16.msrb.mxu0 %v7137_v11  ;;  %v7165_v4 = vld [vmem:[%s9524_s3 + $0x100] sm:$0xff]  ;;  %vm8258_vm10 = vmor %vm1529_vm7, %vm1530_vm8  ;;  %vm4262_vm8 = vsmask.f32 7954 }
  0x31   :  { %716 = vmatpush.bf16.msrb.mxu2 %v7153_v9  ;;  %548 = vmatpush.bf16.msrb.mxu1 %v7145_v12  ;;  %v7173_v5 = vld [vmem:[%s9524_s3 + $0x140] sm:$0xff] }
  0x32   :  { %730 = vmatpush.bf16.msrb.mxu3 %v7161_v10 }
  0x34   :  { %535 = vmatpush.bf16.msrb.mxu0 %v7136_v15 }
  0x35   :  { %717 = vmatpush.bf16.msrb.mxu2 %v7152_v13  ;;  %549 = vmatpush.bf16.msrb.mxu1 %v7144_v16 }
  0x36   :  { %731 = vmatpush.bf16.msrb.mxu3 %v7160_v14 }
  0x38   :  { %536 = vmatpush.bf16.msrb.mxu0 %v7135_v19 }
  0x39   :  { %718 = vmatpush.bf16.msrb.mxu2 %v7151_v17  ;;  %550 = vmatpush.bf16.msrb.mxu1 %v7143_v20 }
  0x3a   :  { %732 = vmatpush.bf16.msrb.mxu3 %v7159_v18 }
  0x3c   :  { %537 = vmatpush.bf16.msrb.mxu0 %v7134_v23 }
  0x3d   :  { %719 = vmatpush.bf16.msrb.mxu2 %v7150_v21  ;;  %551 = vmatpush.bf16.msrb.mxu1 %v7142_v24 }
  0x3e   :  { %733 = vmatpush.bf16.msrb.mxu3 %v7158_v22 }
  0x40   :  { %538 = vmatpush.bf16.msrb.mxu0 %v7133_v29 }
  0x41   :  { %720 = vmatpush.bf16.msrb.mxu2 %v7149_v25  ;;  %552 = vmatpush.bf16.msrb.mxu1 %v7141_v30  ;;  %v366_v25 = vrot.slane %v7503_v37, 4 }
  0x42   :  { %734 = vmatpush.bf16.msrb.mxu3 %v7157_v26  ;;  %v369_v26 = vrot.slane %v7503_v37, 5 }
  0x44   :  { %921 = vmatpush.bf16.msra.mxu0 %v7172_v31  ;;  %v370_v31 = vor.u32 %v369_v26, %v366_v25  ;;  %v7203_v25 = vld [vmem:[%s9524_s3 + $0x230] sm:$0xff] }
  0x45   :  { %1105 = vmatpush.bf16.msra.mxu2 %v7188_v27  ;;  %935 = vmatpush.bf16.msra.mxu1 %v7180_v32  ;;  %v7211_v26 = vld [vmem:[%s9524_s3 + $0x270] sm:$0xff] }
  0x46   :  { %1119 = vmatpush.bf16.msra.mxu3 %v7196_v28 }
  0x48   :  { %922 = vmatpush.bf16.msra.mxu0 %v7171_v35 }
  0x49   :  { %1106 = vmatpush.bf16.msra.mxu2 %v7187_v33  ;;  %936 = vmatpush.bf16.msra.mxu1 %v7179_v36  ;;  %v559_v33 = vld [vmem:[#allocation2] sm:$0xee] }
  0x4a   :  { %1120 = vmatpush.bf16.msra.mxu3 %v7195_v34  ;;  %v560_v34 = vld [vmem:[#allocation2 + $0x18] sm:$0xee]  ;;  %v5080_v35 = vrot.slane %v559_v33, 9 }
  0x4c   :  { %923 = vmatpush.bf16.msra.mxu0 %v7170_v40  ;;  %v371_v40 = vrot.slane %v370_v31, 4  ;;  %v7226_v31 = vld [vmem:[%s9524_s3 + $0x2e8] sm:$0xff] }
  0x4d   :  { %1107 = vmatpush.bf16.msra.mxu2 %v7186_v38  ;;  %937 = vmatpush.bf16.msra.mxu1 %v7178_v41  ;;  %v752_v41 = vshll.u32 %v559_v33, 16 }
  0x4e   :  { %1121 = vmatpush.bf16.msra.mxu3 %v7194_v39  ;;  %v749_v39 = vshrl.u32 %v559_v33, 16 }
  0x50   :  { %924 = vmatpush.bf16.msra.mxu0 %v7169_v44  ;;  %v5081_v44 = vrot.slane %v560_v34, 9 }
  0x51   :  { %1108 = vmatpush.bf16.msra.mxu2 %v7185_v42  ;;  %938 = vmatpush.bf16.msra.mxu1 %v7177_v45  ;;  %v767_v42 = vshrl.u32 %v560_v34, 16 }
  0x52   :  { %1122 = vmatpush.bf16.msra.mxu3 %v7193_v43  ;;  %v770_v43 = vshll.u32 %v560_v34, 16 }
  0x54   :  { %925 = vmatpush.bf16.msra.mxu0 %v7168_v48  ;;  %v772_v55 = vrot.slane %v770_v43, 6 }
  0x55   :  { %1109 = vmatpush.bf16.msra.mxu2 %v7184_v46  ;;  %939 = vmatpush.bf16.msra.mxu1 %v7176_v50  ;;  %v7983_v50 = vrot.slane %v749_v39, 5 }
  0x56   :  { %1123 = vmatpush.bf16.msra.mxu3 %v7192_v47 }
  0x58   :  { %926 = vmatpush.bf16.msra.mxu0 %v7167_v53  ;;  %v7987_v53 = vrot.slane %v752_v41, 6  ;;  %v7210_v41 = vld [vmem:[%s9524_s3 + $0x268] sm:$0xff] }
  0x59   :  { %1110 = vmatpush.bf16.msra.mxu2 %v7183_v51  ;;  %940 = vmatpush.bf16.msra.mxu1 %v7175_v54  ;;  %v769_v54 = vrot.slane %v767_v42, 5 }
  0x5a   :  { %1124 = vmatpush.bf16.msra.mxu3 %v7191_v52 }
  0x5c   :  { %927 = vmatpush.bf16.msra.mxu0 %v7166_v58 }
  0x5d   :  { %1111 = vmatpush.bf16.msra.mxu2 %v7182_v56  ;;  %941 = vmatpush.bf16.msra.mxu1 %v7174_v59 }
  0x5e   :  { %1125 = vmatpush.bf16.msra.mxu3 %v7190_v57 }
  0x60   :  { %928 = vmatpush.bf16.msra.mxu0 %v7165_v4 }
  0x61   :  { %1112 = vmatpush.bf16.msra.mxu2 %v7181_v0  ;;  %942 = vmatpush.bf16.msra.mxu1 %v7173_v5 }
  0x62   :  { %1126 = vmatpush.bf16.msra.mxu3 %v7189_v1 }
  0xa0   :  { %v152_v62 = vpop.f32.mrf.mxu0 }
  0xa1   :  { %v166_v63 = vpop.f32.mrf.mxu1  ;;  %v153_v2 = vadd.f32 %v152_v62, %v53_v60 }
  0xa2   :  { %v167_v3 = vadd.f32 %v166_v63, %v54_v61 }
  0xa8   :  { %v154_v12 = vpop.f32.mrf.mxu0 }
  0xa9   :  { %v316_v6 = vpop.f32.mrf.mxu2  ;;  %v168_v13 = vpop.f32.mrf.mxu1  ;;  %v155_v17 = vadd.f32 %v154_v12, %v53_v60  ;;  %v7204_v12 = vld [vmem:[%s9524_s3 + $0x238] sm:$0xff] }
  0xaa   :  { %v330_v7 = vpop.f32.mrf.mxu3  ;;  %v335_v8 = vadd.f32 %v316_v6, %v153_v2  ;;  %v169_v18 = vadd.f32 %v168_v13, %v54_v61  ;;  %v7220_v2 = vld [vmem:[%s9524_s3 + $0x2b8] sm:$0xff] }
  0xab   :  { %v336_v9 = vadd.f32 %v330_v7, %v167_v3  ;;  %v7228_v3 = vld [vmem:[%s9524_s3 + $0x2f8] sm:$0xff] }
  0xac   :  { %vm339_vm3 = vcmp.ge.f32.partialorder %v335_v8, 0.0  ;;  %v343_v10 = vmul.f32 0.01, %v335_v8  ;;  %v7212_v13 = vld [vmem:[%s9524_s3 + $0x278] sm:$0xff] }
  0xad   :  { %vm340_vm4 = vcmp.ge.f32.partialorder %v336_v9, 0.0  ;;  %v344_v11 = vmul.f32 0.01, %v336_v9 }
  0xae   :  { %v347_v14 = vsel %vm339_vm3, %v335_v8, %v343_v10  ;;  %vm1137_vm3 = vsmask.f32 1280 }
  0xaf   :  { %v348_v15 = vsel %vm340_vm4, %v336_v9, %v344_v11  ;;  %vm1138_vm4 = vsmask.f32 5392 }
  0xb0   :  { %v355_v16 = vpack.c.bf16 %v348_v15, %v347_v14 }
  0xb1   :  { %v318_v19 = vpop.f32.mrf.mxu2 }
  0xb2   :  { %357 = vst [vmem:[#allocation2 + $0x8] sm:$0xff] %v355_v16  ;;  %v332_v20 = vpop.f32.mrf.mxu3  ;;  %v337_v21 = vadd.f32 %v318_v19, %v155_v17  ;;  %v7219_v16 = vld [vmem:[%s9524_s3 + $0x2b0] sm:$0xff] }
  0xb3   :  { %v338_v22 = vadd.f32 %v332_v20, %v169_v18  ;;  %v7227_v17 = vld [vmem:[%s9524_s3 + $0x2f0] sm:$0xff]  ;;  %v773_v18 = vor.u32 %v772_v55, %v769_v54  ;;  %v7201_v54 = vld [vmem:[%s9524_s3 + $0x220] sm:$0xff] }
  0xb4   :  { %vm341_vm5 = vcmp.ge.f32.partialorder %v337_v21, 0.0  ;;  %v345_v23 = vmul.f32 0.01, %v337_v21  ;;  %v7209_v55 = vld [vmem:[%s9524_s3 + $0x260] sm:$0xff] }
  0xb5   :  { %vm342_vm6 = vcmp.ge.f32.partialorder %v338_v22, 0.0  ;;  %v346_v24 = vmul.f32 0.01, %v338_v22  ;;  %v774_v34 = vrot.slane %v773_v18, 4  ;;  %v7215_v18 = vld [vmem:[%s9524_s3 + $0x290] sm:$0xff] }
  0xb6   :  { %v349_v27 = vsel %vm341_vm5, %v337_v21, %v345_v23  ;;  %v952_v21 = vld [vmem:[#allocation2 + $0x18] sm:$0xcc]  ;;  %vm8125_vm5 = vmor %vm1349_vm0, %vm1350_vm1 }
  0xb7   :  { %v350_v28 = vsel %vm342_vm6, %v338_v22, %v346_v24  ;;  %v755_v22 = vor.u32 %v7987_v53, %v7983_v50  ;;  %v1162_v50 = vshll.u32 %v952_v21, 16  ;;  %vm8139_vm6 = vmor %vm1137_vm3, %vm1138_vm4  ;;  %vm3330_vm4 = vcmask 523264  }
  0xb8   :  { %v356_v29 = vpack.c.bf16 %v350_v28, %v349_v27  ;;  %v5275_v27 = vrot.slane %v952_v21, 10 }
  0xb9   :  { %v360_v30 = vld [vmem:[#allocation2 + $0x8] sm:$0x11]  ;;  %v756_v39 = vrot.slane %v755_v22, 4 }
  0xba   :  { %358 = vst [vmem:[#allocation2 + $0x20] sm:$0xff] %v356_v29  ;;  %v373_v32 = vshll.u32 %v360_v30, 16  ;;  %v570_v36 = vrot.slane %v360_v30, 5  ;;  %v7979_v45 = vld [vmem:[#allocation2 + $0x8] sm:$0x33] }
  0xbb   :  { %v758_v57 = vshrl.u32 %v7979_v45, 16  ;;  %v761_v61 = vshll.u32 %v7979_v45, 16  ;;  %v951_v29 = vld [vmem:[#allocation2] sm:$0xcc]  ;;  %v7218_v30 = vld [vmem:[%s9524_s3 + $0x2a8] sm:$0xff]  ;;  %v962_v33 = vrot.slane %v7979_v45, 6 }
  0xbc   :  { %v375_v37 = vrot.slane %v373_v32, 5  ;;  %v571_v47 = vsel %vm7975_vm9, %v5080_v35, %v570_v36  ;;  %v5274_v32 = vrot.slane %v951_v29, 10  ;;  %v7225_v45 = vld [vmem:[%s9524_s3 + $0x2e0] sm:$0xff] }
  0xbd   :  { %v609_v59 = vunpack.c.l.b16 %v571_v47  ;;  %v610_v63 = vunpack.c.h.b16 %v571_v47  ;;  %v760_v23 = vrot.slane %v758_v57, 5  ;;  %v763_v24 = vrot.slane %v761_v61, 6 }
  0xbe   :  { %v376_v51 = vsel %vm7766_vm2, %v371_v40, %v375_v37  ;;  %v7202_v37 = vld [vmem:[%s9524_s3 + $0x228] sm:$0xff]  ;;  %v1141_v57 = vshrl.u32 %v951_v29, 16 }
  0xbf   :  { %v427_v1 = vunpack.c.l.b16 %v376_v51  ;;  %v428_v5 = vunpack.c.h.b16 %v376_v51 }
  0xc1   :  { %v362_v46 = vld [vmem:[#allocation2 + $0x20] sm:$0x11] }
  0xc2   :  { %v574_v48 = vrot.slane %v362_v46, 5  ;;  %v387_v52 = vshll.u32 %v362_v46, 16  ;;  %v7989_v56 = vld [vmem:[#allocation2 + $0x20] sm:$0x33]  ;;  %v963_v46 = vsel %vm8035_vm14, %v5274_v32, %v962_v33  ;;  %v7214_v32 = vld [vmem:[%s9524_s3 + $0x288] sm:$0xff] }
  0xc3   :  { %v776_v6 = vshrl.u32 %v7989_v56, 16  ;;  %v779_v7 = vshll.u32 %v7989_v56, 16  ;;  %v966_v28 = vrot.slane %v7989_v56, 6  ;;  %v8071_v56 = vld [vmem:[#allocation2 + $0x20] sm:$0x77]  ;;  %v7222_v33 = vld [vmem:[%s9524_s3 + $0x2c8] sm:$0xff] }
  0xc4   :  { %v575_v58 = vsel %vm7975_vm9, %v5081_v44, %v574_v48  ;;  %v389_v60 = vrot.slane %v387_v52, 5  ;;  %v7217_v44 = vld [vmem:[%s9524_s3 + $0x2a0] sm:$0xff]  ;;  %v1159_v48 = vshrl.u32 %v952_v21, 16 }
  0xc5   :  { %v611_v62 = vunpack.c.l.b16 %v575_v58  ;;  %v612_v0 = vunpack.c.h.b16 %v575_v58  ;;  %v778_v19 = vrot.slane %v776_v6, 5  ;;  %v781_v20 = vrot.slane %v779_v7, 6  ;;  %v8099_v21 = vld [vmem:[#allocation2] sm:$0x88] }
  0xc6   :  { %v390_v4 = vsel %vm7766_vm2, %v371_v40, %v389_v60  ;;  %v764_v40 = vor.u32 %v763_v24, %v760_v23  ;;  %v967_v42 = vsel %vm8035_vm14, %v5275_v27, %v966_v28  ;;  %v1144_v58 = vshll.u32 %v951_v29, 16 }
  0xc7   :  { %v613_v8 = vpack.c.b16 %v611_v62, %v609_v59  ;;  %v614_v9 = vpack.c.b16 %v612_v0, %v610_v63  ;;  %v429_v10 = vunpack.c.l.b16 %v390_v4  ;;  %v430_v11 = vunpack.c.h.b16 %v390_v4  ;;  %v7216_v63 = vld [vmem:[%s9524_s3 + $0x298] sm:$0xff] }
  0xc8   :  { %v782_v35 = vor.u32 %v781_v20, %v778_v19  ;;  %v1003_v51 = vunpack.c.l.b16 %v967_v42  ;;  %v1004_v52 = vunpack.c.h.b16 %v967_v42  ;;  %v765_v53 = vsel %vm8049_vm15, %v756_v39, %v764_v40  ;;  %v7224_v0 = vld [vmem:[%s9524_s3 + $0x2d8] sm:$0xff]  ;;  %v7223_v19 = vld [vmem:[%s9524_s3 + $0x2d0] sm:$0xff] }
  0xc9   :  { %721 = vmatmul.bf16.vlgmr.msrb.gmra.mxu2 %v613_v8  ;;  %735 = vmatmul.bf16.vlgmr.msrb.gmra.mxu3 %v614_v9  ;;  %v431_v14 = vpack.c.b16 %v429_v10, %v427_v1  ;;  %v432_v15 = vpack.c.b16 %v430_v11, %v428_v5  ;;  %v1001_v59 = vunpack.c.l.b16 %v963_v46  ;;  %v1002_v60 = vunpack.c.h.b16 %v963_v46  ;;  %v7200_v10 = vld [vmem:[%s9524_s3 + $0x218] sm:$0xff] }
  0xca   :  { %1497 = vmatpush.bf16.msrb.mxu2 %v7220_v2  ;;  %1511 = vmatpush.bf16.msrb.mxu3 %v7228_v3  ;;  %v783_v47 = vsel %vm8049_vm15, %v774_v34, %v782_v35  ;;  %v817_v1 = vunpack.c.l.b16 %v765_v53  ;;  %v818_v2 = vunpack.c.h.b16 %v765_v53  ;;  %v8079_v3 = vld [vmem:[#allocation2 + $0x8] sm:$0x77]  ;;  %v1161_v4 = vrot.slane %v1159_v48, 6  ;;  %v7208_v11 = vld [vmem:[%s9524_s3 + $0x258] sm:$0xff]  ;;  %v7221_v48 = vld [vmem:[%s9524_s3 + $0x2c0] sm:$0xff] }
  0xcb   :  { %539 = vmatmul.bf16.vlgmr.msrb.gmra.mxu0 %v431_v14  ;;  %553 = vmatmul.bf16.vlgmr.msrb.gmra.mxu1 %v432_v15  ;;  %v819_v61 = vunpack.c.l.b16 %v783_v47  ;;  %v820_v62 = vunpack.c.h.b16 %v783_v47  ;;  %v1164_v5 = vrot.slane %v1162_v50, 7  ;;  %v1005_v6 = vpack.c.b16 %v1003_v51, %v1001_v59  ;;  %v8097_v20 = vld [vmem:[#allocation2 + $0x18] sm:$0x88]  ;;  %v7213_v47 = vld [vmem:[%s9524_s3 + $0x280] sm:$0xff] }
  0xcc   :  { %1313 = vmatpush.bf16.msrb.mxu0 %v7204_v12  ;;  %1327 = vmatpush.bf16.msrb.mxu1 %v7212_v13  ;;  %v1006_v7 = vpack.c.b16 %v1004_v52, %v1002_v60  ;;  %v1168_v8 = vshrl.u32 %v8071_v56, 16  ;;  %v1171_v9 = vshll.u32 %v8071_v56, 16  ;;  %v1143_v12 = vrot.slane %v1141_v57, 6  ;;  %v7254_v51 = vld [vmem:[%s9524_s3 + $0x3b8] sm:$0xff] }
  0xcd   :  { %v1146_v13 = vrot.slane %v1144_v58, 7  ;;  %v821_v14 = vpack.c.b16 %v819_v61, %v817_v1  ;;  %v822_v15 = vpack.c.b16 %v820_v62, %v818_v2  ;;  %v1165_v22 = vor.u32 %v1164_v5, %v1161_v4  ;;  %v7262_v52 = vld [vmem:[%s9524_s3 + $0x3f8] sm:$0xff]  ;;  %v7253_v2 = vld [vmem:[%s9524_s3 + $0x3b0] sm:$0xff] }
  0xce   :  { %1498 = vmatpush.bf16.msrb.mxu2 %v7219_v16  ;;  %1512 = vmatpush.bf16.msrb.mxu3 %v7227_v17  ;;  %v1150_v16 = vshrl.u32 %v8079_v3, 16  ;;  %v1153_v17 = vshll.u32 %v8079_v3, 16  ;;  %v1170_v23 = vrot.slane %v1168_v8, 6  ;;  %v1173_v24 = vrot.slane %v1171_v9, 7  ;;  %v7238_v59 = vld [vmem:[%s9524_s3 + $0x338] sm:$0xff]  ;;  %v7237_v8 = vld [vmem:[%s9524_s3 + $0x330] sm:$0xff] }
  0xcf   :  { %v1147_v27 = vor.u32 %v1146_v13, %v1143_v12  ;;  %v5469_v28 = vrot.slane %v8097_v20, 11  ;;  %v1358_v29 = vrot.slane %v8071_v56, 7  ;;  %v5468_v34 = vrot.slane %v8099_v21, 11  ;;  %v7205_v56 = vld [vmem:[%s9524_s3 + $0x240] sm:$0xff]  ;;  %v7246_v60 = vld [vmem:[%s9524_s3 + $0x378] sm:$0xff]  ;;  %v7245_v9 = vld [vmem:[%s9524_s3 + $0x370] sm:$0xff] }
  0xd0   :  { %1314 = vmatpush.bf16.msrb.mxu0 %v7203_v25  ;;  %1328 = vmatpush.bf16.msrb.mxu1 %v7211_v26  ;;  %v7199_v25 = vld [vmem:[%s9524_s3 + $0x210] sm:$0xff]  ;;  %v1354_v35 = vrot.slane %v8079_v3, 7  ;;  %v1166_v39 = vrot.slane %v1165_v22, 4  ;;  %v1174_v40 = vor.u32 %v1173_v24, %v1170_v23  ;;  %v7252_v12 = vld [vmem:[%s9524_s3 + $0x3a8] sm:$0xff]  ;;  %v7243_v22 = vld [vmem:[%s9524_s3 + $0x360] sm:$0xff] }
  0xd1   :  { %v7207_v26 = vld [vmem:[%s9524_s3 + $0x250] sm:$0xff]  ;;  %v7260_v13 = vld [vmem:[%s9524_s3 + $0x3e8] sm:$0xff]  ;;  %v7250_v24 = vld [vmem:[%s9524_s3 + $0x398] sm:$0xff] }
  0xd2   :  { %1499 = vmatpush.bf16.msrb.mxu2 %v7218_v30  ;;  %1513 = vmatpush.bf16.msrb.mxu3 %v7226_v31  ;;  %v1152_v30 = vrot.slane %v1150_v16, 6  ;;  %v1155_v31 = vrot.slane %v1153_v17, 7  ;;  %v1355_v53 = vsel %vm8125_vm5, %v5468_v34, %v1354_v35  ;;  %v7261_v3 = vld [vmem:[%s9524_s3 + $0x3f0] sm:$0xff]  ;;  %v7251_v16 = vld [vmem:[%s9524_s3 + $0x3a0] sm:$0xff]  ;;  %v8205_v23 = vld [vmem:[#allocation2 + $0x8] sm:$0xff] }
  0xd3   :  { %v1393_v62 = vunpack.c.l.b16 %v1355_v53  ;;  %v7259_v17 = vld [vmem:[%s9524_s3 + $0x3e0] sm:$0xff]  ;;  %v7233_v34 = vld [vmem:[%s9524_s3 + $0x310] sm:$0xff] }
  0xd4   :  { %1315 = vmatpush.bf16.msrb.mxu0 %v7202_v37  ;;  %1329 = vmatpush.bf16.msrb.mxu1 %v7210_v41  ;;  %v7198_v37 = vld [vmem:[%s9524_s3 + $0x208] sm:$0xff]  ;;  %v1156_v46 = vor.u32 %v1155_v31, %v1152_v30  ;;  %v7249_v30 = vld [vmem:[%s9524_s3 + $0x390] sm:$0xff] }
  0xd5   :  { %v7206_v41 = vld [vmem:[%s9524_s3 + $0x248] sm:$0xff]  ;;  %v7257_v31 = vld [vmem:[%s9524_s3 + $0x3d0] sm:$0xff] }
  0xd6   :  { %1500 = vmatpush.bf16.msrb.mxu2 %v7217_v44  ;;  %1514 = vmatpush.bf16.msrb.mxu3 %v7225_v45  ;;  %v1359_v44 = vsel %vm8125_vm5, %v5469_v28, %v1358_v29  ;;  %v1148_v45 = vrot.slane %v1147_v27, 4  ;;  %v7234_v27 = vld [vmem:[%s9524_s3 + $0x318] sm:$0xff]  ;;  %v1538_v29 = vshrl.u32 %v8205_v23, 16  ;;  %v7241_v35 = vld [vmem:[%s9524_s3 + $0x350] sm:$0xff] }
  0xd7   :  { %v1395_v57 = vunpack.c.l.b16 %v1359_v44  ;;  %v1396_v58 = vunpack.c.h.b16 %v1359_v44  ;;  %v7242_v28 = vld [vmem:[%s9524_s3 + $0x358] sm:$0xff]  ;;  %v1541_v44 = vshll.u32 %v8205_v23, 16  ;;  %v7265_v23 = vld [vmem:[%s9524_s3 + $0x410] sm:$0xff] }
  0xd8   :  { %1316 = vmatpush.bf16.msrb.mxu0 %v7201_v54  ;;  %1330 = vmatpush.bf16.msrb.mxu1 %v7209_v55  ;;  %v1175_v54 = vsel %vm8139_vm6, %v1166_v39, %v1174_v40  ;;  %v7197_v55 = vld [vmem:[%s9524_s3 + $0x200] sm:$0xff]  ;;  %v1157_v61 = vsel %vm8139_vm6, %v1148_v45, %v1156_v46  ;;  %v1533_v39 = vshrl.u32 %v8099_v21, 16  ;;  %v1540_v40 = vrot.slane %v1538_v29, 7  ;;  %v7232_v46 = vld [vmem:[%s9524_s3 + $0x308] sm:$0xff] }
  0xd9   :  { %1113 = vmatmul.bf16.vlgmr.msra.gmra.mxu2 %v1005_v6  ;;  %1127 = vmatmul.bf16.vlgmr.msra.gmra.mxu3 %v1006_v7  ;;  %v1212_v1 = vunpack.c.h.b16 %v1175_v54  ;;  %v1397_v4 = vpack.c.b16 %v1395_v57, %v1393_v62  ;;  %v1209_v6 = vunpack.c.l.b16 %v1157_v61  ;;  %v1210_v7 = vunpack.c.h.b16 %v1157_v61  ;;  %v7294_v57 = vld [vmem:[%s9524_s3 + $0x4f8] sm:$0xff]  ;;  %v5700_v61 = vld [vmem:[#allocation2 + $0x20] sm:$0xf0] }
  0xda   :  { %1501 = vmatpush.bf16.msrb.mxu2 %v7216_v63  ;;  %1515 = vmatpush.bf16.msrb.mxu3 %v7224_v0  ;;  %v1394_v63 = vunpack.c.h.b16 %v1355_v53  ;;  %v1211_v0 = vunpack.c.l.b16 %v1175_v54  ;;  %v7247_v53 = vld [vmem:[%s9524_s3 + $0x380] sm:$0xff] }
  0xdb   :  { %929 = vmatmul.bf16.vlgmr.msra.gmra.mxu0 %v821_v14  ;;  %943 = vmatmul.bf16.vlgmr.msra.gmra.mxu1 %v822_v15  ;;  %v7236_v14 = vld [vmem:[%s9524_s3 + $0x328] sm:$0xff]  ;;  %v7255_v54 = vld [vmem:[%s9524_s3 + $0x3c0] sm:$0xff] }
  0xdc   :  { %1317 = vmatpush.bf16.msrb.mxu0 %v7200_v10  ;;  %1331 = vmatpush.bf16.msrb.mxu1 %v7208_v11  ;;  %v1398_v5 = vpack.c.b16 %v1396_v58, %v1394_v63  ;;  %v1213_v10 = vpack.c.b16 %v1211_v0, %v1209_v6  ;;  %v1214_v11 = vpack.c.b16 %v1212_v1, %v1210_v7  ;;  %v7244_v15 = vld [vmem:[%s9524_s3 + $0x368] sm:$0xff]  ;;  %v7230_v58 = vld [vmem:[#allocation2 + $0x1c] sm:$0xf0] }
  0xdd   :  { %v5698_v63 = vld [vmem:[#allocation2 + $0x8] sm:$0xf] }
  0xde   :  { %1502 = vmatpush.bf16.msrb.mxu2 %v7215_v18  ;;  %1516 = vmatpush.bf16.msrb.mxu3 %v7223_v19  ;;  %v8197_v18 = vld [vmem:[#allocation2 + $0x20] sm:$0xff] }
  0xdf   :  { %v7235_v19 = vld [vmem:[%s9524_s3 + $0x320] sm:$0xff] }
  0xe0   :  { %1318 = vmatpush.bf16.msrb.mxu0 %v7199_v25  ;;  %1332 = vmatpush.bf16.msrb.mxu1 %v7207_v26  ;;  %v7258_v25 = vld [vmem:[%s9524_s3 + $0x3d8] sm:$0xff]  ;;  %v1551_v26 = vshrl.u32 %v8197_v18, 16 }
  0xe2   :  { %1503 = vmatpush.bf16.msrb.mxu2 %v7214_v32  ;;  %1517 = vmatpush.bf16.msrb.mxu3 %v7222_v33  ;;  %v1546_v32 = vshrl.u32 %v8097_v20, 16  ;;  %v1553_v33 = vrot.slane %v1551_v26, 7  ;;  %v1554_v20 = vshll.u32 %v8197_v18, 16  ;;  %v7281_v18 = vld [vmem:[%s9524_s3 + $0x490] sm:$0xff] }
  0xe4   :  { %1319 = vmatpush.bf16.msrb.mxu0 %v7198_v37  ;;  %1333 = vmatpush.bf16.msrb.mxu1 %v7206_v41  ;;  %v7248_v37 = vld [vmem:[%s9524_s3 + $0x388] sm:$0xff]  ;;  %v5567_v21 = vrot.slane %v1546_v32, 11  ;;  %v1556_v45 = vor.u32 %v1554_v20, %v1553_v33  ;;  %v1918_v32 = vrot.slane %v1554_v20, 5  ;;  %v7266_v33 = vld [vmem:[%s9524_s3 + $0x418] sm:$0xff]  ;;  %v7289_v20 = vld [vmem:[%s9524_s3 + $0x4d0] sm:$0xff] }
  0xe5   :  { %v7256_v41 = vld [vmem:[%s9524_s3 + $0x3c8] sm:$0xff] }
  0xe6   :  { %1504 = vmatpush.bf16.msrb.mxu2 %v7213_v47  ;;  %1518 = vmatpush.bf16.msrb.mxu3 %v7221_v48  ;;  %v7240_v47 = vld [vmem:[%s9524_s3 + $0x348] sm:$0xff]  ;;  %v5566_v48 = vrot.slane %v1533_v39, 11  ;;  %v1904_v39 = vrot.slane %v1541_v44, 5 }
  0xe8   :  { %1320 = vmatpush.bf16.msrb.mxu0 %v7197_v55  ;;  %1334 = vmatpush.bf16.msrb.mxu1 %v7205_v56  ;;  %v1557_v55 = vsel %vm8258_vm10, %v5567_v21, %v1556_v45  ;;  %v7286_v56 = vld [vmem:[%s9524_s3 + $0x4b8] sm:$0xff]  ;;  %v1895_v21 = vld [vmem:[#allocation2 + $0x10] sm:$0x11] }
  0xe9   :  { %1505 = vmatmul.bf16.vlgmr.msrb.gmra.mxu2 %v1397_v4  ;;  %1519 = vmatmul.bf16.vlgmr.msrb.gmra.mxu3 %v1398_v5  ;;  %v1593_v0 = vunpack.c.l.b16 %v1557_v55  ;;  %v1594_v1 = vunpack.c.h.b16 %v1557_v55  ;;  %v7278_v4 = vld [vmem:[%s9524_s3 + $0x478] sm:$0xff]  ;;  %v5699_v5 = vor.u32 %v7230_v58, %v5698_v63  ;;  %v2101_v55 = vrot.slane %v1895_v21, 5  ;;  %v7264_v58 = vld [vmem:[%s9524_s3 + $0x408] sm:$0xff]  ;;  %v7279_v63 = vld [vmem:[%s9524_s3 + $0x480] sm:$0xff] }
  0xea   :  { %1864 = vmatpush.bf16.msra.mxu2 %v7254_v51  ;;  %1878 = vmatpush.bf16.msra.mxu3 %v7262_v52  ;;  %v1543_v51 = vor.u32 %v1541_v44, %v1540_v40  ;;  %v8346_v40 = vld [vmem:[#allocation2 + $0x20] sm:$0xee]  ;;  %v7273_v44 = vld [vmem:[%s9524_s3 + $0x450] sm:$0xff] }
  0xeb   :  { %1321 = vmatmul.bf16.vlgmr.msrb.gmra.mxu0 %v1213_v10  ;;  %1335 = vmatmul.bf16.vlgmr.msrb.gmra.mxu1 %v1214_v11  ;;  %v7293_v10 = vld [vmem:[%s9524_s3 + $0x4f0] sm:$0xff]  ;;  %v5865_v45 = vrot.slane %v8346_v40, 9 }
  0xec   :  { %1695 = vmatpush.bf16.msra.mxu0 %v7238_v59  ;;  %1709 = vmatpush.bf16.msra.mxu1 %v7246_v60  ;;  %v7231_v59 = vld [vmem:[%s9524_s3 + $0x300] sm:$0xff]  ;;  %v1544_v62 = vsel %vm8258_vm10, %v5566_v48, %v1543_v51  ;;  %v1908_v48 = vshll.u32 %v1895_v21, 16  ;;  %v7280_v51 = vld [vmem:[%s9524_s3 + $0x488] sm:$0xff] }
  0xed   :  { %v7239_v60 = vld [vmem:[%s9524_s3 + $0x340] sm:$0xff]  ;;  %v1591_v7 = vunpack.c.l.b16 %v1544_v62 }
  0xee   :  { %1865 = vmatpush.bf16.msra.mxu2 %v7253_v2  ;;  %1879 = vmatpush.bf16.msra.mxu3 %v7261_v3  ;;  %v7229_v2 = vld [vmem:[#allocation2 + $0xc] sm:$0xf]  ;;  %v7270_v3 = vld [vmem:[%s9524_s3 + $0x438] sm:$0xff] }
  0xef   :  { %v5703_v6 = vor.u32 %v7229_v2, %v5700_v61  ;;  %v1595_v11 = vpack.c.b16 %v1593_v0, %v1591_v7  ;;  %v7287_v0 = vld [vmem:[%s9524_s3 + $0x4c0] sm:$0xff] }
  0xf0   :  { %1696 = vmatpush.bf16.msra.mxu0 %v7237_v8  ;;  %1710 = vmatpush.bf16.msra.mxu1 %v7245_v9  ;;  %v1592_v8 = vunpack.c.h.b16 %v1544_v62  ;;  %v7285_v9 = vld [vmem:[%s9524_s3 + $0x4b0] sm:$0xff]  ;;  %v1910_v62 = vrot.slane %v1908_v48, 5  ;;  %v7263_v7 = vld [vmem:[%s9524_s3 + $0x400] sm:$0xff] }
  0xf2   :  { %1866 = vmatpush.bf16.msra.mxu2 %v7252_v12  ;;  %1880 = vmatpush.bf16.msra.mxu3 %v7260_v13  ;;  %v1596_v12 = vpack.c.b16 %v1594_v1, %v1592_v8  ;;  %v7269_v13 = vld [vmem:[%s9524_s3 + $0x430] sm:$0xff]  ;;  %v7271_v8 = vld [vmem:[%s9524_s3 + $0x440] sm:$0xff] }
  0xf4   :  { %1697 = vmatpush.bf16.msra.mxu0 %v7236_v14  ;;  %1711 = vmatpush.bf16.msra.mxu1 %v7244_v15  ;;  %v7277_v14 = vld [vmem:[%s9524_s3 + $0x470] sm:$0xff]  ;;  %v7284_v15 = vld [vmem:[%s9524_s3 + $0x4a8] sm:$0xff] }
  0xf6   :  { %1867 = vmatpush.bf16.msra.mxu2 %v7251_v16  ;;  %1881 = vmatpush.bf16.msra.mxu3 %v7259_v17  ;;  %v7292_v16 = vld [vmem:[%s9524_s3 + $0x4e8] sm:$0xff] }
  0xf7   :  { %v7268_v17 = vld [vmem:[%s9524_s3 + $0x428] sm:$0xff] }
  0xf8   :  { %1698 = vmatpush.bf16.msra.mxu0 %v7235_v19  ;;  %1712 = vmatpush.bf16.msra.mxu1 %v7243_v22  ;;  %v7276_v19 = vld [vmem:[%s9524_s3 + $0x468] sm:$0xff]  ;;  %v7283_v22 = vld [vmem:[%s9524_s3 + $0x4a0] sm:$0xff] }
  0xfa   :  { %1868 = vmatpush.bf16.msra.mxu2 %v7250_v24  ;;  %1882 = vmatpush.bf16.msra.mxu3 %v7258_v25  ;;  %v7291_v24 = vld [vmem:[%s9524_s3 + $0x4e0] sm:$0xff] }
  0xfb   :  { %v7267_v25 = vld [vmem:[%s9524_s3 + $0x420] sm:$0xff] }
  0xfc   :  { %1699 = vmatpush.bf16.msra.mxu0 %v7234_v27  ;;  %1713 = vmatpush.bf16.msra.mxu1 %v7242_v28  ;;  %v7275_v27 = vld [vmem:[%s9524_s3 + $0x460] sm:$0xff]  ;;  %v7282_v28 = vld [vmem:[%s9524_s3 + $0x498] sm:$0xff] }
  0xfe   :  { %1869 = vmatpush.bf16.msra.mxu2 %v7249_v30  ;;  %1883 = vmatpush.bf16.msra.mxu3 %v7257_v31  ;;  %v7290_v30 = vld [vmem:[%s9524_s3 + $0x4d8] sm:$0xff]  ;;  %v1915_v31 = vrot.slane %v1551_v26, 4  ;;  %v1897_v26 = vld [vmem:[#allocation2 + $0x28] sm:$0x11] }
 0x100   :  { %1700 = vmatpush.bf16.msra.mxu0 %v7233_v34  ;;  %1714 = vmatpush.bf16.msra.mxu1 %v7241_v35  ;;  %v7274_v34 = vld [vmem:[%s9524_s3 + $0x458] sm:$0xff]  ;;  %v1901_v35 = vrot.slane %v1538_v29, 4  ;;  %v8354_v29 = vld [vmem:[#allocation2 + $0x8] sm:$0xee] }
 0x101   :  { %v2277_v21 = vshrl.u32 %v8354_v29, 16 }
 0x102   :  { %1870 = vmatpush.bf16.msra.mxu2 %v7248_v37  ;;  %1884 = vmatpush.bf16.msra.mxu3 %v7256_v41  ;;  %v1919_v37 = vor.u32 %v1918_v32, %v1915_v31  ;;  %v1922_v41 = vshll.u32 %v1897_v26, 16  ;;  %v7309_v31 = vld [vmem:[%s9524_s3 + $0x570] sm:$0xff]  ;;  %v7316_v32 = vld [vmem:[%s9524_s3 + $0x5a8] sm:$0xff] }
 0x104   :  { %1701 = vmatpush.bf16.msra.mxu0 %v7232_v46  ;;  %1715 = vmatpush.bf16.msra.mxu1 %v7240_v47  ;;  %v2105_v46 = vrot.slane %v1897_v26, 5  ;;  %v1905_v47 = vor.u32 %v1904_v39, %v1901_v35  ;;  %v7308_v35 = vld [vmem:[%s9524_s3 + $0x568] sm:$0xff]  ;;  %v7315_v39 = vld [vmem:[%s9524_s3 + $0x5a0] sm:$0xff] }
 0x105   :  { %v7323_v26 = vld [vmem:[%s9524_s3 + $0x5e0] sm:$0xff] }
 0x106   :  { %1871 = vmatpush.bf16.msra.mxu2 %v7247_v53  ;;  %1885 = vmatpush.bf16.msra.mxu3 %v7255_v54  ;;  %v7288_v53 = vld [vmem:[%s9524_s3 + $0x4c8] sm:$0xff]  ;;  %v5864_v54 = vrot.slane %v8354_v29, 9  ;;  %v1906_v61 = vrot.slane %v1905_v47, 4 }
 0x108   :  { %1702 = vmatpush.bf16.msra.mxu0 %v7231_v59  ;;  %1716 = vmatpush.bf16.msra.mxu1 %v7239_v60  ;;  %v7272_v59 = vld [vmem:[%s9524_s3 + $0x448] sm:$0xff]  ;;  %v2106_v60 = vsel %vm7975_vm9, %v5865_v45, %v2105_v46  ;;  %v2102_v1 = vsel %vm7975_vm9, %v5864_v54, %v2101_v55  ;;  %v7322_v45 = vld [vmem:[%s9524_s3 + $0x5d8] sm:$0xff]  ;;  %v8454_v54 = vld [vmem:[#allocation2 + $0x20] sm:$0xcc] }
 0x109   :  { %1872 = vmatmul.bf16.vlgmr.msra.gmra.mxu2 %v5699_v5  ;;  %1886 = vmatmul.bf16.vlgmr.msra.gmra.mxu3 %v5703_v6  ;;  %v2142_v5 = vunpack.c.l.b16 %v2106_v60  ;;  %v2143_v6 = vunpack.c.h.b16 %v2106_v60  ;;  %v7306_v55 = vld [vmem:[%s9524_s3 + $0x558] sm:$0xff]  ;;  %v7313_v60 = vld [vmem:[%s9524_s3 + $0x590] sm:$0xff] }
 0x10a   :  { %2244 = vmatpush.bf16.msrb.mxu2 %v7286_v56  ;;  %2258 = vmatpush.bf16.msrb.mxu3 %v7294_v57  ;;  %v1920_v56 = vrot.slane %v1919_v37, 4  ;;  %v1924_v57 = vrot.slane %v1922_v41, 5  ;;  %v7299_v37 = vld [vmem:[%s9524_s3 + $0x520] sm:$0xff] }
 0x10b   :  { %1703 = vmatmul.bf16.vlgmr.msra.gmra.mxu0 %v1595_v11  ;;  %1717 = vmatmul.bf16.vlgmr.msra.gmra.mxu1 %v1596_v12  ;;  %v2141_v11 = vunpack.c.h.b16 %v2102_v1  ;;  %v7307_v41 = vld [vmem:[%s9524_s3 + $0x560] sm:$0xff] }
 0x10c   :  { %2063 = vmatpush.bf16.msrb.mxu0 %v7270_v3  ;;  %2077 = vmatpush.bf16.msrb.mxu1 %v7278_v4  ;;  %v1925_v2 = vsel %vm7766_vm2, %v1920_v56, %v1924_v57  ;;  %v7318_v3 = vld [vmem:[%s9524_s3 + $0x5b8] sm:$0xff]  ;;  %v2279_v56 = vrot.slane %v2277_v21, 5 }
 0x10d   :  { %v7326_v4 = vld [vmem:[%s9524_s3 + $0x5f8] sm:$0xff]  ;;  %v1961_v12 = vunpack.c.l.b16 %v1925_v2 }
 0x10e   :  { %2245 = vmatpush.bf16.msrb.mxu2 %v7285_v9  ;;  %2259 = vmatpush.bf16.msrb.mxu3 %v7293_v10  ;;  %v1911_v9 = vsel %vm7766_vm2, %v1906_v61, %v1910_v62  ;;  %v2140_v10 = vunpack.c.l.b16 %v2102_v1  ;;  %v7321_v61 = vld [vmem:[%s9524_s3 + $0x5d0] sm:$0xff]  ;;  %v8468_v1 = vld [vmem:[#allocation2 + $0x8] sm:$0xcc]  ;;  %v7342_v21 = vld [vmem:[%s9524_s3 + $0x678] sm:$0xff] }
 0x110   :  { %2064 = vmatpush.bf16.msrb.mxu0 %v7269_v13  ;;  %2078 = vmatpush.bf16.msrb.mxu1 %v7277_v14  ;;  %v1962_v13 = vunpack.c.h.b16 %v1925_v2  ;;  %v7302_v14 = vld [vmem:[%s9524_s3 + $0x538] sm:$0xff]  ;;  %v6059_v2 = vrot.slane %v8454_v54, 10 }
 0x112   :  { %2246 = vmatpush.bf16.msrb.mxu2 %v7284_v15  ;;  %2260 = vmatpush.bf16.msrb.mxu3 %v7292_v16  ;;  %v7310_v15 = vld [vmem:[%s9524_s3 + $0x578] sm:$0xff]  ;;  %v2144_v16 = vpack.c.b16 %v2142_v5, %v2140_v10  ;;  %v7320_v10 = vld [vmem:[%s9524_s3 + $0x5c8] sm:$0xff] }
 0x114   :  { %2065 = vmatpush.bf16.msrb.mxu0 %v7268_v17  ;;  %2079 = vmatpush.bf16.msrb.mxu1 %v7276_v19  ;;  %v2145_v17 = vpack.c.b16 %v2143_v6, %v2141_v11  ;;  %v1959_v19 = vunpack.c.l.b16 %v1911_v9  ;;  %v6058_v11 = vrot.slane %v8468_v1, 10 }
 0x116   :  { %2247 = vmatpush.bf16.msrb.mxu2 %v7283_v22  ;;  %2261 = vmatpush.bf16.msrb.mxu3 %v7291_v24  ;;  %v1960_v22 = vunpack.c.h.b16 %v1911_v9  ;;  %v7317_v24 = vld [vmem:[%s9524_s3 + $0x5b0] sm:$0xff]  ;;  %v7312_v9 = vld [vmem:[%s9524_s3 + $0x588] sm:$0xff] }
 0x118   :  { %2066 = vmatpush.bf16.msrb.mxu0 %v7267_v25  ;;  %2080 = vmatpush.bf16.msrb.mxu1 %v7275_v27  ;;  %v7325_v25 = vld [vmem:[%s9524_s3 + $0x5f0] sm:$0xff]  ;;  %v1963_v27 = vpack.c.b16 %v1961_v12, %v1959_v19 }
 0x11a   :  { %2248 = vmatpush.bf16.msrb.mxu2 %v7282_v28  ;;  %2262 = vmatpush.bf16.msrb.mxu3 %v7290_v30  ;;  %v1964_v28 = vpack.c.b16 %v1962_v13, %v1960_v22  ;;  %v7301_v30 = vld [vmem:[%s9524_s3 + $0x530] sm:$0xff] }
 0x11c   :  { %2067 = vmatpush.bf16.msrb.mxu0 %v7266_v33  ;;  %2081 = vmatpush.bf16.msrb.mxu1 %v7274_v34  ;;  %v7324_v33 = vld [vmem:[%s9524_s3 + $0x5e8] sm:$0xff] }
 0x11d   :  { %v7300_v34 = vld [vmem:[%s9524_s3 + $0x528] sm:$0xff] }
 0x11e   :  { %2249 = vmatpush.bf16.msrb.mxu2 %v7281_v18  ;;  %2263 = vmatpush.bf16.msrb.mxu3 %v7289_v20  ;;  %v2295_v18 = vshrl.u32 %v8346_v40, 16  ;;  %v2298_v20 = vshll.u32 %v8346_v40, 16  ;;  %v7314_v40 = vld [vmem:[%s9524_s3 + $0x598] sm:$0xff] }
 0x120   :  { %2068 = vmatpush.bf16.msrb.mxu0 %v7265_v23  ;;  %2082 = vmatpush.bf16.msrb.mxu1 %v7273_v44  ;;  %v2280_v23 = vshll.u32 %v8354_v29, 16  ;;  %v2275_v44 = vld [vmem:[#allocation2 + $0x28] sm:$0x33]  ;;  %v2297_v46 = vrot.slane %v2295_v18, 5  ;;  %v2300_v47 = vrot.slane %v2298_v20, 6  ;;  %v7298_v29 = vld [vmem:[%s9524_s3 + $0x518] sm:$0xff] }
 0x121   :  { %v2304_v48 = vshrl.u32 %v2275_v44, 16  ;;  %v2491_v5 = vrot.slane %v2275_v44, 6 }
 0x122   :  { %2250 = vmatpush.bf16.msrb.mxu2 %v7280_v51  ;;  %2264 = vmatpush.bf16.msrb.mxu3 %v7288_v53  ;;  %v2307_v51 = vshll.u32 %v2275_v44, 16  ;;  %v2274_v53 = vld [vmem:[#allocation2 + $0x10] sm:$0x33]  ;;  %v2282_v57 = vrot.slane %v2280_v23, 6  ;;  %v2301_v62 = vor.u32 %v2300_v47, %v2297_v46 }
 0x123   :  { %v2487_v12 = vrot.slane %v2274_v53, 6  ;;  %v7349_v46 = vld [vmem:[%s9524_s3 + $0x6b0] sm:$0xff] }
 0x124   :  { %2069 = vmatpush.bf16.msrb.mxu0 %v7264_v58  ;;  %2083 = vmatpush.bf16.msrb.mxu1 %v7272_v59  ;;  %v2286_v58 = vshrl.u32 %v2274_v53, 16  ;;  %v2289_v59 = vshll.u32 %v2274_v53, 16  ;;  %v2283_v6 = vor.u32 %v2282_v57, %v2279_v56  ;;  %v2302_v13 = vrot.slane %v2301_v62, 4  ;;  %v7357_v47 = vld [vmem:[%s9524_s3 + $0x6f0] sm:$0xff]  ;;  %v7356_v56 = vld [vmem:[%s9524_s3 + $0x6e8] sm:$0xff] }
 0x125   :  { %v7333_v53 = vld [vmem:[%s9524_s3 + $0x630] sm:$0xff]  ;;  %v8543_v57 = vld [vmem:[%s9526_s4] ss:$0 sm:$0xff]  ;;  %v2681_v62 = vshrl.u32 %v8454_v54, 16 }
 0x126   :  { %2251 = vmatpush.bf16.msrb.mxu2 %v7279_v63  ;;  %2265 = vmatpush.bf16.msrb.mxu3 %v7287_v0  ;;  %v2306_v63 = vrot.slane %v2304_v48, 5  ;;  %v2309_v0 = vrot.slane %v2307_v51, 6  ;;  %v2284_v19 = vrot.slane %v2283_v6, 4  ;;  %v7331_v6 = vld [vmem:[%s9524_s3 + $0x620] sm:$0xff] }
 0x128   :  { %2070 = vmatpush.bf16.msrb.mxu0 %v7263_v7  ;;  %2084 = vmatpush.bf16.msrb.mxu1 %v7271_v8  ;;  %v2288_v7 = vrot.slane %v2286_v58, 5  ;;  %v2291_v8 = vrot.slane %v2289_v59, 6  ;;  %v7332_v58 = vld [vmem:[%s9524_s3 + $0x628] sm:$0xff] }
 0x129   :  { %2252 = vmatmul.bf16.vlgmr.msrb.gmra.mxu2 %v2144_v16  ;;  %2266 = vmatmul.bf16.vlgmr.msrb.gmra.mxu3 %v2145_v17  ;;  %v7304_v16 = vld [vmem:[%s9524_s3 + $0x548] sm:$0xff]  ;;  %v2492_v17 = vsel %vm8035_vm14, %v6059_v2, %v2491_v5  ;;  %v7355_v2 = vld [vmem:[%s9524_s3 + $0x6e0] sm:$0xff] }
 0x12a   :  { %2630 = vmatpush.bf16.msra.mxu2 %v7318_v3  ;;  %2644 = vmatpush.bf16.msra.mxu3 %v7326_v4  ;;  %v7297_v3 = vld [vmem:[%s9524_s3 + $0x510] sm:$0xff]  ;;  %v2292_v22 = vor.u32 %v2291_v8, %v2288_v7  ;;  %v7340_v59 = vld [vmem:[%s9524_s3 + $0x668] sm:$0xff]  ;;  %v7339_v7 = vld [vmem:[%s9524_s3 + $0x660] sm:$0xff]  ;;  %v2666_v8 = vshll.u32 %v8468_v1, 16 }
 0x12b   :  { %2071 = vmatmul.bf16.vlgmr.msrb.gmra.mxu0 %v1963_v27  ;;  %2085 = vmatmul.bf16.vlgmr.msrb.gmra.mxu1 %v1964_v28  ;;  %v7305_v4 = vld [vmem:[%s9524_s3 + $0x550] sm:$0xff]  ;;  %v2488_v27 = vsel %vm8035_vm14, %v6058_v11, %v2487_v12  ;;  %v2661_v11 = vld [vmem:[#allocation2 + $0x28] sm:$0x77]  ;;  %v2683_v12 = vrot.slane %v2681_v62, 6 }
 0x12c   :  { %2449 = vmatpush.bf16.msra.mxu0 %v7302_v14  ;;  %2463 = vmatpush.bf16.msra.mxu1 %v7310_v15  ;;  %v2310_v14 = vor.u32 %v2309_v0, %v2306_v63  ;;  %v7296_v15 = vld [vmem:[%s9524_s3 + $0x508] sm:$0xff]  ;;  %v2527_v18 = vunpack.c.h.b16 %v2488_v27  ;;  %v7347_v0 = vld [vmem:[%s9524_s3 + $0x6a0] sm:$0xff] }
 0x12e   :  { %2631 = vmatpush.bf16.msra.mxu2 %v7317_v24  ;;  %2645 = vmatpush.bf16.msra.mxu3 %v7325_v25  ;;  %v7311_v24 = vld [vmem:[%s9524_s3 + $0x580] sm:$0xff]  ;;  %v2311_v28 = vsel %vm8049_vm15, %v2302_v13, %v2310_v14  ;;  %v7346_v13 = vld [vmem:[%s9524_s3 + $0x698] sm:$0xff] }
 0x12f   :  { %v7319_v25 = vld [vmem:[%s9524_s3 + $0x5c0] sm:$0xff]  ;;  %v2347_v20 = vunpack.c.l.b16 %v2311_v28  ;;  %v7354_v14 = vld [vmem:[%s9524_s3 + $0x6d8] sm:$0xff] }
 0x130   :  { %2450 = vmatpush.bf16.msra.mxu0 %v7301_v30  ;;  %2464 = vmatpush.bf16.msra.mxu1 %v7309_v31  ;;  %v7350_v30 = vld [vmem:[%s9524_s3 + $0x6b8] sm:$0xff] }
 0x131   :  { %v7358_v31 = vld [vmem:[%s9524_s3 + $0x6f8] sm:$0xff] }
 0x132   :  { %2632 = vmatpush.bf16.msra.mxu2 %v7316_v32  ;;  %2646 = vmatpush.bf16.msra.mxu3 %v7324_v33  ;;  %v2528_v32 = vunpack.c.l.b16 %v2492_v17  ;;  %v2529_v33 = vunpack.c.h.b16 %v2492_v17  ;;  %v2693_v17 = vshll.u32 %v2661_v11, 16 }
 0x134   :  { %2451 = vmatpush.bf16.msra.mxu0 %v7300_v34  ;;  %2465 = vmatpush.bf16.msra.mxu1 %v7308_v35  ;;  %v7295_v34 = vld [vmem:[%s9524_s3 + $0x500] sm:$0xff]  ;;  %v2531_v44 = vpack.c.b16 %v2529_v33, %v2527_v18  ;;  %v2695_v18 = vrot.slane %v2693_v17, 7 }
 0x135   :  { %v7303_v35 = vld [vmem:[%s9524_s3 + $0x540] sm:$0xff] }
 0x136   :  { %2633 = vmatpush.bf16.msra.mxu2 %v7315_v39  ;;  %2647 = vmatpush.bf16.msra.mxu3 %v7323_v26  ;;  %v2293_v39 = vsel %vm8049_vm15, %v2284_v19, %v2292_v22  ;;  %v2526_v26 = vunpack.c.l.b16 %v2488_v27  ;;  %v2660_v19 = vld [vmem:[#allocation2 + $0x10] sm:$0x77]  ;;  %v7338_v27 = vld [vmem:[%s9524_s3 + $0x658] sm:$0xff] }
 0x138   :  { %2452 = vmatpush.bf16.msra.mxu0 %v7299_v37  ;;  %2466 = vmatpush.bf16.msra.mxu1 %v7307_v41  ;;  %v2348_v37 = vunpack.c.h.b16 %v2311_v28  ;;  %v7334_v41 = vld [vmem:[%s9524_s3 + $0x638] sm:$0xff]  ;;  %v2530_v23 = vpack.c.b16 %v2528_v32, %v2526_v26  ;;  %v2668_v28 = vrot.slane %v2666_v8, 7  ;;  %v7327_v8 = vld [vmem:[%s9524_s3 + $0x600] sm:$0xff] }
 0x13a   :  { %2634 = vmatpush.bf16.msra.mxu2 %v7314_v40  ;;  %2648 = vmatpush.bf16.msra.mxu3 %v7322_v45  ;;  %v2345_v40 = vunpack.c.l.b16 %v2293_v39  ;;  %v2346_v45 = vunpack.c.h.b16 %v2293_v39 }
 0x13c   :  { %2453 = vmatpush.bf16.msra.mxu0 %v7298_v29  ;;  %2467 = vmatpush.bf16.msra.mxu1 %v7306_v55  ;;  %v2349_v48 = vpack.c.b16 %v2347_v20, %v2345_v40  ;;  %v2350_v51 = vpack.c.b16 %v2348_v37, %v2346_v45  ;;  %v7341_v29 = vld [vmem:[%s9524_s3 + $0x670] sm:$0xff]  ;;  %v7348_v55 = vld [vmem:[%s9524_s3 + $0x6a8] sm:$0xff] }
 0x13d   :  { %v8592_v20 = vld [vmem:[#allocation2 + $0x8] sm:$0x88] }
 0x13e   :  { %2635 = vmatpush.bf16.msra.mxu2 %v7313_v60  ;;  %2649 = vmatpush.bf16.msra.mxu3 %v7321_v61 }
 0x140   :  { %2454 = vmatpush.bf16.msra.mxu0 %v7297_v3  ;;  %2468 = vmatpush.bf16.msra.mxu1 %v7305_v4  ;;  %v2684_v3 = vshll.u32 %v8454_v54, 16  ;;  %v2663_v4 = vshrl.u32 %v8468_v1, 16  ;;  %v8574_v1 = vld [vmem:[#allocation2 + $0x20] sm:$0x88] }
 0x141   :  { %v6253_v37 = vrot.slane %v8574_v1, 11 }
 0x142   :  { %2636 = vmatpush.bf16.msra.mxu2 %v7312_v9  ;;  %2650 = vmatpush.bf16.msra.mxu3 %v7320_v10  ;;  %v2665_v22 = vrot.slane %v2663_v4, 6 }
 0x144   :  { %2455 = vmatpush.bf16.msra.mxu0 %v7296_v15  ;;  %2469 = vmatpush.bf16.msra.mxu1 %v7304_v16  ;;  %v2686_v15 = vrot.slane %v2684_v3, 7  ;;  %v2690_v16 = vshrl.u32 %v2661_v11, 16 }
 0x146   :  { %2637 = vmatpush.bf16.msra.mxu2 %v7311_v24  ;;  %2651 = vmatpush.bf16.msra.mxu3 %v7319_v25  ;;  %v7330_v25 = vld [vmem:[%s9524_s3 + $0x618] sm:$0xff]  ;;  %v2687_v39 = vor.u32 %v2686_v15, %v2683_v12  ;;  %v2692_v26 = vrot.slane %v2690_v16, 6 }
 0x147   :  { %v7374_v15 = vld [vmem:[%s9524_s3 + $0x778] sm:$0xff] }
 0x148   :  { %2456 = vmatpush.bf16.msra.mxu0 %v7295_v34  ;;  %2470 = vmatpush.bf16.msra.mxu1 %v7303_v35  ;;  %v540_v60 = vpop.f32.mrf.mxu0  ;;  %v554_v61 = vpop.f32.mrf.mxu1  ;;  %v7345_v34 = vld [vmem:[%s9524_s3 + $0x690] sm:$0xff] }
 0x149   :  { %2638 = vmatmul.bf16.vlgmr.msra.gmra.mxu2 %v2530_v23  ;;  %2652 = vmatmul.bf16.vlgmr.msra.gmra.mxu3 %v2531_v44  ;;  %v541_v63 = vadd.f32 %v8543_v57, %v540_v60  ;;  %v7353_v35 = vld [vmem:[%s9524_s3 + $0x6d0] sm:$0xff]  ;;  %v2877_v23 = vrot.slane %v2661_v11, 7  ;;  %v2669_v44 = vor.u32 %v2668_v28, %v2665_v22 }
 0x14a   :  { %3016 = vmatpush.bf16.msrb.mxu2 %v7350_v30  ;;  %3030 = vmatpush.bf16.msrb.mxu3 %v7358_v31  ;;  %v2672_v30 = vshrl.u32 %v2660_v19, 16  ;;  %v2675_v31 = vshll.u32 %v2660_v19, 16 }
 0x14b   :  { %2457 = vmatmul.bf16.vlgmr.msra.gmra.mxu0 %v2349_v48  ;;  %2471 = vmatmul.bf16.vlgmr.msra.gmra.mxu1 %v2350_v51  ;;  %v555_v5 = vadd.f32 %v554_v61, %v541_v63  ;;  %v6252_v48 = vrot.slane %v8592_v20, 11  ;;  %v2873_v51 = vrot.slane %v2660_v19, 7 }
 0x14c   :  { %2835 = vmatpush.bf16.msrb.mxu0 %v7334_v41  ;;  %2849 = vmatpush.bf16.msrb.mxu1 %v7342_v21  ;;  %v722_v9 = vpop.f32.mrf.mxu2  ;;  %v736_v10 = vpop.f32.mrf.mxu3  ;;  %v7329_v41 = vld [vmem:[%s9524_s3 + $0x610] sm:$0xff]  ;;  %v2674_v40 = vrot.slane %v2672_v30, 6  ;;  %v2677_v45 = vrot.slane %v2675_v31, 7 }
 0x14d   :  { %v737_v54 = vadd.f32 %v736_v10, %v722_v9  ;;  %v7337_v21 = vld [vmem:[%s9524_s3 + $0x650] sm:$0xff]  ;;  %v2874_v3 = vsel %vm8125_vm5, %v6252_v48, %v2873_v51  ;;  %v7335_v9 = vld [vmem:[%s9524_s3 + $0x640] sm:$0xff] }
 0x14e   :  { %3017 = vmatpush.bf16.msrb.mxu2 %v7349_v46  ;;  %3031 = vmatpush.bf16.msrb.mxu3 %v7357_v47  ;;  %v7344_v46 = vld [vmem:[%s9524_s3 + $0x688] sm:$0xff]  ;;  %v2678_v60 = vor.u32 %v2677_v45, %v2674_v40  ;;  %v2912_v11 = vunpack.c.l.b16 %v2874_v3  ;;  %v2913_v12 = vunpack.c.h.b16 %v2874_v3  ;;  %v7365_v31 = vld [vmem:[%s9524_s3 + $0x730] sm:$0xff] }
 0x14f   :  { %v741_v24 = vadd.f32 %v737_v54, %v555_v5  ;;  %v7352_v47 = vld [vmem:[%s9524_s3 + $0x6c8] sm:$0xff]  ;;  %v7361_v40 = vld [vmem:[%s9524_s3 + $0x710] sm:$0xff] }
 0x150   :  { %2836 = vmatpush.bf16.msrb.mxu0 %v7333_v53  ;;  %2850 = vmatpush.bf16.msrb.mxu1 %v7341_v29  ;;  %v8582_v32 = vpop.f32.mrf.mxu0  ;;  %v8584_v33 = vpop.f32.mrf.mxu1  ;;  %v2688_v53 = vrot.slane %v2687_v39, 4  ;;  %v2696_v29 = vor.u32 %v2695_v18, %v2692_v26  ;;  %v7372_v39 = vld [vmem:[%s9524_s3 + $0x768] sm:$0xff]  ;;  %v7363_v26 = vld [vmem:[%s9524_s3 + $0x720] sm:$0xff]  ;;  %v7369_v45 = vld [vmem:[%s9524_s3 + $0x750] sm:$0xff] }
 0x151   :  { %v7371_v18 = vld [vmem:[%s9524_s3 + $0x760] sm:$0xff] }
 0x152   :  { %3018 = vmatpush.bf16.msrb.mxu2 %v7348_v55  ;;  %3032 = vmatpush.bf16.msrb.mxu3 %v7356_v56  ;;  %v7328_v55 = vld [vmem:[%s9524_s3 + $0x608] sm:$0xff]  ;;  %v2697_v4 = vsel %vm8139_vm6, %v2688_v53, %v2696_v29 }
 0x153   :  { %v7336_v56 = vld [vmem:[%s9524_s3 + $0x648] sm:$0xff]  ;;  %v2733_v54 = vunpack.c.l.b16 %v2697_v4 }
 0x154   :  { %2837 = vmatpush.bf16.msrb.mxu0 %v7332_v58  ;;  %2851 = vmatpush.bf16.msrb.mxu1 %v7340_v59  ;;  %v2878_v58 = vsel %vm8125_vm5, %v6253_v37, %v2877_v23  ;;  %v2670_v59 = vrot.slane %v2669_v44, 4  ;;  %v7362_v37 = vld [vmem:[%s9524_s3 + $0x718] sm:$0xff]  ;;  %v3062_v44 = vshrl.u32 %v8574_v1, 16  ;;  %v7360_v1 = vld [vmem:[%s9524_s3 + $0x708] sm:$0xff]  ;;  %v724_v3 = vpop.f32.mrf.mxu2 }
 0x155   :  { %v2914_v5 = vunpack.c.l.b16 %v2878_v58  ;;  %v7368_v53 = vld [vmem:[%s9524_s3 + $0x748] sm:$0xff] }
 0x156   :  { %3019 = vmatpush.bf16.msrb.mxu2 %v7347_v0  ;;  %3033 = vmatpush.bf16.msrb.mxu3 %v7355_v2  ;;  %v7343_v0 = vld [vmem:[%s9524_s3 + $0x680] sm:$0xff]  ;;  %v2679_v10 = vsel %vm8139_vm6, %v2670_v59, %v2678_v60  ;;  %v6351_v51 = vrot.slane %v3062_v44, 11 }
 0x157   :  { %v7351_v2 = vld [vmem:[%s9524_s3 + $0x6c0] sm:$0xff]  ;;  %v2916_v16 = vpack.c.b16 %v2914_v5, %v2912_v11  ;;  %v2731_v19 = vunpack.c.l.b16 %v2679_v10  ;;  %v2732_v22 = vunpack.c.h.b16 %v2679_v10 }
 0x158   :  { %2838 = vmatpush.bf16.msrb.mxu0 %v7331_v6  ;;  %2852 = vmatpush.bf16.msrb.mxu1 %v7339_v7  ;;  %v930_v61 = vpop.f32.mrf.mxu0  ;;  %v944_v62 = vpop.f32.mrf.mxu1  ;;  %v2915_v6 = vunpack.c.h.b16 %v2878_v58  ;;  %v7367_v58 = vld [vmem:[%s9524_s3 + $0x740] sm:$0xff] }
 0x159   :  { %v945_v63 = vadd.f32 %v944_v62, %v930_v61 }
 0x15a   :  { %3020 = vmatpush.bf16.msrb.mxu2 %v7346_v13  ;;  %3034 = vmatpush.bf16.msrb.mxu3 %v7354_v14  ;;  %v2734_v13 = vunpack.c.h.b16 %v2697_v4  ;;  %v7366_v14 = vld [vmem:[%s9524_s3 + $0x738] sm:$0xff]  ;;  %v2917_v17 = vpack.c.b16 %v2915_v6, %v2913_v12  ;;  %v738_v4 = vpop.f32.mrf.mxu3 }
 0x15b   :  { %v8626_v7 = vadd.f32 %v945_v63, %v741_v24  ;;  %v2735_v24 = vpack.c.b16 %v2733_v54, %v2731_v19 }
 0x15c   :  { %2839 = vmatpush.bf16.msrb.mxu0 %v7330_v25  ;;  %2853 = vmatpush.bf16.msrb.mxu1 %v7338_v27  ;;  %v2736_v25 = vpack.c.b16 %v2734_v13, %v2732_v22  ;;  %v1114_v5 = vpop.f32.mrf.mxu2 }
 0x15e   :  { %3021 = vmatpush.bf16.msrb.mxu2 %v7345_v34  ;;  %3035 = vmatpush.bf16.msrb.mxu3 %v7353_v35  ;;  %v7373_v34 = vld [vmem:[%s9524_s3 + $0x770] sm:$0xff]  ;;  %v7364_v35 = vld [vmem:[%s9524_s3 + $0x728] sm:$0xff] }
 0x160   :  { %2840 = vmatpush.bf16.msrb.mxu0 %v7329_v41  ;;  %2854 = vmatpush.bf16.msrb.mxu1 %v7337_v21  ;;  %v932_v27 = vpop.f32.mrf.mxu0  ;;  %v946_v28 = vpop.f32.mrf.mxu1  ;;  %v7370_v41 = vld [vmem:[%s9524_s3 + $0x758] sm:$0xff]  ;;  %v8668_v21 = vld [vmem:[#allocation2] sm:$0xff] }
 0x161   :  { %v8642_v30 = vadd.f32 %v946_v28, %v932_v27  ;;  %v3054_v23 = vshrl.u32 %v8668_v21, 16  ;;  %v3057_v48 = vshll.u32 %v8668_v21, 16  ;;  %3248 = vst.msk [vmem:[#allocation3] sm:$0x3] %vm3247_vm11, %v8668_v21 }
 0x162   :  { %3022 = vmatpush.bf16.msrb.mxu2 %v7344_v46  ;;  %3036 = vmatpush.bf16.msrb.mxu3 %v7352_v47  ;;  %v3049_v46 = vshrl.u32 %v8592_v20, 16  ;;  %v7359_v20 = vld [vmem:[%s9524_s3 + $0x700] sm:$0xff]  ;;  %v1128_v6 = vpop.f32.mrf.mxu3  ;;  %3249 = vst.msk [vmem:[#allocation3 + $0x8] sm:$0x3] %vm3247_vm11, %v8668_v21 }
 0x163   :  { %v3056_v47 = vrot.slane %v3054_v23, 7  ;;  %3251 = vst.msk [vmem:[#allocation3 + $0x4] sm:$0xc] %vm3250_vm12, %v8668_v21 }
 0x164   :  { %2841 = vmatpush.bf16.msrb.mxu0 %v7328_v55  ;;  %2855 = vmatpush.bf16.msrb.mxu1 %v7336_v56  ;;  %v6350_v29 = vrot.slane %v3049_v46, 11  ;;  %3252 = vst.msk [vmem:[#allocation3 + $0xc] sm:$0xc] %vm3250_vm12, %v8668_v21 }
 0x165   :  { %v3059_v55 = vor.u32 %v3057_v48, %v3056_v47  ;;  %v543_v47 = vadd.f32 %v8543_v57, %v8582_v32 }
 0x166   :  { %3023 = vmatpush.bf16.msrb.mxu2 %v7343_v0  ;;  %3037 = vmatpush.bf16.msrb.mxu3 %v7351_v2 }
 0x167   :  { %v3073_v56 = vsel %vm8258_vm10, %v6351_v51, %v3059_v55  ;;  %v3060_v59 = vsel %vm8258_vm10, %v6350_v29, %v3059_v55  ;;  %v557_v55 = vadd.f32 %v8584_v33, %v543_v47 }
 0x168   :  { %2842 = vmatpush.bf16.msrb.mxu0 %v7327_v8  ;;  %2856 = vmatpush.bf16.msrb.mxu1 %v7335_v9  ;;  %v3109_v60 = vunpack.c.l.b16 %v3073_v56  ;;  %v3110_v61 = vunpack.c.h.b16 %v3073_v56  ;;  %v3107_v62 = vunpack.c.l.b16 %v3060_v59  ;;  %v3108_v63 = vunpack.c.h.b16 %v3060_v59  ;;  %v1116_v8 = vpop.f32.mrf.mxu2  ;;  %v1322_v10 = vpop.f32.mrf.mxu0 }
 0x169   :  { %3024 = vmatmul.bf16.vlgmr.msrb.gmra.mxu2 %v2916_v16  ;;  %3038 = vmatmul.bf16.vlgmr.msrb.gmra.mxu3 %v2917_v17  ;;  %v1336_v11 = vpop.f32.mrf.mxu1 }
 0x16a   :  { %v3111_v0 = vpack.c.b16 %v3109_v60, %v3107_v62  ;;  %v3112_v2 = vpack.c.b16 %v3110_v61, %v3108_v63  ;;  %v1130_v9 = vpop.f32.mrf.mxu3  ;;  %v1337_v29 = vadd.f32 %v1336_v11, %v1322_v10 }
 0x16b   :  { %2843 = vmatmul.bf16.vlgmr.msrb.gmra.mxu0 %v2735_v24  ;;  %2857 = vmatmul.bf16.vlgmr.msrb.gmra.mxu1 %v2736_v25 }
 0x16c   :  { %3211 = vmatpush.bf16.msra.mxu0 %v7366_v14  ;;  %3225 = vmatpush.bf16.msra.mxu1 %v7374_v15 }
 0x170   :  { %3212 = vmatpush.bf16.msra.mxu0 %v7365_v31  ;;  %3226 = vmatpush.bf16.msra.mxu1 %v7373_v34  ;;  %v1506_v12 = vpop.f32.mrf.mxu2  ;;  %v1324_v13 = vpop.f32.mrf.mxu0 }
 0x171   :  { %v1338_v14 = vpop.f32.mrf.mxu1 }
 0x172   :  { %v1520_v54 = vpop.f32.mrf.mxu3  ;;  %v1339_v61 = vadd.f32 %v1338_v14, %v1324_v13  ;;  %v6478_v14 = vld [vmem:[%s9527_s5 + $0x30] sm:$0xf] }
 0x173   :  { %v1521_v32 = vadd.f32 %v1520_v54, %v1506_v12 }
 0x174   :  { %3213 = vmatpush.bf16.msra.mxu0 %v7364_v35  ;;  %3227 = vmatpush.bf16.msra.mxu1 %v7372_v39 }
 0x178   :  { %3214 = vmatpush.bf16.msra.mxu0 %v7363_v26  ;;  %3228 = vmatpush.bf16.msra.mxu1 %v7371_v18  ;;  %v1508_v17 = vpop.f32.mrf.mxu2 }
 0x17a   :  { %v1522_v19 = vpop.f32.mrf.mxu3 }
 0x17c   :  { %3215 = vmatpush.bf16.msra.mxu0 %v7362_v37  ;;  %3229 = vmatpush.bf16.msra.mxu1 %v7370_v41 }
 0x180   :  { %3216 = vmatpush.bf16.msra.mxu0 %v7361_v40  ;;  %3230 = vmatpush.bf16.msra.mxu1 %v7369_v45 }
 0x184   :  { %3217 = vmatpush.bf16.msra.mxu0 %v7360_v1  ;;  %3231 = vmatpush.bf16.msra.mxu1 %v7368_v53  ;;  %v1129_v1 = vadd.f32 %v1128_v6, %v1114_v5  ;;  %v739_v53 = vadd.f32 %v738_v4, %v724_v3  ;;  %v1523_v4 = vadd.f32 %v1522_v19, %v1508_v17 }
 0x186   :  { %v1133_v57 = vadd.f32 %v1129_v1, %v8626_v7  ;;  %v742_v56 = vadd.f32 %v739_v53, %v557_v55  ;;  %v6462_v1 = vld [vmem:[%s9527_s5 + $0x10] sm:$0xf]  ;;  %v7379_v53 = vld [vmem:[%s9527_s5 + $0x14] sm:$0xf0] }
 0x187   :  { %v6564_v55 = vld [vmem:[%s9527_s5 + $0xb0] sm:$0xf] }
 0x188   :  { %3218 = vmatpush.bf16.msra.mxu0 %v7359_v20  ;;  %3232 = vmatpush.bf16.msra.mxu1 %v7367_v58  ;;  %v1704_v15 = vpop.f32.mrf.mxu0  ;;  %v1718_v16 = vpop.f32.mrf.mxu1  ;;  %v1131_v20 = vadd.f32 %v1130_v9, %v1116_v8  ;;  %v1341_v58 = vadd.f32 %v1337_v29, %v1133_v57  ;;  %v950_v60 = vadd.f32 %v8642_v30, %v742_v56  ;;  %v7378_v56 = vld [vmem:[%s9527_s5 + $0x14] sm:$0xf] }
 0x189   :  { %v1719_v59 = vadd.f32 %v1718_v16, %v1704_v15  ;;  %v7383_v15 = vld [vmem:[%s9527_s5 + $0x34] sm:$0xf0]  ;;  %v7382_v16 = vld [vmem:[%s9527_s5 + $0x34] sm:$0xf] }
 0x18a   :  { %v1134_v7 = vadd.f32 %v1131_v20, %v950_v60  ;;  %v6464_v20 = vld [vmem:[%s9527_s5 + $0x18] sm:$0xf0] }
 0x18b   :  { %3219 = vmatmul.bf16.vlgmr.msra.gmra.mxu0 %v3111_v0  ;;  %3233 = vmatmul.bf16.vlgmr.msra.gmra.mxu1 %v3112_v2  ;;  %v1525_v0 = vadd.f32 %v1521_v32, %v1341_v58 }
 0x18c   :  { %v1873_v22 = vpop.f32.mrf.mxu2  ;;  %v1887_v24 = vpop.f32.mrf.mxu3  ;;  %v1342_v21 = vadd.f32 %v1339_v61, %v1134_v7 }
 0x18d   :  { %v1888_v33 = vadd.f32 %v1887_v24, %v1873_v22  ;;  %v1723_v5 = vadd.f32 %v1719_v59, %v1525_v0  ;;  %v6566_v59 = vld [vmem:[%s9527_s5 + $0xb8] sm:$0xf0]  ;;  %v7377_v0 = vld [vmem:[%s9527_s5 + $0x4] sm:$0xf0] }
 0x18e   :  { %v1526_v11 = vadd.f32 %v1523_v4, %v1342_v21  ;;  %v6558_v21 = vld [vmem:[%s9527_s5 + $0xa8] sm:$0xf0] }
 0x18f   :  { %v1892_v8 = vadd.f32 %v1888_v33, %v1723_v5  ;;  %v6556_v33 = vld [vmem:[%s9527_s5 + $0xa0] sm:$0xf]  ;;  %v6463_v5 = vor.u32 %v7379_v53, %v6462_v1  ;;  %v7388_v1 = vld [vmem:[%s9527_s5 + $0x64] sm:$0xf] }
 0x190   :  { %v1706_v25 = vpop.f32.mrf.mxu0  ;;  %v1720_v27 = vpop.f32.mrf.mxu1 }
 0x191   :  { %v1721_v10 = vadd.f32 %v1720_v27, %v1706_v25  ;;  %v6479_v27 = vor.u32 %v7383_v15, %v6478_v14  ;;  %v6548_v14 = vld [vmem:[%s9527_s5 + $0x90] sm:$0xf] }
 0x193   :  { %v1724_v13 = vadd.f32 %v1721_v10, %v1526_v11  ;;  %3338 = vmatpush.bf16.msra.mxu2 %v6479_v27  ;;  %v6467_v10 = vor.u32 %v7378_v56, %v6464_v20  ;;  %v6550_v27 = vld [vmem:[%s9527_s5 + $0x98] sm:$0xf0] }
 0x194   :  { %v1875_v34 = vpop.f32.mrf.mxu2  ;;  %v1889_v35 = vpop.f32.mrf.mxu3 }
 0x195   :  { %v1890_v12 = vadd.f32 %v1889_v35, %v1875_v34  ;;  %v7381_v34 = vld [vmem:[%s9527_s5 + $0x24] sm:$0xf0] }
 0x197   :  { %v1893_v35 = vadd.f32 %v1890_v12, %v1724_v13  ;;  %v6520_v12 = vld [vmem:[%s9527_s5 + $0x70] sm:$0xf]  ;;  %v6522_v13 = vld [vmem:[%s9527_s5 + $0x78] sm:$0xf0] }
 0x1a8   :  { %v2072_v28 = vpop.f32.mrf.mxu0  ;;  %v2086_v31 = vpop.f32.mrf.mxu1 }
 0x1a9   :  { %v2087_v6 = vadd.f32 %v2086_v31, %v2072_v28  ;;  %v6480_v28 = vld [vmem:[%s9527_s5 + $0x38] sm:$0xf0]  ;;  %v6470_v31 = vld [vmem:[%s9527_s5 + $0x20] sm:$0xf] }
 0x1aa   :  { %v6471_v47 = vor.u32 %v7381_v34, %v6470_v31 }
 0x1ab   :  { %v2091_v30 = vadd.f32 %v2087_v6, %v1892_v8  ;;  %v7396_v6 = vld [vmem:[%s9527_s5 + $0xa4] sm:$0xf]  ;;  %v6456_v8 = vld [vmem:[%s9527_s5 + $0x8] sm:$0xf0] }
 0x1ac   :  { %v2253_v39 = vpop.f32.mrf.mxu2  ;;  %v2267_v26 = vpop.f32.mrf.mxu3  ;;  %3339 = vmatpush.bf16.msra.mxu2 %v6471_v47  ;;  %v6561_v11 = vor.u32 %v7396_v6, %v6558_v21  ;;  %v6652_v21 = vld [vmem:[%s9527_s5 + $0x138] sm:$0xf0] }
 0x1ad   :  { %v2268_v9 = vadd.f32 %v2267_v26, %v2253_v39 }
 0x1af   :  { %v2272_v17 = vadd.f32 %v2268_v9, %v2091_v30  ;;  %v7391_v30 = vld [vmem:[%s9527_s5 + $0x74] sm:$0xf0] }
 0x1b0   :  { %v2074_v18 = vpop.f32.mrf.mxu0  ;;  %v2088_v37 = vpop.f32.mrf.mxu1  ;;  %3340 = vmatpush.bf16.msra.mxu2 %v6463_v5 }
 0x1b1   :  { %v2089_v19 = vadd.f32 %v2088_v37, %v2074_v18  ;;  %v6483_v18 = vor.u32 %v7382_v16, %v6480_v28  ;;  %v7380_v37 = vld [vmem:[%s9527_s5 + $0x24] sm:$0xf] }
 0x1b3   :  { %3352 = vmatpush.bf16.msra.mxu3 %v6483_v18  ;;  %v2092_v57 = vadd.f32 %v2089_v19, %v1893_v35 }
 0x1b4   :  { %v8696_v44 = vpop.f32.mrf.mxu2  ;;  %v2269_v40 = vpop.f32.mrf.mxu3 }
 0x1c8   :  { %v2458_v41 = vpop.f32.mrf.mxu0  ;;  %v2472_v23 = vpop.f32.mrf.mxu1 }
 0x1c9   :  { %v2473_v54 = vadd.f32 %v2472_v23, %v2458_v41  ;;  %v6472_v41 = vld [vmem:[%s9527_s5 + $0x28] sm:$0xf0]  ;;  %v2270_v23 = vadd.f32 %v2269_v40, %v8696_v44  ;;  %v7399_v44 = vld [vmem:[%s9527_s5 + $0xb4] sm:$0xf0]  ;;  %v7398_v40 = vld [vmem:[%s9527_s5 + $0xb4] sm:$0xf] }
 0x1ca   :  { %v6475_v29 = vor.u32 %v7380_v37, %v6472_v41  ;;  %v6565_v58 = vor.u32 %v7399_v44, %v6564_v55  ;;  %v6521_v37 = vor.u32 %v7391_v30, %v6520_v12  ;;  %v6540_v41 = vld [vmem:[%s9527_s5 + $0x80] sm:$0xf]  ;;  %v7392_v55 = vld [vmem:[%s9527_s5 + $0x84] sm:$0xf]  ;;  %v6542_v44 = vld [vmem:[%s9527_s5 + $0x88] sm:$0xf0] }
 0x1cb   :  { %v2273_v7 = vadd.f32 %v2270_v23, %v2092_v57  ;;  %v7393_v23 = vld [vmem:[%s9527_s5 + $0x84] sm:$0xf0]  ;;  %v6642_v12 = vld [vmem:[%s9527_s5 + $0x120] sm:$0xf] }
 0x1cc   :  { %v2639_v45 = vpop.f32.mrf.mxu2  ;;  %v2653_v46 = vpop.f32.mrf.mxu3  ;;  %3554 = vmatpush.bf16.msrb.mxu0 %v6565_v58  ;;  %3353 = vmatpush.bf16.msra.mxu3 %v6475_v29  ;;  %v6514_v29 = vld [vmem:[%s9527_s5 + $0x68] sm:$0xf0]  ;;  %v6504_v58 = vld [vmem:[%s9527_s5 + $0x50] sm:$0xf] }
 0x1cd   :  { %v2654_v22 = vadd.f32 %v2653_v46, %v2639_v45  ;;  %v2477_v45 = vadd.f32 %v2473_v54, %v2272_v17  ;;  %v7390_v54 = vld [vmem:[%s9527_s5 + $0x74] sm:$0xf] }
 0x1cf   :  { %v2658_v32 = vadd.f32 %v2654_v22, %v2477_v45 }
 0x1d0   :  { %v8700_v48 = vpop.f32.mrf.mxu0  ;;  %v8702_v51 = vpop.f32.mrf.mxu1  ;;  %3354 = vmatpush.bf16.msra.mxu3 %v6467_v10 }
 0x1d1   :  { %v2475_v60 = vadd.f32 %v8702_v51, %v8700_v48  ;;  %v7376_v48 = vld [vmem:[%s9527_s5 + $0x4] sm:$0xf]  ;;  %v7397_v51 = vld [vmem:[%s9527_s5 + $0xa4] sm:$0xf0] }
 0x1d2   :  { %v6557_v9 = vor.u32 %v7397_v51, %v6556_v33  ;;  %v6459_v18 = vor.u32 %v7376_v48, %v6456_v8  ;;  %v7414_v33 = vld [vmem:[%s9527_s5 + $0x134] sm:$0xf]  ;;  %v6506_v51 = vld [vmem:[%s9527_s5 + $0x58] sm:$0xf0] }
 0x1d3   :  { %v2478_v15 = vadd.f32 %v2475_v60, %v2273_v7  ;;  %v7386_v48 = vld [vmem:[%s9527_s5 + $0x54] sm:$0xf] }
 0x1d4   :  { %v8715_v2 = vpop.f32.mrf.mxu2  ;;  %v8717_v3 = vpop.f32.mrf.mxu3  ;;  %3555 = vmatpush.bf16.msrb.mxu0 %v6557_v9  ;;  %3355 = vmatpush.bf16.msra.mxu3 %v6459_v18  ;;  %v6655_v9 = vor.u32 %v7414_v33, %v6652_v21  ;;  %v7405_v21 = vld [vmem:[%s9527_s5 + $0xe4] sm:$0xf0] }
 0x1d5   :  { %v2656_v16 = vadd.f32 %v8717_v3, %v8715_v2 }
 0x1d7   :  { %v2659_v53 = vadd.f32 %v2656_v16, %v2478_v15  ;;  %v6509_v16 = vor.u32 %v7386_v48, %v6506_v51 }
 0x1e8   :  { %v2844_v62 = vpop.f32.mrf.mxu0  ;;  %v2858_v63 = vpop.f32.mrf.mxu1 }
 0x1e9   :  { %v2859_v46 = vadd.f32 %v2858_v63, %v2844_v62  ;;  %v6569_v62 = vor.u32 %v7398_v40, %v6566_v59  ;;  %v6454_v63 = vld [vmem:[%s9527_s5] sm:$0xf]  ;;  %v7387_v59 = vld [vmem:[%s9527_s5 + $0x54] sm:$0xf0] }
 0x1ea   :  { %v6455_v31 = vor.u32 %v7377_v0, %v6454_v63  ;;  %v6650_v63 = vld [vmem:[%s9527_s5 + $0x130] sm:$0xf]  ;;  %v7415_v0 = vld [vmem:[%s9527_s5 + $0x134] sm:$0xf0] }
 0x1eb   :  { %v2863_v4 = vadd.f32 %v2859_v46, %v2658_v32  ;;  %3568 = vmatpush.bf16.msrb.mxu1 %v6569_v62  ;;  %v6525_v46 = vor.u32 %v7390_v54, %v6522_v13  ;;  %v6541_v32 = vor.u32 %v7393_v23, %v6540_v41  ;;  %v6545_v62 = vor.u32 %v7392_v55, %v6542_v44  ;;  %v7413_v13 = vld [vmem:[%s9527_s5 + $0x124] sm:$0xf0]  ;;  %v7410_v41 = vld [vmem:[%s9527_s5 + $0x114] sm:$0xf]  ;;  %v6636_v23 = vld [vmem:[%s9527_s5 + $0x118] sm:$0xf0] }
 0x1ec   :  { %v3025_v24 = vpop.f32.mrf.mxu2  ;;  %v3039_v25 = vpop.f32.mrf.mxu3  ;;  %3341 = vmatpush.bf16.msra.mxu2 %v6455_v31  ;;  %v6651_v6 = vor.u32 %v7415_v0, %v6650_v63  ;;  %v6505_v54 = vor.u32 %v7387_v59, %v6504_v58  ;;  %v7409_v44 = vld [vmem:[%s9527_s5 + $0x104] sm:$0xf0]  ;;  %v6608_v63 = vld [vmem:[%s9527_s5 + $0xf8] sm:$0xf0] }
 0x1ed   :  { %v3040_v61 = vadd.f32 %v3039_v25, %v3025_v24  ;;  %v7395_v24 = vld [vmem:[%s9527_s5 + $0x94] sm:$0xf0]  ;;  %v7394_v25 = vld [vmem:[%s9527_s5 + $0x94] sm:$0xf]  ;;  %3467 = vmatpush.bf16.msrb.mxu3 %v6525_v46  ;;  %v6639_v46 = vor.u32 %v7410_v41, %v6636_v23 }
 0x1ee   :  { %v6549_v2 = vor.u32 %v7395_v24, %v6548_v14  ;;  %v6553_v47 = vor.u32 %v7394_v25, %v6550_v27  ;;  %v7412_v14 = vld [vmem:[%s9527_s5 + $0x124] sm:$0xf]  ;;  %v6644_v24 = vld [vmem:[%s9527_s5 + $0x128] sm:$0xf0] }
 0x1ef   :  { %v3044_v17 = vadd.f32 %v3040_v61, %v2863_v4  ;;  %3569 = vmatpush.bf16.msrb.mxu1 %v6561_v11  ;;  %v6517_v61 = vor.u32 %v7388_v1, %v6514_v29  ;;  %v6496_v11 = vld [vmem:[%s9527_s5 + $0x40] sm:$0xf]  ;;  %v6498_v27 = vld [vmem:[%s9527_s5 + $0x48] sm:$0xf0] }
 0x1f0   :  { %v2846_v39 = vpop.f32.mrf.mxu0  ;;  %v2860_v26 = vpop.f32.mrf.mxu1  ;;  %3556 = vmatpush.bf16.msrb.mxu0 %v6549_v2  ;;  %3453 = vmatpush.bf16.msrb.mxu2 %v6521_v37  ;;  %v7411_v37 = vld [vmem:[%s9527_s5 + $0x114] sm:$0xf0] }
 0x1f1   :  { %v2861_v3 = vadd.f32 %v2860_v26, %v2846_v39  ;;  %v6512_v39 = vld [vmem:[%s9527_s5 + $0x60] sm:$0xf]  ;;  %v7389_v26 = vld [vmem:[%s9527_s5 + $0x64] sm:$0xf0]  ;;  %3468 = vmatpush.bf16.msrb.mxu3 %v6517_v61  ;;  %v7407_v61 = vld [vmem:[%s9527_s5 + $0xf4] sm:$0xf0] }
 0x1f2   :  { %v6513_v20 = vor.u32 %v7389_v26, %v6512_v39  ;;  %v6626_v26 = vld [vmem:[%s9527_s5 + $0x100] sm:$0xf] }
 0x1f3   :  { %v2864_v56 = vadd.f32 %v2861_v3, %v2659_v53  ;;  %3570 = vmatpush.bf16.msrb.mxu1 %v6553_v47  ;;  %v6627_v59 = vor.u32 %v7409_v44, %v6626_v26 }
 0x1f4   :  { %v3027_v34 = vpop.f32.mrf.mxu2  ;;  %v3041_v35 = vpop.f32.mrf.mxu3  ;;  %3557 = vmatpush.bf16.msrb.mxu0 %v6541_v32  ;;  %3454 = vmatpush.bf16.msrb.mxu2 %v6513_v20  ;;  %v6606_v32 = vld [vmem:[%s9527_s5 + $0xf0] sm:$0xf] }
 0x1f5   :  { %v3042_v40 = vadd.f32 %v3041_v35, %v3027_v34  ;;  %3469 = vmatpush.bf16.msrb.mxu3 %v6509_v16  ;;  %v6634_v35 = vld [vmem:[%s9527_s5 + $0x110] sm:$0xf] }
 0x1f7   :  { %v3045_v10 = vadd.f32 %v3042_v40, %v2864_v56  ;;  %3571 = vmatpush.bf16.msrb.mxu1 %v6545_v62  ;;  %v7408_v40 = vld [vmem:[%s9527_s5 + $0x104] sm:$0xf]  ;;  %v7406_v62 = vld [vmem:[%s9527_s5 + $0xf4] sm:$0xf] }
 0x1f8   :  { %3780 = vmatpush.bf16.msra.mxu0 %v6651_v6  ;;  %3455 = vmatpush.bf16.msrb.mxu2 %v6505_v54  ;;  %v6598_v6 = vld [vmem:[%s9527_s5 + $0xe0] sm:$0xf]  ;;  %v6607_v54 = vor.u32 %v7407_v61, %v6606_v32 }
 0x1f9   :  { %v6599_v23 = vor.u32 %v7405_v21, %v6598_v6  ;;  %v7428_v21 = vld [vmem:[%s9527_s5 + $0x1a4] sm:$0xf] }
 0x1fb   :  { %3794 = vmatpush.bf16.msra.mxu1 %v6655_v9 }
 0x208   :  { %v3220_v19 = vpop.f32.mrf.mxu0  ;;  %v3234_v22 = vpop.f32.mrf.mxu1 }
 0x209   :  { %v3235_v28 = vadd.f32 %v3234_v22, %v3220_v19  ;;  %v7384_v19 = vld [vmem:[%s9527_s5 + $0x44] sm:$0xf]  ;;  %v6643_v22 = vor.u32 %v7413_v13, %v6642_v12  ;;  %v6611_v13 = vor.u32 %v7406_v62, %v6608_v63  ;;  %v6728_v62 = vld [vmem:[%s9527_s5 + $0x1a0] sm:$0xf]  ;;  %v7429_v63 = vld [vmem:[%s9527_s5 + $0x1a4] sm:$0xf0] }
 0x20a   :  { %v6501_v34 = vor.u32 %v7384_v19, %v6498_v27  ;;  %v8960_v19 = vld [vmem:[%s9527_s5 + $0xd0] sm:$0xf] }
 0x20b   :  { %v3239_v45 = vadd.f32 %v3235_v28, %v3044_v17  ;;  %v7385_v17 = vld [vmem:[%s9527_s5 + $0x44] sm:$0xf0]  ;;  %v6647_v28 = vor.u32 %v7412_v14, %v6644_v24  ;;  %3781 = vmatpush.bf16.msra.mxu0 %v6643_v22  ;;  %v8965_v22 = vld [vmem:[%s9527_s5 + $0xd4] sm:$0xf0] }
 0x20c   :  { %v6497_v2 = vor.u32 %v7385_v17, %v6496_v11  ;;  %3470 = vmatpush.bf16.msrb.mxu3 %v6501_v34  ;;  %v6591_v32 = vor.u32 %v8965_v22, %v8960_v19 }
 0x20d   :  { %vm3241_vm13 = vcmp.ge.f32.partialorder %v3239_v45, 0.0  ;;  %v3243_v57 = vmul.f32 0.01, %v3239_v45  ;;  %3795 = vmatpush.bf16.msra.mxu1 %v6647_v28 }
 0x20e   :  { %3456 = vmatpush.bf16.msrb.mxu2 %v6497_v2  ;;  %v7431_v2 = vld [vmem:[%s9527_s5 + $0x1b4] sm:$0xf0] }
 0x20f   :  { %v3245_v60 = vsel %vm3241_vm13, %v3239_v45, %v3243_v57  ;;  %v6635_v45 = vor.u32 %v7411_v37, %v6634_v35  ;;  %vm4293_vm13 = vcmask 1043456  }
 0x210   :  { %v3253_v7 = vpack.c.bf16 %v3245_v60, %v3245_v60  ;;  %v3222_v4 = vpop.f32.mrf.mxu0  ;;  %v3236_v5 = vpop.f32.mrf.mxu1  ;;  %v6628_v60 = vld [vmem:[%s9527_s5 + $0x108] sm:$0xf0] }
 0x211   :  { %v3237_v8 = vadd.f32 %v3236_v5, %v3222_v4  ;;  %3782 = vmatpush.bf16.msra.mxu0 %v6635_v45  ;;  %3796 = vmatpush.bf16.msra.mxu1 %v6639_v46  ;;  %v6631_v0 = vor.u32 %v7408_v40, %v6628_v60 }
 0x212   :  { %v3257_v30 = vrot.slane %v3253_v7, 6 }
 0x213   :  { %v3240_v15 = vadd.f32 %v3237_v8, %v3045_v10  ;;  %v7404_v10 = vld [vmem:[%s9527_s5 + $0xe4] sm:$0xf]  ;;  %v6600_v8 = vld [vmem:[%s9527_s5 + $0xe8] sm:$0xf0] }
 0x214   :  { %v3258_v25 = vrot.slane %v3257_v30, 4  ;;  %3265 = vst.msk [vmem:[#allocation3] sm:$0xc] %vm3250_vm12, %v3257_v30  ;;  %v6603_v45 = vor.u32 %v7404_v10, %v6600_v8  ;;  %v6730_v10 = vld [vmem:[%s9527_s5 + $0x1a8] sm:$0xf0] }
 0x215   :  { %vm3242_vm3 = vcmp.ge.f32.partialorder %v3240_v15, 0.0  ;;  %v3244_v31 = vmul.f32 0.01, %v3240_v15  ;;  %3783 = vmatpush.bf16.msra.mxu0 %v6627_v59  ;;  %3797 = vmatpush.bf16.msra.mxu1 %v6631_v0  ;;  %v6733_v19 = vor.u32 %v7428_v21, %v6730_v10 }
 0x216   :  { %3266 = vst.msk [vmem:[#allocation3 + $0x4] sm:$0x3] %vm3247_vm11, %v3258_v25 }
 0x217   :  { %v3246_v3 = vsel %vm3242_vm3, %v3240_v15, %v3244_v31  ;;  %v6736_v31 = vld [vmem:[%s9527_s5 + $0x1b0] sm:$0xf]  ;;  %vm4295_vm3 = vcmask 1047556  }
 0x218   :  { %v3254_v18 = vpack.c.bf16 %v3246_v3, %v3246_v3  ;;  %v6737_v60 = vor.u32 %v7431_v2, %v6736_v31 }
 0x21a   :  { %v3259_v47 = vrot.slane %v3254_v18, 6  ;;  %v7430_v18 = vld [vmem:[%s9527_s5 + $0x1b4] sm:$0xf] }
 0x21b   :  { %v3362_v39 = vld [vmem:[#allocation3] sm:$0xf] }
 0x21c   :  { %v3260_v1 = vrot.slane %v3259_v47, 4  ;;  %3267 = vst.msk [vmem:[#allocation3 + $0x8] sm:$0xc] %vm3250_vm12, %v3259_v47  ;;  %v3367_v53 = vshrl.u32 %v3362_v39, 16  ;;  %v3370_v29 = vshll.u32 %v3362_v39, 16 }
 0x21d   :  { %v3363_v55 = vld [vmem:[#allocation3 + $0x4] sm:$0x1]  ;;  %v8920_v56 = vld [vmem:[#allocation3] sm:$0xe]  ;;  %v6738_v47 = vld [vmem:[%s9527_s5 + $0x1b8] sm:$0xf0] }
 0x21e   :  { %3268 = vst.msk [vmem:[#allocation3 + $0xc] sm:$0x3] %vm3247_vm11, %v3260_v1  ;;  %v3376_v57 = vshll.u32 %v3363_v55, 16  ;;  %v3369_v20 = vrot.slane %v3367_v53, 4  ;;  %v3372_v58 = vrot.slane %v3370_v29, 5  ;;  %v3489_v33 = vrot.slane %v3363_v55, 5  ;;  %vm4263_vm11 = vmand %vm1350_vm1, %vm4262_vm8 }
 0x21f   :  { %v8934_v7 = vld [vmem:[#allocation3 + $0x4] sm:$0x3]  ;;  %v8936_v4 = vld [vmem:[#allocation3] sm:$0xc]  ;;  %v6528_v48 = vrot.slane %v8920_v56, 9  ;;  %v3585_v55 = vshrl.u32 %v8920_v56, 16  ;;  %v6741_v61 = vor.u32 %v7430_v18, %v6738_v47 }
 0x220   :  { %v6450_v5 = vld [vmem:[#allocation3] sm:$0xf]  ;;  %v8939_v51 = vrot.slane %v3376_v57, 5  ;;  %v3373_v30 = vor.u32 %v3372_v58, %v3369_v20  ;;  %v6614_v16 = vrot.slane %v8936_v4, 10  ;;  %v3715_v17 = vrot.slane %v8934_v7, 6 }
 0x221   :  { %v3490_v25 = vsel %vm7975_vm9, %v6528_v48, %v3489_v33  ;;  %v7402_v53 = vld [vmem:[%s9527_s5 + $0xd4] sm:$0xf]  ;;  %v6592_v29 = vld [vmem:[%s9527_s5 + $0xd8] sm:$0xf0]  ;;  %v6582_v20 = vld [vmem:[%s9527_s5 + $0xc0] sm:$0xf] }
 0x222   :  { %v3504_v26 = vunpack.c.l.b16 %v3490_v25  ;;  %v3374_v1 = vrot.slane %v3373_v30, 4  ;;  %v7401_v58 = vld [vmem:[%s9527_s5 + $0xc4] sm:$0xf0]  ;;  %v3588_v0 = vshll.u32 %v8920_v56, 16  ;;  %v6595_v6 = vor.u32 %v7402_v53, %v6592_v29  ;;  %v7400_v56 = vld [vmem:[%s9527_s5 + $0xc4] sm:$0xf] }
 0x223   :  { %v7375_v9 = vld [vmem:[#allocation3 + $0x4] sm:$0xf0]  ;;  %v3587_v30 = vrot.slane %v3585_v55, 5  ;;  %v7422_v18 = vld [vmem:[%s9527_s5 + $0x174] sm:$0xf] }
 0x224   :  { %v8953_v11 = vld [vmem:[#allocation3 + $0x8] sm:$0xe]  ;;  %v6451_v14 = vor.u32 %v7375_v9, %v6450_v5  ;;  %v3379_v8 = vsel %vm7766_vm2, %v3374_v1, %v8939_v51  ;;  %v6583_v9 = vor.u32 %v7401_v58, %v6582_v20  ;;  %v6729_v51 = vor.u32 %v7429_v63, %v6728_v62  ;;  %v7426_v47 = vld [vmem:[%s9527_s5 + $0x194] sm:$0xf]  ;;  %v7421_v20 = vld [vmem:[%s9527_s5 + $0x164] sm:$0xf0] }
 0x225   :  { %v3364_v12 = vld [vmem:[#allocation3 + $0x8] sm:$0xf]  ;;  %v3365_v24 = vld [vmem:[#allocation3 + $0xc] sm:$0x1]  ;;  %v6529_v27 = vrot.slane %v8953_v11, 9  ;;  %v3590_v22 = vrot.slane %v3588_v0, 6  ;;  %v3716_v0 = vsel %vm8035_vm14, %v6614_v16, %v3715_v17 }
 0x226   :  { %v3381_v15 = vshrl.u32 %v3364_v12, 16  ;;  %v3384_v28 = vshll.u32 %v3364_v12, 16  ;;  %6484 = vmatmul.msk.bf16.vlgmr.msra.gmra.mxu2 %vm3330_vm4, %v6451_v14  ;;  %6485 = vmatmul.msk.bf16.vlgmr.msra.gmra.mxu3 %vm3330_vm4, %v6451_v14  ;;  %v3493_v3 = vrot.slane %v3365_v24, 5  ;;  %v8978_v35 = vld [vmem:[#allocation3 + $0x8] sm:$0xc]  ;;  %v3390_v41 = vshll.u32 %v3365_v24, 16 }
 0x227   :  { %3679 = vmatpush.bf16.msra.mxu2 %v6607_v54  ;;  %3693 = vmatpush.bf16.msra.mxu3 %v6611_v13  ;;  %v8983_v46 = vld [vmem:[#allocation3 + $0xc] sm:$0x3]  ;;  %v6615_v57 = vrot.slane %v8978_v35, 10  ;;  %v6584_v12 = vld [vmem:[%s9527_s5 + $0xc8] sm:$0xf0]  ;;  %v3603_v54 = vshrl.u32 %v8953_v11, 16 }
 0x228   :  { %v3383_v34 = vrot.slane %v3381_v15, 4  ;;  %v3386_v37 = vrot.slane %v3384_v28, 5  ;;  %v3494_v39 = vsel %vm7975_vm9, %v6529_v27, %v3493_v3  ;;  %v3719_v59 = vrot.slane %v8983_v46, 6  ;;  %v6692_v27 = vld [vmem:[%s9527_s5 + $0x170] sm:$0xf] }
 0x229   :  { %v3505_v44 = vunpack.c.l.b16 %v3494_v39  ;;  %v3392_v48 = vrot.slane %v3390_v41, 5  ;;  %v3594_v14 = vshrl.u32 %v8934_v7, 16  ;;  %v3606_v15 = vshll.u32 %v8953_v11, 16  ;;  %v7423_v11 = vld [vmem:[%s9527_s5 + $0x174] sm:$0xf0] }
 0x22a   :  { %v3387_v40 = vor.u32 %v3386_v37, %v3383_v34  ;;  %v3597_v24 = vshll.u32 %v8934_v7, 16  ;;  %v3605_v25 = vrot.slane %v3603_v54, 5  ;;  %v6587_v28 = vor.u32 %v7400_v56, %v6584_v12  ;;  %v6694_v37 = vld [vmem:[%s9527_s5 + $0x178] sm:$0xf0]  ;;  %v6720_v41 = vld [vmem:[%s9527_s5 + $0x190] sm:$0xf] }
 0x22b   :  { %v3506_v33 = vpack.c.b16 %v3505_v44, %v3504_v26  ;;  %3680 = vmatpush.bf16.msra.mxu2 %v6599_v23  ;;  %3694 = vmatpush.bf16.msra.mxu3 %v6603_v45  ;;  %v3608_v31 = vrot.slane %v3606_v15, 6  ;;  %v3612_v2 = vshrl.u32 %v8983_v46, 16  ;;  %v3615_v3 = vshll.u32 %v8983_v46, 16  ;;  %v7427_v46 = vld [vmem:[%s9527_s5 + $0x194] sm:$0xf0] }
 0x22c   :  { %v3388_v5 = vrot.slane %v3387_v40, 4  ;;  %v3403_v23 = vunpack.c.l.b16 %v3379_v8  ;;  %v3720_v45 = vsel %vm8035_vm14, %v6615_v57, %v3719_v59  ;;  %v6722_v39 = vld [vmem:[%s9527_s5 + $0x198] sm:$0xf0]  ;;  %v3591_v26 = vor.u32 %v3590_v22, %v3587_v30  ;;  %v6686_v62 = vld [vmem:[%s9527_s5 + $0x168] sm:$0xf0]  ;;  %vm4250_vm14 = vmand %vm1349_vm0, %vm1529_vm7 }
 0x22d   :  { %6570 = vmatmul.msk.bf16.vlgmr.msrb.gmra.mxu0 %vm3330_vm4, %v3506_v33  ;;  %6571 = vmatmul.msk.bf16.vlgmr.msrb.gmra.mxu1 %vm3330_vm4, %v3506_v33  ;;  %v3596_v1 = vrot.slane %v3594_v14, 5  ;;  %v3599_v53 = vrot.slane %v3597_v24, 6  ;;  %v3609_v29 = vor.u32 %v3608_v31, %v3605_v25  ;;  %v3614_v55 = vrot.slane %v3612_v2, 5  ;;  %v6712_v63 = vld [vmem:[%s9527_s5 + $0x180] sm:$0xf] }
 0x22e   :  { %v3393_v13 = vsel %vm7766_vm2, %v3388_v5, %v3392_v48  ;;  %4006 = vmatpush.bf16.msrb.mxu0 %v6737_v60  ;;  %4020 = vmatpush.bf16.msrb.mxu1 %v6741_v61  ;;  %v3617_v44 = vrot.slane %v3615_v3, 6  ;;  %v6693_v40 = vor.u32 %v7423_v11, %v6692_v27  ;;  %v6697_v57 = vor.u32 %v7422_v18, %v6694_v37  ;;  %v7420_v61 = vld [vmem:[%s9527_s5 + $0x164] sm:$0xf]  ;;  %v7425_v33 = vld [vmem:[%s9527_s5 + $0x184] sm:$0xf0] }
 0x22f   :  { %3681 = vmatpush.bf16.msra.mxu2 %v6591_v32  ;;  %3695 = vmatpush.bf16.msra.mxu3 %v6595_v6  ;;  %v3404_v34 = vunpack.c.l.b16 %v3393_v13  ;;  %v6684_v32 = vld [vmem:[%s9527_s5 + $0x160] sm:$0xf]  ;;  %v6721_v59 = vor.u32 %v7427_v46, %v6720_v41  ;;  %v6725_v60 = vor.u32 %v7426_v47, %v6722_v39  ;;  %v7424_v5 = vld [vmem:[%s9527_s5 + $0x184] sm:$0xf]  ;;  %v6714_v48 = vld [vmem:[%s9527_s5 + $0x188] sm:$0xf0]  ;;  %v3731_v7 = vunpack.c.l.b16 %v3720_v45 }
 0x230   :  { %v3592_v6 = vrot.slane %v3591_v26, 4  ;;  %v3610_v36 = vrot.slane %v3609_v29, 4  ;;  %v6676_v16 = vld [vmem:[%s9527_s5 + $0x150] sm:$0xf]  ;;  %v3811_v17 = vshrl.u32 %v8936_v4, 16  ;;  %v3600_v21 = vor.u32 %v3599_v53, %v3596_v1 }
 0x231   :  { %v3405_v58 = vpack.c.b16 %v3404_v34, %v3403_v23  ;;  %v6685_v10 = vor.u32 %v7421_v20, %v6684_v32  ;;  %v6689_v8 = vor.u32 %v7420_v61, %v6686_v62  ;;  %v9103_v56 = vld [vmem:[#allocation3] sm:$0x8]  ;;  %v7419_v12 = vld [vmem:[%s9527_s5 + $0x154] sm:$0xf0]  ;;  %v7418_v30 = vld [vmem:[%s9527_s5 + $0x154] sm:$0xf]  ;;  %v3730_v13 = vunpack.c.l.b16 %v3716_v0 }
 0x232   :  { %4007 = vmatpush.bf16.msrb.mxu0 %v6729_v51  ;;  %4021 = vmatpush.bf16.msrb.mxu1 %v6733_v19  ;;  %v6826_v54 = vld [vmem:[%s9527_s5 + $0x230] sm:$0xf]  ;;  %v3618_v51 = vor.u32 %v3617_v44, %v3614_v55  ;;  %v6713_v14 = vor.u32 %v7425_v33, %v6712_v63  ;;  %v6717_v15 = vor.u32 %v7424_v5, %v6714_v48  ;;  %v9114_v19 = vld [vmem:[#allocation3 + $0xc] sm:$0x7]  ;;  %v7448_v24 = vld [vmem:[%s9527_s5 + $0x234] sm:$0xf0] }
 0x233   :  { %3682 = vmatpush.bf16.msra.mxu2 %v6583_v9  ;;  %3696 = vmatpush.bf16.msra.mxu3 %v6587_v28  ;;  %v9101_v9 = vld [vmem:[#allocation3 + $0x4] sm:$0x7]  ;;  %v6678_v22 = vld [vmem:[%s9527_s5 + $0x158] sm:$0xf0]  ;;  %v9125_v27 = vld [vmem:[#allocation3 + $0x8] sm:$0x8]  ;;  %v3732_v2 = vpack.c.b16 %v3731_v7, %v3730_v13  ;;  %v6827_v3 = vor.u32 %v7448_v24, %v6826_v54  ;;  %v3601_v41 = vsel %vm8049_vm15, %v3592_v6, %v3600_v21 }
 0x234   :  { %v7447_v25 = vld [vmem:[%s9527_s5 + $0x234] sm:$0xf]  ;;  %v6828_v28 = vld [vmem:[%s9527_s5 + $0x238] sm:$0xf0]  ;;  %v6668_v31 = vld [vmem:[%s9527_s5 + $0x140] sm:$0xf]  ;;  %v6677_v23 = vor.u32 %v7419_v12, %v6676_v16  ;;  %v6681_v45 = vor.u32 %v7418_v30, %v6678_v22  ;;  %v3619_v26 = vsel %vm8049_vm15, %v3610_v36, %v3618_v51  ;;  %v3629_v6 = vunpack.c.l.b16 %v3601_v41 }
 0x235   :  { %v6831_v11 = vor.u32 %v7447_v25, %v6828_v28  ;;  %v7417_v34 = vld [vmem:[%s9527_s5 + $0x144] sm:$0xf0]  ;;  %v7416_v18 = vld [vmem:[%s9527_s5 + $0x144] sm:$0xf]  ;;  %v6670_v37 = vld [vmem:[%s9527_s5 + $0x148] sm:$0xf0]  ;;  %v3630_v33 = vunpack.c.l.b16 %v3619_v26 }
 0x236   :  { %6526 = vmatmul.msk.bf16.vlgmr.msrb.gmra.mxu2 %vm3330_vm4, %v3405_v58  ;;  %6527 = vmatmul.msk.bf16.vlgmr.msrb.gmra.mxu3 %vm3330_vm4, %v3405_v58  ;;  %v6818_v46 = vld [vmem:[%s9527_s5 + $0x220] sm:$0xf]  ;;  %v7446_v47 = vld [vmem:[%s9527_s5 + $0x224] sm:$0xf0]  ;;  %v7445_v39 = vld [vmem:[%s9527_s5 + $0x224] sm:$0xf]  ;;  %v6669_v43 = vor.u32 %v7417_v34, %v6668_v31  ;;  %v6673_v32 = vor.u32 %v7416_v18, %v6670_v37 }
 0x237   :  { %3905 = vmatpush.bf16.msrb.mxu2 %v6693_v40  ;;  %3919 = vmatpush.bf16.msrb.mxu3 %v6697_v57  ;;  %v6700_v1 = vrot.slane %v9103_v56, 11  ;;  %v3941_v53 = vrot.slane %v9101_v9, 7  ;;  %v6701_v29 = vrot.slane %v9125_v27, 11  ;;  %v6820_v55 = vld [vmem:[%s9527_s5 + $0x228] sm:$0xf0]  ;;  %v3945_v44 = vrot.slane %v9114_v19, 7 }
 0x238   :  { %4008 = vmatpush.bf16.msrb.mxu0 %v6721_v59  ;;  %4022 = vmatpush.bf16.msrb.mxu1 %v6725_v60  ;;  %v3829_v40 = vshrl.u32 %v8978_v35, 16  ;;  %v3832_v57 = vshll.u32 %v8978_v35, 16  ;;  %v6819_v20 = vor.u32 %v7446_v47, %v6818_v46  ;;  %v6823_v58 = vor.u32 %v7445_v39, %v6820_v55  ;;  %v6780_v60 = vld [vmem:[%s9527_s5 + $0x1f0] sm:$0xf]  ;;  %v7440_v35 = vld [vmem:[%s9527_s5 + $0x1f4] sm:$0xf0] }
 0x239   :  { %v3814_v59 = vshll.u32 %v8936_v4, 16  ;;  %v3838_v63 = vshrl.u32 %v9114_v19, 16  ;;  %v3841_v0 = vshll.u32 %v9114_v19, 16  ;;  %v7439_v5 = vld [vmem:[%s9527_s5 + $0x1f4] sm:$0xf]  ;;  %v3946_v36 = vsel %vm8125_vm5, %v6701_v29, %v3945_v44 }
 0x23a   :  { %v3831_v61 = vrot.slane %v3829_v40, 6  ;;  %v3834_v62 = vrot.slane %v3832_v57, 7  ;;  %v6782_v48 = vld [vmem:[%s9527_s5 + $0x1f8] sm:$0xf0]  ;;  %v6810_v7 = vld [vmem:[%s9527_s5 + $0x210] sm:$0xf]  ;;  %v3942_v31 = vsel %vm8125_vm5, %v6700_v1, %v3941_v53  ;;  %v3957_v18 = vunpack.c.l.b16 %v3946_v36 }
 0x23b   :  { %3906 = vmatpush.bf16.msrb.mxu2 %v6685_v10  ;;  %3920 = vmatpush.bf16.msrb.mxu3 %v6689_v8  ;;  %v7444_v16 = vld [vmem:[%s9527_s5 + $0x214] sm:$0xf0]  ;;  %v7443_v21 = vld [vmem:[%s9527_s5 + $0x214] sm:$0xf]  ;;  %v6812_v10 = vld [vmem:[%s9527_s5 + $0x218] sm:$0xf0]  ;;  %v3956_v47 = vunpack.c.l.b16 %v3942_v31 }
 0x23c   :  { %4009 = vmatpush.bf16.msrb.mxu0 %v6713_v14  ;;  %4023 = vmatpush.bf16.msrb.mxu1 %v6717_v15  ;;  %v3813_v8 = vrot.slane %v3811_v17, 6  ;;  %v3816_v12 = vrot.slane %v3814_v59, 7  ;;  %v3820_v30 = vshrl.u32 %v9101_v9, 16  ;;  %v3823_v54 = vshll.u32 %v9101_v9, 16  ;;  %v6772_v19 = vld [vmem:[%s9527_s5 + $0x1e0] sm:$0xf] }
 0x23d   :  { %6656 = vmatmul.msk.bf16.vlgmr.msra.gmra.mxu0 %vm3330_vm4, %v3732_v2  ;;  %6657 = vmatmul.msk.bf16.vlgmr.msra.gmra.mxu1 %vm3330_vm4, %v3732_v2  ;;  %v3840_v13 = vrot.slane %v3838_v63, 6  ;;  %v3843_v51 = vrot.slane %v3841_v0, 7  ;;  %v6781_v14 = vor.u32 %v7440_v35, %v6780_v60  ;;  %v6785_v15 = vor.u32 %v7439_v5, %v6782_v48  ;;  %v7438_v4 = vld [vmem:[%s9527_s5 + $0x1e4] sm:$0xf0]  ;;  %v7437_v9 = vld [vmem:[%s9527_s5 + $0x1e4] sm:$0xf] }
 0x23e   :  { %v3631_v17 = vpack.c.b16 %v3630_v33, %v3629_v6  ;;  %v6811_v22 = vor.u32 %v7444_v16, %v6810_v7  ;;  %v6815_v24 = vor.u32 %v7443_v21, %v6812_v10  ;;  %v6774_v25 = vld [vmem:[%s9527_s5 + $0x1e8] sm:$0xf0]  ;;  %v6802_v28 = vld [vmem:[%s9527_s5 + $0x200] sm:$0xf]  ;;  %v3835_v2 = vor.u32 %v3834_v62, %v3831_v61  ;;  %v6764_v46 = vld [vmem:[%s9527_s5 + $0x1d0] sm:$0xf] }
 0x23f   :  { %3907 = vmatpush.bf16.msrb.mxu2 %v6677_v23  ;;  %3921 = vmatpush.bf16.msrb.mxu3 %v6681_v45  ;;  %v6804_v34 = vld [vmem:[%s9527_s5 + $0x208] sm:$0xf0]  ;;  %v3822_v42 = vrot.slane %v3820_v30, 6  ;;  %v3817_v37 = vor.u32 %v3816_v12, %v3813_v8  ;;  %v3825_v41 = vrot.slane %v3823_v54, 7  ;;  %v6773_v23 = vor.u32 %v7438_v4, %v6772_v19  ;;  %v7436_v1 = vld [vmem:[%s9527_s5 + $0x1d4] sm:$0xf0] }
 0x240   :  { %4210 = vmatpush.bf16.msra.mxu0 %v6827_v3  ;;  %4224 = vmatpush.bf16.msra.mxu1 %v6831_v11  ;;  %v7442_v3 = vld [vmem:[%s9527_s5 + $0x204] sm:$0xf0]  ;;  %v7441_v11 = vld [vmem:[%s9527_s5 + $0x204] sm:$0xf]  ;;  %v6777_v45 = vor.u32 %v7437_v9, %v6774_v25  ;;  %v7435_v53 = vld [vmem:[%s9527_s5 + $0x1d4] sm:$0xf]  ;;  %v3844_v44 = vor.u32 %v3843_v51, %v3840_v13 }
 0x241   :  { %v6803_v39 = vor.u32 %v7442_v3, %v6802_v28  ;;  %v6807_v26 = vor.u32 %v7441_v11, %v6804_v34  ;;  %v6766_v29 = vld [vmem:[%s9527_s5 + $0x1d8] sm:$0xf0]  ;;  %v3836_v55 = vrot.slane %v3835_v2, 4  ;;  %v3818_v40 = vrot.slane %v3817_v37, 4  ;;  %v7434_v59 = vld [vmem:[%s9527_s5 + $0x1c4] sm:$0xf0] }
 0x242   :  { %v3826_v57 = vor.u32 %v3825_v41, %v3822_v42  ;;  %v7433_v60 = vld [vmem:[%s9527_s5 + $0x1c4] sm:$0xf]  ;;  %v6758_v61 = vld [vmem:[%s9527_s5 + $0x1c8] sm:$0xf0]  ;;  %v4035_v63 = vld [vmem:[#allocation3 + $0xc] sm:$0xf] }
 0x243   :  { %3908 = vmatpush.bf16.msrb.mxu2 %v6669_v43  ;;  %3922 = vmatpush.bf16.msrb.mxu3 %v6673_v32  ;;  %v3958_v43 = vpack.c.b16 %v3957_v18, %v3956_v47  ;;  %v6765_v32 = vor.u32 %v7436_v1, %v6764_v46  ;;  %v3845_v62 = vsel %vm8139_vm6, %v3836_v55, %v3844_v44  ;;  %v4034_v48 = vld [vmem:[#allocation3 + $0x4] sm:$0xf]  ;;  %v4055_v7 = vshrl.u32 %v4035_v63, 16  ;;  %v7432_v12 = vld [vmem:[#allocation3 + $0x8] sm:$0xf0]  ;;  %v7464_v1 = vld [vmem:[%s9529_s7 + $0x68] sm:$0xff] }
 0x244   :  { %4211 = vmatpush.bf16.msra.mxu0 %v6819_v20  ;;  %4225 = vmatpush.bf16.msra.mxu1 %v6823_v58  ;;  %v6769_v20 = vor.u32 %v7435_v53, %v6766_v29  ;;  %v6756_v58 = vld [vmem:[%s9527_s5 + $0x1c0] sm:$0xf]  ;;  %v3827_v0 = vsel %vm8139_vm6, %v3818_v40, %v3826_v57  ;;  %v6761_v33 = vor.u32 %v7433_v60, %v6758_v61  ;;  %v3856_v5 = vunpack.c.l.b16 %v3845_v62  ;;  %v6798_v51 = vld [vmem:[#allocation3 + $0x4] sm:$0xf]  ;;  %v7458_v42 = vld [vmem:[%s9529_s7 + $0x38] sm:$0xff] }
 0x245   :  { %v6757_v35 = vor.u32 %v7434_v59, %v6756_v58  ;;  %v3855_v6 = vunpack.c.l.b16 %v3827_v0  ;;  %v4042_v36 = vshrl.u32 %v4034_v48, 16  ;;  %v4057_v21 = vrot.slane %v4055_v7, 7  ;;  %v7466_v37 = vld [vmem:[%s9529_s7 + $0x78] sm:$0xff]  ;;  %v7457_v47 = vld [vmem:[%s9529_s7 + $0x30] sm:$0xff]  ;;  %v4254_v40 = vld [vmem:[#allocation4] sm:$0x11] }
 0x246   :  { %6612 = vmatmul.msk.bf16.vlgmr.msra.gmra.mxu2 %vm3330_vm4, %v3631_v17  ;;  %6613 = vmatmul.msk.bf16.vlgmr.msra.gmra.mxu3 %vm3330_vm4, %v3631_v17  ;;  %v4050_v50 = vshrl.u32 %v9125_v27, 16  ;;  %v4058_v8 = vshll.u32 %v4035_v63, 16  ;;  %v4037_v30 = vshrl.u32 %v9103_v56, 16  ;;  %v4045_v54 = vshll.u32 %v4034_v48, 16  ;;  %v4265_v61 = vld [vmem:[#allocation4 + $0x8] sm:$0x11] }
 0x247   :  { %4121 = vmatpush.bf16.msra.mxu2 %v6781_v14  ;;  %4135 = vmatpush.bf16.msra.mxu3 %v6785_v15  ;;  %v3857_v16 = vpack.c.b16 %v3856_v5, %v3855_v6  ;;  %v4044_v10 = vrot.slane %v4042_v36, 7  ;;  %v6799_v15 = vor.u32 %v7432_v12, %v6798_v51  ;;  %vm4251_vm15 = vsmask.f32 4352  ;;  %v4268_v62 = vld [vmem:[#allocation4 + $0x18] sm:$0x11] }
 0x248   :  { %4212 = vmatpush.bf16.msra.mxu0 %v6811_v22  ;;  %4226 = vmatpush.bf16.msra.mxu1 %v6815_v24  ;;  %v4060_v13 = vor.u32 %v4058_v8, %v4057_v21  ;;  %v6745_v14 = vrot.slane %v4050_v50, 11  ;;  %v6744_v4 = vrot.slane %v4037_v30, 11  ;;  %vm4260_vm5 = vsmask.f32 7938  ;;  %vm4252_vm6 = vmand %vm1350_vm1, %vm4251_vm15  ;;  %v7455_v21 = vld [vmem:[%s9529_s7 + $0x20] sm:$0xff] }
 0x249   :  { %v4047_v19 = vor.u32 %v4045_v54, %v4044_v10  ;;  %vm4261_vm7 = vmand %vm1349_vm0, %vm4260_vm5  ;;  %v7463_v50 = vld [vmem:[%s9529_s7 + $0x60] sm:$0xff]  ;;  %v4257_v12 = vld [vmem:[#allocation4 + $0x10] sm:$0x11] }
 0x24a   :  { %v4061_v17 = vsel %vm8258_vm10, %v6745_v14, %v4060_v13  ;;  %vm4264_vm12 = vmor %vm4263_vm11, %vm4261_vm7  ;;  %v7454_v54 = vld [vmem:[%s9529_s7 + $0x18] sm:$0xff] }
 0x24b   :  { %4122 = vmatpush.bf16.msra.mxu2 %v6773_v23  ;;  %4136 = vmatpush.bf16.msra.mxu3 %v6777_v45  ;;  %v4048_v27 = vsel %vm8258_vm10, %v6744_v4, %v4047_v19  ;;  %v4072_v22 = vunpack.c.l.b16 %v4061_v17  ;;  %vm9319_vm10 = vmor %vm4252_vm6, %vm4250_vm14  ;;  %v4266_v5 = vsel %vm4264_vm12, 0, %v4265_v61  ;;  %v4269_v48 = vsel %vm4264_vm12, 0, %v4268_v62  ;;  %v7462_v13 = vld [vmem:[%s9529_s7 + $0x58] sm:$0xff]  ;;  %v7472_v61 = vld [vmem:[%s9529_s7 + $0xa8] sm:$0xff] }
 0x24c   :  { %4213 = vmatpush.bf16.msra.mxu0 %v6803_v39  ;;  %4227 = vmatpush.bf16.msra.mxu1 %v6807_v26  ;;  %v4071_v24 = vunpack.c.l.b16 %v4048_v27  ;;  %v7465_v39 = vld [vmem:[%s9529_s7 + $0x70] sm:$0xff]  ;;  %v7456_v26 = vld [vmem:[%s9529_s7 + $0x28] sm:$0xff]  ;;  %v4255_v60 = vsel %vm9319_vm10, 0, %v4254_v40  ;;  %4267 = vst [vmem:[#allocation4 + $0x8] sm:$0x11] %v4266_v5  ;;  %v4258_v51 = vsel %vm9319_vm10, 0, %v4257_v12  ;;  %vm9429_vm14 = vmand %vm4295_vm3, %vm4262_vm8 }
 0x24d   :  { %6742 = vmatmul.msk.bf16.vlgmr.msrb.gmra.mxu0 %vm3330_vm4, %v3958_v43  ;;  %6743 = vmatmul.msk.bf16.vlgmr.msrb.gmra.mxu1 %vm3330_vm4, %v3958_v43  ;;  %v3279_v43 = vld [vmem:[%s9530_s6] sm:$0x3]  ;;  %4256 = vst [vmem:[#allocation4] sm:$0x11] %v4255_v60  ;;  %v7498_v60 = vld [vmem:[%s9529_s7 + $0x178] sm:$0xff]  ;;  %v7497_v5 = vld [vmem:[%s9529_s7 + $0x170] sm:$0xff] }
 0x24e   :  { %v4073_v56 = vpack.c.b16 %v4072_v22, %v4071_v24  ;;  %v3282_v58 = vperm.slane %v3279_v43, 1  ;;  %4270 = vst [vmem:[#allocation4 + $0x18] sm:$0x11] %v4269_v48  ;;  %v7451_v40 = vld [vmem:[%s9529_s7] sm:$0xff] }
 0x24f   :  { %4123 = vmatpush.bf16.msra.mxu2 %v6765_v32  ;;  %4137 = vmatpush.bf16.msra.mxu3 %v6769_v20  ;;  %v3281_v20 = vperm.slane %v3279_v43, 0  ;;  %4259 = vst [vmem:[#allocation4 + $0x10] sm:$0x11] %v4258_v51 }
 0x253   :  { %4124 = vmatpush.bf16.msra.mxu2 %v6757_v35  ;;  %4138 = vmatpush.bf16.msra.mxu3 %v6761_v33 }
 0x256   :  { %6698 = vmatmul.msk.bf16.vlgmr.msrb.gmra.mxu2 %vm3330_vm4, %v3857_v16  ;;  %6699 = vmatmul.msk.bf16.vlgmr.msrb.gmra.mxu3 %vm3330_vm4, %v3857_v16 }
 0x257   :  { %4454 = vmatpush.bf16.msrb.mxu2 %v7458_v42  ;;  %4468 = vmatpush.bf16.msrb.mxu3 %v7466_v37  ;;  %v7474_v42 = vld [vmem:[%s9529_s7 + $0xb8] sm:$0xff] }
 0x258   :  { %4651 = vmatpush.bf16.msrb.mxu0 %v7474_v42 }
 0x25b   :  { %4455 = vmatpush.bf16.msrb.mxu2 %v7457_v47  ;;  %4469 = vmatpush.bf16.msrb.mxu3 %v7465_v39 }
 0x25d   :  { %6832 = vmatmul.msk.bf16.vlgmr.msra.gmra.mxu0 %vm3330_vm4, %v6799_v15  ;;  %6833 = vmatmul.msk.bf16.vlgmr.msra.gmra.mxu1 %vm3330_vm4, %v6799_v15 }
 0x25f   :  { %4456 = vmatpush.bf16.msrb.mxu2 %v7456_v26  ;;  %4470 = vmatpush.bf16.msrb.mxu3 %v7464_v1 }
 0x263   :  { %4457 = vmatpush.bf16.msrb.mxu2 %v7455_v21  ;;  %4471 = vmatpush.bf16.msrb.mxu3 %v7463_v50 }
 0x266   :  { %6786 = vmatmul.msk.bf16.vlgmr.msra.gmra.mxu2 %vm3330_vm4, %v4073_v56  ;;  %6787 = vmatmul.msk.bf16.vlgmr.msra.gmra.mxu3 %vm3330_vm4, %v4073_v56  ;;  %vm9417_vm4 = vmand %vm4293_vm13, %vm4260_vm5 }
 0x267   :  { %4458 = vmatpush.bf16.msrb.mxu2 %v7454_v54  ;;  %4472 = vmatpush.bf16.msrb.mxu3 %v7462_v13  ;;  %vm4297_vm15 = vmor %vm9429_vm14, %vm9417_vm4 }
 0x2a9   :  { %v3343_v9 = vpop.f32.mrf.mxu2  ;;  %v3357_v25 = vpop.f32.mrf.mxu3 }
 0x2aa   :  { %v9269_v28 = vpop.f32.mrf.mxu0  ;;  %v9271_v31 = vpop.f32.mrf.mxu1  ;;  %v3344_v35 = vadd.f32 %v3343_v9, %v3281_v20  ;;  %v3358_v33 = vadd.f32 %v3357_v25, %v3282_v58 }
 0x2b1   :  { %v9273_v2 = vpop.f32.mrf.mxu2  ;;  %v9275_v3 = vpop.f32.mrf.mxu3 }
 0x2b2   :  { %v9277_v11 = vpop.f32.mrf.mxu0  ;;  %v9279_v52 = vpop.f32.mrf.mxu1  ;;  %v3346_v30 = vadd.f32 %v9273_v2, %v3281_v20  ;;  %v3360_v14 = vadd.f32 %v9275_v3, %v3282_v58  ;;  %v7461_v2 = vld [vmem:[%s9529_s7 + $0x50] sm:$0xff] }
 0x2b3   :  { %4473 = vmatpush.bf16.msrb.mxu3 %v7461_v2  ;;  %v4301_v2 = vld [vmem:[#allocation4 + $0x8] sm:$0x11] }
 0x2b9   :  { %v3458_v34 = vpop.f32.mrf.mxu2  ;;  %v3472_v18 = vpop.f32.mrf.mxu3 }
 0x2ba   :  { %v9287_v41 = vpop.f32.mrf.mxu0  ;;  %v9289_v23 = vpop.f32.mrf.mxu1  ;;  %v3477_v7 = vadd.f32 %v3458_v34, %v3344_v35  ;;  %v3478_v6 = vadd.f32 %v3472_v18, %v3358_v33  ;;  %v7489_v33 = vld [vmem:[%s9529_s7 + $0x130] sm:$0xff] }
 0x2bc   :  { %v3578_v10 = vadd.f32 %v9269_v28, %v3477_v7  ;;  %v3579_v8 = vadd.f32 %v9271_v31, %v3478_v6  ;;  %v7453_v31 = vld [vmem:[%s9529_s7 + $0x10] sm:$0xff]  ;;  %v7471_v6 = vld [vmem:[%s9529_s7 + $0xa0] sm:$0xff] }
 0x2bd   :  { %4459 = vmatpush.bf16.msrb.mxu2 %v7453_v31 }
 0x2c1   :  { %v9291_v45 = vpop.f32.mrf.mxu2  ;;  %v9293_v46 = vpop.f32.mrf.mxu3 }
 0x2c2   :  { %v9307_v55 = vpop.f32.mrf.mxu0  ;;  %v9309_v44 = vpop.f32.mrf.mxu1  ;;  %v3479_v27 = vadd.f32 %v9291_v45, %v3346_v30  ;;  %v3480_v22 = vadd.f32 %v9293_v46, %v3360_v14  ;;  %v7473_v45 = vld [vmem:[%s9529_s7 + $0xb0] sm:$0xff]  ;;  %v7488_v14 = vld [vmem:[%s9529_s7 + $0x128] sm:$0xff] }
 0x2c3   :  { %v7481_v46 = vld [vmem:[%s9529_s7 + $0xf0] sm:$0xff]  ;;  %4652 = vmatpush.bf16.msrb.mxu0 %v7473_v45 }
 0x2c4   :  { %v3580_v28 = vadd.f32 %v9277_v11, %v3479_v27  ;;  %v3581_v3 = vadd.f32 %v9279_v52, %v3480_v22  ;;  %v7482_v11 = vld [vmem:[%s9529_s7 + $0xf8] sm:$0xff]  ;;  %v7460_v52 = vld [vmem:[%s9529_s7 + $0x48] sm:$0xff] }
 0x2c5   :  { %4665 = vmatpush.bf16.msrb.mxu1 %v7482_v11  ;;  %4474 = vmatpush.bf16.msrb.mxu3 %v7460_v52  ;;  %v7470_v22 = vld [vmem:[%s9529_s7 + $0x98] sm:$0xff]  ;;  %v7477_v52 = vld [vmem:[%s9529_s7 + $0xd0] sm:$0xff] }
 0x2c7   :  { %4653 = vmatpush.bf16.msrb.mxu0 %v7472_v61 }
 0x2c9   :  { %v3684_v53 = vpop.f32.mrf.mxu2  ;;  %v3698_v29 = vpop.f32.mrf.mxu3  ;;  %4666 = vmatpush.bf16.msrb.mxu1 %v7481_v46 }
 0x2ca   :  { %v4011_v63 = vpop.f32.mrf.mxu0  ;;  %v4025_v0 = vpop.f32.mrf.mxu1  ;;  %v3703_v15 = vadd.f32 %v3684_v53, %v3578_v10  ;;  %v3704_v19 = vadd.f32 %v3698_v29, %v3579_v8 }
 0x2cb   :  { %4654 = vmatpush.bf16.msrb.mxu0 %v7471_v6 }
 0x2cc   :  { %v3804_v9 = vadd.f32 %v9287_v41, %v3703_v15  ;;  %v3805_v25 = vadd.f32 %v9289_v23, %v3704_v19  ;;  %v7452_v41 = vld [vmem:[%s9529_s7 + $0x8] sm:$0xff] }
 0x2cd   :  { %4460 = vmatpush.bf16.msrb.mxu2 %v7452_v41  ;;  %v7496_v15 = vld [vmem:[%s9529_s7 + $0x168] sm:$0xff]  ;;  %v7469_v41 = vld [vmem:[%s9529_s7 + $0x90] sm:$0xff] }
 0x2cf   :  { %4655 = vmatpush.bf16.msrb.mxu0 %v7470_v22 }
 0x2d1   :  { %v3686_v57 = vpop.f32.mrf.mxu2  ;;  %v9316_v32 = vpop.f32.mrf.mxu3  ;;  %4461 = vmatpush.bf16.msrb.mxu2 %v7451_v40 }
 0x2d2   :  { %v9347_v4 = vpop.f32.mrf.mxu0  ;;  %v9349_v17 = vpop.f32.mrf.mxu1  ;;  %v3705_v37 = vadd.f32 %v3686_v57, %v3580_v28  ;;  %v3706_v23 = vadd.f32 %v9316_v32, %v3581_v3  ;;  %v7459_v57 = vld [vmem:[%s9529_s7 + $0x40] sm:$0xff] }
 0x2d3   :  { %4475 = vmatpush.bf16.msrb.mxu3 %v7459_v57  ;;  %v7487_v3 = vld [vmem:[%s9529_s7 + $0x120] sm:$0xff]  ;;  %4656 = vmatpush.bf16.msrb.mxu0 %v7469_v41 }
 0x2d4   :  { %v3806_v53 = vadd.f32 %v9307_v55, %v3705_v37  ;;  %v3807_v32 = vadd.f32 %v9309_v44, %v3706_v23  ;;  %v7490_v55 = vld [vmem:[%s9529_s7 + $0x138] sm:$0xff]  ;;  %v7480_v44 = vld [vmem:[%s9529_s7 + $0xe8] sm:$0xff] }
 0x2d5   :  { %4832 = vmatpush.bf16.msra.mxu2 %v7490_v55  ;;  %4667 = vmatpush.bf16.msrb.mxu1 %v7480_v44  ;;  %v7493_v55 = vld [vmem:[%s9529_s7 + $0x150] sm:$0xff]  ;;  %v7467_v44 = vld [vmem:[%s9529_s7 + $0x80] sm:$0xff] }
 0x2d7   :  { %4846 = vmatpush.bf16.msra.mxu3 %v7498_v60 }
 0x2d9   :  { %v3910_v36 = vpop.f32.mrf.mxu2  ;;  %v3924_v16 = vpop.f32.mrf.mxu3  ;;  %4833 = vmatpush.bf16.msra.mxu2 %v7489_v33 }
 0x2da   :  { %v3929_v34 = vadd.f32 %v3910_v36, %v3804_v9  ;;  %v3930_v18 = vadd.f32 %v3924_v16, %v3805_v25  ;;  %v4215_v47 = vpop.f32.mrf.mxu0  ;;  %v4229_v39 = vpop.f32.mrf.mxu1  ;;  %v7479_v36 = vld [vmem:[%s9529_s7 + $0xe0] sm:$0xff] }
 0x2db   :  { %4847 = vmatpush.bf16.msra.mxu3 %v7497_v5  ;;  %4668 = vmatpush.bf16.msrb.mxu1 %v7479_v36  ;;  %v7484_v5 = vld [vmem:[%s9529_s7 + $0x108] sm:$0xff] }
 0x2dc   :  { %v4030_v26 = vadd.f32 %v4011_v63, %v3929_v34  ;;  %v4031_v1 = vadd.f32 %v4025_v0, %v3930_v18  ;;  %v7495_v34 = vld [vmem:[%s9529_s7 + $0x160] sm:$0xff] }
 0x2dd   :  { %4834 = vmatpush.bf16.msra.mxu2 %v7488_v14 }
 0x2df   :  { %4848 = vmatpush.bf16.msra.mxu3 %v7496_v15 }
 0x2e1   :  { %v3912_v24 = vpop.f32.mrf.mxu2  ;;  %v3926_v56 = vpop.f32.mrf.mxu3  ;;  %4835 = vmatpush.bf16.msra.mxu2 %v7487_v3 }
 0x2e2   :  { %v3931_v62 = vadd.f32 %v3912_v24, %v3806_v53  ;;  %v3932_v63 = vadd.f32 %v3926_v56, %v3807_v32  ;;  %v4217_v19 = vpop.f32.mrf.mxu0  ;;  %v7478_v24 = vld [vmem:[%s9529_s7 + $0xd8] sm:$0xff]  ;;  %v4298_v56 = vld [vmem:[#allocation4] sm:$0xff] }
 0x2e3   :  { %4669 = vmatpush.bf16.msrb.mxu1 %v7478_v24  ;;  %4849 = vmatpush.bf16.msra.mxu3 %v7495_v34  ;;  %v4307_v32 = vld [vmem:[#allocation4 + $0x18] sm:$0x11] }
 0x2e4   :  { %v4032_v50 = vadd.f32 %v9347_v4, %v3931_v62  ;;  %v4033_v10 = vadd.f32 %v9349_v17, %v3932_v63  ;;  %v4231_v4 = vpop.f32.mrf.mxu1  ;;  %v7475_v62 = vld [vmem:[%s9529_s7 + $0xc0] sm:$0xff] }
 0x2e7   :  { %4670 = vmatpush.bf16.msrb.mxu1 %v7477_v52 }
 0x2e9   :  { %v4126_v29 = vpop.f32.mrf.mxu2  ;;  %v4140_v43 = vpop.f32.mrf.mxu3 }
 0x2ea   :  { %v4145_v20 = vadd.f32 %v4126_v29, %v4030_v26  ;;  %v4146_v58 = vadd.f32 %v4140_v43, %v4031_v1  ;;  %v7486_v26 = vld [vmem:[%s9529_s7 + $0x118] sm:$0xff]  ;;  %v7468_v29 = vld [vmem:[%s9529_s7 + $0x88] sm:$0xff] }
 0x2eb   :  { %v7494_v1 = vld [vmem:[%s9529_s7 + $0x158] sm:$0xff]  ;;  %v7476_v43 = vld [vmem:[%s9529_s7 + $0xc8] sm:$0xff]  ;;  %4836 = vmatpush.bf16.msra.mxu2 %v7486_v26  ;;  %4657 = vmatpush.bf16.msrb.mxu0 %v7468_v29 }
 0x2ec   :  { %v4234_v0 = vadd.f32 %v4215_v47, %v4145_v20  ;;  %v4235_v35 = vadd.f32 %v4229_v39, %v4146_v58  ;;  %v4304_v20 = vld [vmem:[#allocation4 + $0x10] sm:$0xff]  ;;  %4850 = vmatpush.bf16.msra.mxu3 %v7494_v1  ;;  %4671 = vmatpush.bf16.msrb.mxu1 %v7476_v43 }
 0x2ed   :  { %v7485_v58 = vld [vmem:[%s9529_s7 + $0x110] sm:$0xff] }
 0x2ee   :  { %vm4238_vm0 = vcmp.ge.f32.partialorder %v4234_v0, 0.0  ;;  %v4242_v48 = vmul.f32 0.01, %v4234_v0  ;;  %vm4239_vm1 = vcmp.ge.f32.partialorder %v4235_v35, 0.0  ;;  %v4243_v7 = vmul.f32 0.01, %v4235_v35 }
 0x2ef   :  { %4837 = vmatpush.bf16.msra.mxu2 %v7485_v58  ;;  %4658 = vmatpush.bf16.msrb.mxu0 %v7467_v44 }
 0x2f0   :  { %v4246_v16 = vsel %vm4238_vm0, %v4234_v0, %v4242_v48  ;;  %v4247_v21 = vsel %vm4239_vm1, %v4235_v35, %v4243_v7  ;;  %4851 = vmatpush.bf16.msra.mxu3 %v7493_v55  ;;  %v7492_v48 = vld [vmem:[%s9529_s7 + $0x148] sm:$0xff]  ;;  %4672 = vmatpush.bf16.msrb.mxu1 %v7475_v62 }
 0x2f1   :  { %v4271_v8 = vpack.c.bf16 %v4247_v21, %v4246_v16  ;;  %v4128_v12 = vpop.f32.mrf.mxu2  ;;  %v4142_v30 = vpop.f32.mrf.mxu3 }
 0x2f2   :  { %v4147_v13 = vadd.f32 %v4128_v12, %v4032_v50  ;;  %v4148_v51 = vadd.f32 %v4142_v30, %v4033_v10  ;;  %v7491_v12 = vld [vmem:[%s9529_s7 + $0x140] sm:$0xff] }
 0x2f3   :  { %v4274_v17 = vshrl.u32 %v4271_v8, 16  ;;  %v4277_v31 = vshll.u32 %v4271_v8, 16  ;;  %4838 = vmatpush.bf16.msra.mxu2 %v7484_v5  ;;  %v7483_v8 = vld [vmem:[%s9529_s7 + $0x100] sm:$0xff] }
 0x2f4   :  { %v4236_v9 = vadd.f32 %v4217_v19, %v4147_v13  ;;  %v4237_v25 = vadd.f32 %v4231_v4, %v4148_v51  ;;  %4852 = vmatpush.bf16.msra.mxu3 %v7492_v48 }
 0x2f5   :  { %v4276_v28 = vrot.slane %v4274_v17, 7 }
 0x2f6   :  { %vm4240_vm5 = vcmp.ge.f32.partialorder %v4236_v9, 0.0  ;;  %v4244_v18 = vmul.f32 0.01, %v4236_v9  ;;  %vm4241_vm6 = vcmp.ge.f32.partialorder %v4237_v25, 0.0  ;;  %v4245_v42 = vmul.f32 0.01, %v4237_v25 }
 0x2f7   :  { %v4279_v11 = vor.u32 %v4277_v31, %v4276_v28  ;;  %v4280_v37 = vrot.slane %v4276_v28, 4  ;;  %4839 = vmatpush.bf16.msra.mxu2 %v7483_v8 }
 0x2f8   :  { %v4248_v23 = vsel %vm4240_vm5, %v4236_v9, %v4244_v18  ;;  %v4249_v45 = vsel %vm4241_vm6, %v4237_v25, %v4245_v42  ;;  %4853 = vmatpush.bf16.msra.mxu3 %v7491_v12 }
 0x2f9   :  { %v4299_v46 = vsel %vm4297_vm15, %v4279_v11, %v4298_v56  ;;  %v4302_v47 = vsel %vm9319_vm10, %v4280_v37, %v4301_v2  ;;  %v4272_v39 = vpack.c.bf16 %v4249_v45, %v4248_v23 }
 0x2fa   :  { %4300 = vst [vmem:[#allocation4] sm:$0xff] %v4299_v46  ;;  %v4487_v63 = vshrl.u32 %v4299_v46, 16  ;;  %v4490_v0 = vshll.u32 %v4299_v46, 16 }
 0x2fb   :  { %4303 = vst [vmem:[#allocation4 + $0x8] sm:$0x11] %v4302_v47  ;;  %v4282_v53 = vshrl.u32 %v4272_v39, 16  ;;  %v4285_v57 = vshll.u32 %v4272_v39, 16 }
 0x2fc   :  { %v4489_v16 = vrot.slane %v4487_v63, 4  ;;  %v4492_v59 = vrot.slane %v4490_v0, 5 }
 0x2fd   :  { %v4284_v40 = vrot.slane %v4282_v53, 7 }
 0x2fe   :  { %v4493_v30 = vor.u32 %v4492_v59, %v4489_v16 }
 0x2ff   :  { %v4287_v60 = vor.u32 %v4285_v57, %v4284_v40  ;;  %v4288_v61 = vrot.slane %v4284_v40, 4  ;;  %v7501_v57 = vld [vmem:[%s9528_s8] ss:$0 sm:$0xff] }
 0x300   :  { %v4494_v22 = vrot.slane %v4493_v30, 4 }
 0x301   :  { %v4305_v35 = vsel %vm4297_vm15, %v4287_v60, %v4304_v20  ;;  %v4308_v33 = vsel %vm9319_vm10, %v4288_v61, %v4307_v32  ;;  %v6836_v54 = vld [vmem:[#allocation4] sm:$0xf]  ;;  %v7449_v13 = vld [vmem:[#allocation4 + $0x4] sm:$0xf] }
 0x302   :  { %4306 = vst [vmem:[#allocation4 + $0x10] sm:$0xff] %v4305_v35  ;;  %v4483_v7 = vld [vmem:[#allocation4 + $0x8] sm:$0x11]  ;;  %v4501_v6 = vshrl.u32 %v4305_v35, 16  ;;  %v4504_v36 = vshll.u32 %v4305_v35, 16 }
 0x303   :  { %4309 = vst [vmem:[#allocation4 + $0x18] sm:$0x11] %v4308_v33  ;;  %v4496_v21 = vshll.u32 %v4483_v7, 16  ;;  %v4681_v31 = vld [vmem:[#allocation4] sm:$0xee]  ;;  %v4689_v52 = vrot.slane %v4483_v7, 5 }
 0x304   :  { %v4503_v50 = vrot.slane %v4501_v6, 4  ;;  %v4506_v10 = vrot.slane %v4504_v36, 5  ;;  %v7002_v41 = vrot.slane %v4681_v31, 9 }
 0x305   :  { %v4498_v15 = vrot.slane %v4496_v21, 5 }
 0x306   :  { %v4507_v19 = vor.u32 %v4506_v10, %v4503_v50  ;;  %v4690_v47 = vsel %vm7975_vm9, %v7002_v41, %v4689_v52 }
 0x307   :  { %v4499_v9 = vsel %vm7766_vm2, %v4494_v22, %v4498_v15  ;;  %v4728_v26 = vunpack.c.l.b16 %v4690_v47  ;;  %v4729_v1 = vunpack.c.h.b16 %v4690_v47 }
 0x308   :  { %v4508_v25 = vrot.slane %v4507_v19, 4  ;;  %v4547_v18 = vunpack.c.l.b16 %v4499_v9  ;;  %v4548_v11 = vunpack.c.h.b16 %v4499_v9 }
 0x309   :  { %v7450_v51 = vld [vmem:[#allocation4 + $0xc] sm:$0xf0]  ;;  %v6838_v14 = vld [vmem:[#allocation4 + $0x10] sm:$0xf0] }
 0x30a   :  { %v6837_v4 = vor.u32 %v7450_v51, %v6836_v54  ;;  %v6841_v17 = vor.u32 %v7449_v13, %v6838_v14  ;;  %v4485_v27 = vld [vmem:[#allocation4 + $0x18] sm:$0x11]  ;;  %v4682_v56 = vld [vmem:[#allocation4 + $0x10] sm:$0xee] }
 0x30b   :  { %v4510_v24 = vshll.u32 %v4485_v27, 16  ;;  %v7003_v3 = vrot.slane %v4682_v56, 9  ;;  %v4693_v34 = vrot.slane %v4485_v27, 5 }
 0x30c   :  { %4462 = vmatmul.bf16.vlgmr.msrb.gmra.mxu2 %v6837_v4  ;;  %4476 = vmatmul.bf16.vlgmr.msrb.gmra.mxu3 %v6841_v17 }
 0x30d   :  { %v4512_v28 = vrot.slane %v4510_v24, 5  ;;  %v4694_v46 = vsel %vm7975_vm9, %v7003_v3, %v4693_v34 }
 0x30e   :  { %v4730_v49 = vunpack.c.l.b16 %v4694_v46  ;;  %v4731_v39 = vunpack.c.h.b16 %v4694_v46 }
 0x30f   :  { %v4513_v2 = vsel %vm7766_vm2, %v4508_v25, %v4512_v28 }
 0x310   :  { %v4549_v42 = vunpack.c.l.b16 %v4513_v2  ;;  %v4550_v37 = vunpack.c.h.b16 %v4513_v2  ;;  %v4732_v53 = vpack.c.b16 %v4730_v49, %v4728_v26  ;;  %v4733_v29 = vpack.c.b16 %v4731_v39, %v4729_v1 }
 0x312   :  { %v4551_v23 = vpack.c.b16 %v4549_v42, %v4547_v18  ;;  %v4552_v45 = vpack.c.b16 %v4550_v37, %v4548_v11 }
 0x314   :  { %4659 = vmatmul.bf16.vlgmr.msrb.gmra.mxu0 %v4551_v23  ;;  %4673 = vmatmul.bf16.vlgmr.msrb.gmra.mxu1 %v4552_v45 }
 0x31c   :  { %4840 = vmatmul.bf16.vlgmr.msra.gmra.mxu2 %v4732_v53  ;;  %4854 = vmatmul.bf16.vlgmr.msra.gmra.mxu3 %v4733_v29 }
 0x38f   :  { %v4463_v43 = vpop.f32.mrf.mxu2  ;;  %v4477_v40 = vpop.f32.mrf.mxu3 }
 0x390   :  { %v4464_v38 = vadd.f32 %v7501_v57, %v4463_v43 }
 0x391   :  { %v4660_v32 = vpop.f32.mrf.mxu0  ;;  %v4674_v20 = vpop.f32.mrf.mxu1 }
 0x392   :  { %v4478_v60 = vadd.f32 %v4477_v40, %v4464_v38  ;;  %v4675_v61 = vadd.f32 %v4674_v20, %v4660_v32 }
 0x394   :  { %v4679_v63 = vadd.f32 %v4675_v61, %v4478_v60 }
 0x397   :  { %v4465_v58 = vpop.f32.mrf.mxu2  ;;  %v4479_v55 = vpop.f32.mrf.mxu3 }
 0x398   :  { %v4466_v0 = vadd.f32 %v7501_v57, %v4465_v58 }
 0x399   :  { %v4662_v33 = vpop.f32.mrf.mxu0  ;;  %v4676_v5 = vpop.f32.mrf.mxu1 }
 0x39a   :  { %v4480_v7 = vadd.f32 %v4479_v55, %v4466_v0  ;;  %v4677_v6 = vadd.f32 %v4676_v5, %v4662_v33 }
 0x39c   :  { %v4680_v59 = vadd.f32 %v4677_v6, %v4480_v7 }
 0x39f   :  { %v4841_v44 = vpop.f32.mrf.mxu2  ;;  %v4855_v62 = vpop.f32.mrf.mxu3 }
 0x3a0   :  { %v4856_v35 = vadd.f32 %v4855_v62, %v4841_v44 }
 0x3a2   :  { %v4860_v48 = vadd.f32 %v4856_v35, %v4679_v63 }
 0x3a4   :  { %4862 = vst [vmem:[%s9531_s9] sm:$0xff] %v4860_v48 }
 0x3a7   :  { %v4843_v36 = vpop.f32.mrf.mxu2  ;;  %v4857_v16 = vpop.f32.mrf.mxu3 }
 0x3a8   :  { %v4858_v21 = vadd.f32 %v4857_v16, %v4843_v36 }
 0x3aa   :  { %v4861_v50 = vadd.f32 %v4858_v21, %v4680_v59 }
 0x3ac   :  { %4863 = vst [vmem:[%s9531_s9 + $0x8] sm:$0xff] %v4861_v50 }

</bundles_post_ra>
